<compile_context>
chip_gen: v6e
topology: v6e:2x2x1
jax: 0.10.0
libtpu: 0.0.40
codegen_flags: <defaults>
</compile_context>

<pallas_src>
import functools

import jax
import jax.numpy as jnp
from jax import lax
from jax.experimental import pallas as pl
from jax.experimental.pallas import tpu as pltpu


def _conv2d_flat_kernel(x_ref, w_ref, b_ref, o_ref, *, W, KH, KW):
    """Direct VALID conv, whole batch per invocation, lane-flattened spatial.

    x_ref: (N, Cin, H*W + KW-1)  f32 VMEM   (H*W flattened on lanes, padded)
    w_ref: (Cout*Cin*KH*KW,)     f32 SMEM   (flattened PyTorch OIHW weights)
    b_ref: (Cout,)               f32 SMEM
    o_ref: (N, Cout, OH*W)       f32 VMEM   (W-strided output slab; wrapper
                                             drops the last KW-1 cols per row)
    """
    N, Cin, _ = x_ref.shape
    _, Cout, L = o_ref.shape          # L = OH * W

    # Whole input slab loaded once; all tap shifts stay in-register.
    x = x_ref[...]

    # Per-output-channel f32 accumulators with bias folded into the init,
    # so the epilogue is just the single fused store.
    accs = [jnp.full((N, L), b_ref[c], dtype=jnp.float32) for c in range(Cout)]

    for kh in range(KH):
        for kw in range(KW):
            s = kh * W + kw
            # Tap (kh, kw): output flat index i = oh*W + ow reads input flat
            # index i + s.  Thanks to the KW-1 wrapper padding lanes,
            # s + L <= H*W + KW - 1 for every tap, so this static slice is a
            # pure in-register lane shift of the loaded slab.
            x_s = x[:, :, s:s + L]                     # (N, Cin, L)
            for cin in range(Cin):
                x_c = x_s[:, cin, :]                   # (N, L)
                for cout in range(Cout):
                    # Scalar weight from SMEM -> VPU broadcast-FMA.
                    wv = w_ref[(cout * Cin + cin) * KH * KW + kh * KW + kw]
                    accs[cout] = accs[cout] + wv * x_c

    # Single fused lane-dense store of all output channels.
    o_ref[...] = jnp.stack(accs, axis=1)


def conv2d_pallas(x_nchw, weight_oihw, bias):
    """Conv2d forward: (N, Cin, H, W) f32 -> (N, Cout, H-KH+1, W-KW+1) f32."""
    N, Cin, H, W = x_nchw.shape
    Cout, _, KH, KW = weight_oihw.shape
    OH, OW = H - KH + 1, W - KW + 1
    L = OH * W                               # W-strided output slab length

    # Free layout plumbing in the wrapper: flatten (H, W) onto the lane axis
    # and append KW-1 padding lanes so every tap shift s in [0, (KH-1)*W+KW-1]
    # stays in-bounds (max s + L == H*W + KW - 1).
    x_flat = jnp.pad(x_nchw.reshape(N, Cin, H * W),
                     ((0, 0), (0, 0), (0, KW - 1)))
    w_flat = weight_oihw.reshape(-1)         # contiguous OIHW flatten

    kernel = functools.partial(_conv2d_flat_kernel, W=W, KH=KH, KW=KW)

    out_slab = pl.pallas_call(
        kernel,
        out_shape=jax.ShapeDtypeStruct((N, Cout, L), jnp.float32),
        # Single invocation over the whole batch: no grid, one DMA in/out.
        in_specs=[
            pl.BlockSpec(memory_space=pltpu.MemorySpace.VMEM),
            pl.BlockSpec(memory_space=pltpu.MemorySpace.SMEM),
            pl.BlockSpec(memory_space=pltpu.MemorySpace.SMEM),
        ],
        out_specs=pl.BlockSpec(memory_space=pltpu.MemorySpace.VMEM),
    )(x_flat, w_flat, bias)

    # Drop the last KW-1 columns of each output row (padding lanes only).
    return out_slab.reshape(N, Cout, OH, W)[:, :, :, :OW]


if __name__ == "__main__":
    key = jax.random.PRNGKey(0)
    kx, kwt, kb = jax.random.split(key, 3)

    # Shapes consistent with Conv2d(3, 5, 3): batch=2, Cin=3, 16x16 spatial.
    N, Cin, H, W = 2, 3, 16, 16
    Cout, KH, KW = 5, 3, 3

    x = jax.random.normal(kx, (N, Cin, H, W), dtype=jnp.float32)
    weight = 0.1 * jax.random.normal(kwt, (Cout, Cin, KH, KW), dtype=jnp.float32)
    bias = 0.1 * jax.random.normal(kb, (Cout,), dtype=jnp.float32)

    out = conv2d_pallas(x, weight, bias)
    out = jax.block_until_ready(out)

    # Reference: XLA conv with torch.nn.Conv2d semantics (VALID padding).
    ref = lax.conv_general_dilated(
        x, weight, window_strides=(1, 1), padding="VALID",
        dimension_numbers=("NCHW", "OIHW", "NCHW"),
    ) + bias[None, :, None, None]

    assert out.shape == (N, Cout, H - KH + 1, W - KW + 1)
    assert jnp.allclose(out, ref, atol=1e-4, rtol=1e-4)

    print("KERNEL_OK")
</pallas_src>

<mosaic_0001>
module attributes {stable_mosaic.version = 11 : i64} {
  func.func @_conv2d_flat_kernel(%arg0: memref<2x3x258xf32, #tpu.memory_space<vmem>>, %arg1: memref<135xf32, #tpu.memory_space<smem>>, %arg2: memref<5xf32, #tpu.memory_space<smem>>, %arg3: memref<2x5x224xf32, #tpu.memory_space<vmem>>) attributes {dimension_semantics = [], scalar_prefetch = 0 : i64, scratch_operands = 0 : i64, tpu.core_type = #tpu.core_type<tc>} {
    %c0 = arith.constant 0 : index
    %c0_0 = arith.constant 0 : index
    %c0_1 = arith.constant 0 : index
    %0 = vector.load %arg0[%c0, %c0_0, %c0_1] : memref<2x3x258xf32, #tpu.memory_space<vmem>>, vector<2x3x258xf32>
    %c0_2 = arith.constant 0 : index
    %1 = memref.load %arg2[%c0_2] : memref<5xf32, #tpu.memory_space<smem>>
    %2 = vector.broadcast %1 : f32 to vector<2x224xf32>
    %c1 = arith.constant 1 : index
    %3 = memref.load %arg2[%c1] : memref<5xf32, #tpu.memory_space<smem>>
    %4 = vector.broadcast %3 : f32 to vector<2x224xf32>
    %c2 = arith.constant 2 : index
    %5 = memref.load %arg2[%c2] : memref<5xf32, #tpu.memory_space<smem>>
    %6 = vector.broadcast %5 : f32 to vector<2x224xf32>
    %c3 = arith.constant 3 : index
    %7 = memref.load %arg2[%c3] : memref<5xf32, #tpu.memory_space<smem>>
    %8 = vector.broadcast %7 : f32 to vector<2x224xf32>
    %c4 = arith.constant 4 : index
    %9 = memref.load %arg2[%c4] : memref<5xf32, #tpu.memory_space<smem>>
    %10 = vector.broadcast %9 : f32 to vector<2x224xf32>
    %11 = vector.extract_strided_slice %0 {offsets = [0, 0, 0], sizes = [2, 3, 224], strides = [1, 1, 1]} : vector<2x3x258xf32> to vector<2x3x224xf32>
    %12 = vector.extract_strided_slice %11 {offsets = [0, 0, 0], sizes = [2, 1, 224], strides = [1, 1, 1]} : vector<2x3x224xf32> to vector<2x1x224xf32>
    %13 = vector.shape_cast %12 : vector<2x1x224xf32> to vector<2x224xf32>
    %c0_3 = arith.constant 0 : index
    %14 = memref.load %arg1[%c0_3] : memref<135xf32, #tpu.memory_space<smem>>
    %15 = vector.broadcast %14 : f32 to vector<2x224xf32>
    %16 = arith.mulf %15, %13 : vector<2x224xf32>
    %17 = arith.addf %2, %16 : vector<2x224xf32>
    %c27 = arith.constant 27 : index
    %18 = memref.load %arg1[%c27] : memref<135xf32, #tpu.memory_space<smem>>
    %19 = vector.broadcast %18 : f32 to vector<2x224xf32>
    %20 = arith.mulf %19, %13 : vector<2x224xf32>
    %21 = arith.addf %4, %20 : vector<2x224xf32>
    %c54 = arith.constant 54 : index
    %22 = memref.load %arg1[%c54] : memref<135xf32, #tpu.memory_space<smem>>
    %23 = vector.broadcast %22 : f32 to vector<2x224xf32>
    %24 = arith.mulf %23, %13 : vector<2x224xf32>
    %25 = arith.addf %6, %24 : vector<2x224xf32>
    %c81 = arith.constant 81 : index
    %26 = memref.load %arg1[%c81] : memref<135xf32, #tpu.memory_space<smem>>
    %27 = vector.broadcast %26 : f32 to vector<2x224xf32>
    %28 = arith.mulf %27, %13 : vector<2x224xf32>
    %29 = arith.addf %8, %28 : vector<2x224xf32>
    %c108 = arith.constant 108 : index
    %30 = memref.load %arg1[%c108] : memref<135xf32, #tpu.memory_space<smem>>
    %31 = vector.broadcast %30 : f32 to vector<2x224xf32>
    %32 = arith.mulf %31, %13 : vector<2x224xf32>
    %33 = arith.addf %10, %32 : vector<2x224xf32>
    %34 = vector.extract_strided_slice %11 {offsets = [0, 1, 0], sizes = [2, 1, 224], strides = [1, 1, 1]} : vector<2x3x224xf32> to vector<2x1x224xf32>
    %35 = vector.shape_cast %34 : vector<2x1x224xf32> to vector<2x224xf32>
    %c9 = arith.constant 9 : index
    %36 = memref.load %arg1[%c9] : memref<135xf32, #tpu.memory_space<smem>>
    %37 = vector.broadcast %36 : f32 to vector<2x224xf32>
    %38 = arith.mulf %37, %35 : vector<2x224xf32>
    %39 = arith.addf %17, %38 : vector<2x224xf32>
    %c36 = arith.constant 36 : index
    %40 = memref.load %arg1[%c36] : memref<135xf32, #tpu.memory_space<smem>>
    %41 = vector.broadcast %40 : f32 to vector<2x224xf32>
    %42 = arith.mulf %41, %35 : vector<2x224xf32>
    %43 = arith.addf %21, %42 : vector<2x224xf32>
    %c63 = arith.constant 63 : index
    %44 = memref.load %arg1[%c63] : memref<135xf32, #tpu.memory_space<smem>>
    %45 = vector.broadcast %44 : f32 to vector<2x224xf32>
    %46 = arith.mulf %45, %35 : vector<2x224xf32>
    %47 = arith.addf %25, %46 : vector<2x224xf32>
    %c90 = arith.constant 90 : index
    %48 = memref.load %arg1[%c90] : memref<135xf32, #tpu.memory_space<smem>>
    %49 = vector.broadcast %48 : f32 to vector<2x224xf32>
    %50 = arith.mulf %49, %35 : vector<2x224xf32>
    %51 = arith.addf %29, %50 : vector<2x224xf32>
    %c117 = arith.constant 117 : index
    %52 = memref.load %arg1[%c117] : memref<135xf32, #tpu.memory_space<smem>>
    %53 = vector.broadcast %52 : f32 to vector<2x224xf32>
    %54 = arith.mulf %53, %35 : vector<2x224xf32>
    %55 = arith.addf %33, %54 : vector<2x224xf32>
    %56 = vector.extract_strided_slice %11 {offsets = [0, 2, 0], sizes = [2, 1, 224], strides = [1, 1, 1]} : vector<2x3x224xf32> to vector<2x1x224xf32>
    %57 = vector.shape_cast %56 : vector<2x1x224xf32> to vector<2x224xf32>
    %c18 = arith.constant 18 : index
    %58 = memref.load %arg1[%c18] : memref<135xf32, #tpu.memory_space<smem>>
    %59 = vector.broadcast %58 : f32 to vector<2x224xf32>
    %60 = arith.mulf %59, %57 : vector<2x224xf32>
    %61 = arith.addf %39, %60 : vector<2x224xf32>
    %c45 = arith.constant 45 : index
    %62 = memref.load %arg1[%c45] : memref<135xf32, #tpu.memory_space<smem>>
    %63 = vector.broadcast %62 : f32 to vector<2x224xf32>
    %64 = arith.mulf %63, %57 : vector<2x224xf32>
    %65 = arith.addf %43, %64 : vector<2x224xf32>
    %c72 = arith.constant 72 : index
    %66 = memref.load %arg1[%c72] : memref<135xf32, #tpu.memory_space<smem>>
    %67 = vector.broadcast %66 : f32 to vector<2x224xf32>
    %68 = arith.mulf %67, %57 : vector<2x224xf32>
    %69 = arith.addf %47, %68 : vector<2x224xf32>
    %c99 = arith.constant 99 : index
    %70 = memref.load %arg1[%c99] : memref<135xf32, #tpu.memory_space<smem>>
    %71 = vector.broadcast %70 : f32 to vector<2x224xf32>
    %72 = arith.mulf %71, %57 : vector<2x224xf32>
    %73 = arith.addf %51, %72 : vector<2x224xf32>
    %c126 = arith.constant 126 : index
    %74 = memref.load %arg1[%c126] : memref<135xf32, #tpu.memory_space<smem>>
    %75 = vector.broadcast %74 : f32 to vector<2x224xf32>
    %76 = arith.mulf %75, %57 : vector<2x224xf32>
    %77 = arith.addf %55, %76 : vector<2x224xf32>
    %78 = vector.extract_strided_slice %0 {offsets = [0, 0, 1], sizes = [2, 3, 224], strides = [1, 1, 1]} : vector<2x3x258xf32> to vector<2x3x224xf32>
    %79 = vector.extract_strided_slice %78 {offsets = [0, 0, 0], sizes = [2, 1, 224], strides = [1, 1, 1]} : vector<2x3x224xf32> to vector<2x1x224xf32>
    %80 = vector.shape_cast %79 : vector<2x1x224xf32> to vector<2x224xf32>
    %c1_4 = arith.constant 1 : index
    %81 = memref.load %arg1[%c1_4] : memref<135xf32, #tpu.memory_space<smem>>
    %82 = vector.broadcast %81 : f32 to vector<2x224xf32>
    %83 = arith.mulf %82, %80 : vector<2x224xf32>
    %84 = arith.addf %61, %83 : vector<2x224xf32>
    %c28 = arith.constant 28 : index
    %85 = memref.load %arg1[%c28] : memref<135xf32, #tpu.memory_space<smem>>
    %86 = vector.broadcast %85 : f32 to vector<2x224xf32>
    %87 = arith.mulf %86, %80 : vector<2x224xf32>
    %88 = arith.addf %65, %87 : vector<2x224xf32>
    %c55 = arith.constant 55 : index
    %89 = memref.load %arg1[%c55] : memref<135xf32, #tpu.memory_space<smem>>
    %90 = vector.broadcast %89 : f32 to vector<2x224xf32>
    %91 = arith.mulf %90, %80 : vector<2x224xf32>
    %92 = arith.addf %69, %91 : vector<2x224xf32>
    %c82 = arith.constant 82 : index
    %93 = memref.load %arg1[%c82] : memref<135xf32, #tpu.memory_space<smem>>
    %94 = vector.broadcast %93 : f32 to vector<2x224xf32>
    %95 = arith.mulf %94, %80 : vector<2x224xf32>
    %96 = arith.addf %73, %95 : vector<2x224xf32>
    %c109 = arith.constant 109 : index
    %97 = memref.load %arg1[%c109] : memref<135xf32, #tpu.memory_space<smem>>
    %98 = vector.broadcast %97 : f32 to vector<2x224xf32>
    %99 = arith.mulf %98, %80 : vector<2x224xf32>
    %100 = arith.addf %77, %99 : vector<2x224xf32>
    %101 = vector.extract_strided_slice %78 {offsets = [0, 1, 0], sizes = [2, 1, 224], strides = [1, 1, 1]} : vector<2x3x224xf32> to vector<2x1x224xf32>
    %102 = vector.shape_cast %101 : vector<2x1x224xf32> to vector<2x224xf32>
    %c10 = arith.constant 10 : index
    %103 = memref.load %arg1[%c10] : memref<135xf32, #tpu.memory_space<smem>>
    %104 = vector.broadcast %103 : f32 to vector<2x224xf32>
    %105 = arith.mulf %104, %102 : vector<2x224xf32>
    %106 = arith.addf %84, %105 : vector<2x224xf32>
    %c37 = arith.constant 37 : index
    %107 = memref.load %arg1[%c37] : memref<135xf32, #tpu.memory_space<smem>>
    %108 = vector.broadcast %107 : f32 to vector<2x224xf32>
    %109 = arith.mulf %108, %102 : vector<2x224xf32>
    %110 = arith.addf %88, %109 : vector<2x224xf32>
    %c64 = arith.constant 64 : index
    %111 = memref.load %arg1[%c64] : memref<135xf32, #tpu.memory_space<smem>>
    %112 = vector.broadcast %111 : f32 to vector<2x224xf32>
    %113 = arith.mulf %112, %102 : vector<2x224xf32>
    %114 = arith.addf %92, %113 : vector<2x224xf32>
    %c91 = arith.constant 91 : index
    %115 = memref.load %arg1[%c91] : memref<135xf32, #tpu.memory_space<smem>>
    %116 = vector.broadcast %115 : f32 to vector<2x224xf32>
    %117 = arith.mulf %116, %102 : vector<2x224xf32>
    %118 = arith.addf %96, %117 : vector<2x224xf32>
    %c118 = arith.constant 118 : index
    %119 = memref.load %arg1[%c118] : memref<135xf32, #tpu.memory_space<smem>>
    %120 = vector.broadcast %119 : f32 to vector<2x224xf32>
    %121 = arith.mulf %120, %102 : vector<2x224xf32>
    %122 = arith.addf %100, %121 : vector<2x224xf32>
    %123 = vector.extract_strided_slice %78 {offsets = [0, 2, 0], sizes = [2, 1, 224], strides = [1, 1, 1]} : vector<2x3x224xf32> to vector<2x1x224xf32>
    %124 = vector.shape_cast %123 : vector<2x1x224xf32> to vector<2x224xf32>
    %c19 = arith.constant 19 : index
    %125 = memref.load %arg1[%c19] : memref<135xf32, #tpu.memory_space<smem>>
    %126 = vector.broadcast %125 : f32 to vector<2x224xf32>
    %127 = arith.mulf %126, %124 : vector<2x224xf32>
    %128 = arith.addf %106, %127 : vector<2x224xf32>
    %c46 = arith.constant 46 : index
    %129 = memref.load %arg1[%c46] : memref<135xf32, #tpu.memory_space<smem>>
    %130 = vector.broadcast %129 : f32 to vector<2x224xf32>
    %131 = arith.mulf %130, %124 : vector<2x224xf32>
    %132 = arith.addf %110, %131 : vector<2x224xf32>
    %c73 = arith.constant 73 : index
    %133 = memref.load %arg1[%c73] : memref<135xf32, #tpu.memory_space<smem>>
    %134 = vector.broadcast %133 : f32 to vector<2x224xf32>
    %135 = arith.mulf %134, %124 : vector<2x224xf32>
    %136 = arith.addf %114, %135 : vector<2x224xf32>
    %c100 = arith.constant 100 : index
    %137 = memref.load %arg1[%c100] : memref<135xf32, #tpu.memory_space<smem>>
    %138 = vector.broadcast %137 : f32 to vector<2x224xf32>
    %139 = arith.mulf %138, %124 : vector<2x224xf32>
    %140 = arith.addf %118, %139 : vector<2x224xf32>
    %c127 = arith.constant 127 : index
    %141 = memref.load %arg1[%c127] : memref<135xf32, #tpu.memory_space<smem>>
    %142 = vector.broadcast %141 : f32 to vector<2x224xf32>
    %143 = arith.mulf %142, %124 : vector<2x224xf32>
    %144 = arith.addf %122, %143 : vector<2x224xf32>
    %145 = vector.extract_strided_slice %0 {offsets = [0, 0, 2], sizes = [2, 3, 224], strides = [1, 1, 1]} : vector<2x3x258xf32> to vector<2x3x224xf32>
    %146 = vector.extract_strided_slice %145 {offsets = [0, 0, 0], sizes = [2, 1, 224], strides = [1, 1, 1]} : vector<2x3x224xf32> to vector<2x1x224xf32>
    %147 = vector.shape_cast %146 : vector<2x1x224xf32> to vector<2x224xf32>
    %c2_5 = arith.constant 2 : index
    %148 = memref.load %arg1[%c2_5] : memref<135xf32, #tpu.memory_space<smem>>
    %149 = vector.broadcast %148 : f32 to vector<2x224xf32>
    %150 = arith.mulf %149, %147 : vector<2x224xf32>
    %151 = arith.addf %128, %150 : vector<2x224xf32>
    %c29 = arith.constant 29 : index
    %152 = memref.load %arg1[%c29] : memref<135xf32, #tpu.memory_space<smem>>
    %153 = vector.broadcast %152 : f32 to vector<2x224xf32>
    %154 = arith.mulf %153, %147 : vector<2x224xf32>
    %155 = arith.addf %132, %154 : vector<2x224xf32>
    %c56 = arith.constant 56 : index
    %156 = memref.load %arg1[%c56] : memref<135xf32, #tpu.memory_space<smem>>
    %157 = vector.broadcast %156 : f32 to vector<2x224xf32>
    %158 = arith.mulf %157, %147 : vector<2x224xf32>
    %159 = arith.addf %136, %158 : vector<2x224xf32>
    %c83 = arith.constant 83 : index
    %160 = memref.load %arg1[%c83] : memref<135xf32, #tpu.memory_space<smem>>
    %161 = vector.broadcast %160 : f32 to vector<2x224xf32>
    %162 = arith.mulf %161, %147 : vector<2x224xf32>
    %163 = arith.addf %140, %162 : vector<2x224xf32>
    %c110 = arith.constant 110 : index
    %164 = memref.load %arg1[%c110] : memref<135xf32, #tpu.memory_space<smem>>
    %165 = vector.broadcast %164 : f32 to vector<2x224xf32>
    %166 = arith.mulf %165, %147 : vector<2x224xf32>
    %167 = arith.addf %144, %166 : vector<2x224xf32>
    %168 = vector.extract_strided_slice %145 {offsets = [0, 1, 0], sizes = [2, 1, 224], strides = [1, 1, 1]} : vector<2x3x224xf32> to vector<2x1x224xf32>
    %169 = vector.shape_cast %168 : vector<2x1x224xf32> to vector<2x224xf32>
    %c11 = arith.constant 11 : index
    %170 = memref.load %arg1[%c11] : memref<135xf32, #tpu.memory_space<smem>>
    %171 = vector.broadcast %170 : f32 to vector<2x224xf32>
    %172 = arith.mulf %171, %169 : vector<2x224xf32>
    %173 = arith.addf %151, %172 : vector<2x224xf32>
    %c38 = arith.constant 38 : index
    %174 = memref.load %arg1[%c38] : memref<135xf32, #tpu.memory_space<smem>>
    %175 = vector.broadcast %174 : f32 to vector<2x224xf32>
    %176 = arith.mulf %175, %169 : vector<2x224xf32>
    %177 = arith.addf %155, %176 : vector<2x224xf32>
    %c65 = arith.constant 65 : index
    %178 = memref.load %arg1[%c65] : memref<135xf32, #tpu.memory_space<smem>>
    %179 = vector.broadcast %178 : f32 to vector<2x224xf32>
    %180 = arith.mulf %179, %169 : vector<2x224xf32>
    %181 = arith.addf %159, %180 : vector<2x224xf32>
    %c92 = arith.constant 92 : index
    %182 = memref.load %arg1[%c92] : memref<135xf32, #tpu.memory_space<smem>>
    %183 = vector.broadcast %182 : f32 to vector<2x224xf32>
    %184 = arith.mulf %183, %169 : vector<2x224xf32>
    %185 = arith.addf %163, %184 : vector<2x224xf32>
    %c119 = arith.constant 119 : index
    %186 = memref.load %arg1[%c119] : memref<135xf32, #tpu.memory_space<smem>>
    %187 = vector.broadcast %186 : f32 to vector<2x224xf32>
    %188 = arith.mulf %187, %169 : vector<2x224xf32>
    %189 = arith.addf %167, %188 : vector<2x224xf32>
    %190 = vector.extract_strided_slice %145 {offsets = [0, 2, 0], sizes = [2, 1, 224], strides = [1, 1, 1]} : vector<2x3x224xf32> to vector<2x1x224xf32>
    %191 = vector.shape_cast %190 : vector<2x1x224xf32> to vector<2x224xf32>
    %c20 = arith.constant 20 : index
    %192 = memref.load %arg1[%c20] : memref<135xf32, #tpu.memory_space<smem>>
    %193 = vector.broadcast %192 : f32 to vector<2x224xf32>
    %194 = arith.mulf %193, %191 : vector<2x224xf32>
    %195 = arith.addf %173, %194 : vector<2x224xf32>
    %c47 = arith.constant 47 : index
    %196 = memref.load %arg1[%c47] : memref<135xf32, #tpu.memory_space<smem>>
    %197 = vector.broadcast %196 : f32 to vector<2x224xf32>
    %198 = arith.mulf %197, %191 : vector<2x224xf32>
    %199 = arith.addf %177, %198 : vector<2x224xf32>
    %c74 = arith.constant 74 : index
    %200 = memref.load %arg1[%c74] : memref<135xf32, #tpu.memory_space<smem>>
    %201 = vector.broadcast %200 : f32 to vector<2x224xf32>
    %202 = arith.mulf %201, %191 : vector<2x224xf32>
    %203 = arith.addf %181, %202 : vector<2x224xf32>
    %c101 = arith.constant 101 : index
    %204 = memref.load %arg1[%c101] : memref<135xf32, #tpu.memory_space<smem>>
    %205 = vector.broadcast %204 : f32 to vector<2x224xf32>
    %206 = arith.mulf %205, %191 : vector<2x224xf32>
    %207 = arith.addf %185, %206 : vector<2x224xf32>
    %c128 = arith.constant 128 : index
    %208 = memref.load %arg1[%c128] : memref<135xf32, #tpu.memory_space<smem>>
    %209 = vector.broadcast %208 : f32 to vector<2x224xf32>
    %210 = arith.mulf %209, %191 : vector<2x224xf32>
    %211 = arith.addf %189, %210 : vector<2x224xf32>
    %212 = vector.extract_strided_slice %0 {offsets = [0, 0, 16], sizes = [2, 3, 224], strides = [1, 1, 1]} : vector<2x3x258xf32> to vector<2x3x224xf32>
    %213 = vector.extract_strided_slice %212 {offsets = [0, 0, 0], sizes = [2, 1, 224], strides = [1, 1, 1]} : vector<2x3x224xf32> to vector<2x1x224xf32>
    %214 = vector.shape_cast %213 : vector<2x1x224xf32> to vector<2x224xf32>
    %c3_6 = arith.constant 3 : index
    %215 = memref.load %arg1[%c3_6] : memref<135xf32, #tpu.memory_space<smem>>
    %216 = vector.broadcast %215 : f32 to vector<2x224xf32>
    %217 = arith.mulf %216, %214 : vector<2x224xf32>
    %218 = arith.addf %195, %217 : vector<2x224xf32>
    %c30 = arith.constant 30 : index
    %219 = memref.load %arg1[%c30] : memref<135xf32, #tpu.memory_space<smem>>
    %220 = vector.broadcast %219 : f32 to vector<2x224xf32>
    %221 = arith.mulf %220, %214 : vector<2x224xf32>
    %222 = arith.addf %199, %221 : vector<2x224xf32>
    %c57 = arith.constant 57 : index
    %223 = memref.load %arg1[%c57] : memref<135xf32, #tpu.memory_space<smem>>
    %224 = vector.broadcast %223 : f32 to vector<2x224xf32>
    %225 = arith.mulf %224, %214 : vector<2x224xf32>
    %226 = arith.addf %203, %225 : vector<2x224xf32>
    %c84 = arith.constant 84 : index
    %227 = memref.load %arg1[%c84] : memref<135xf32, #tpu.memory_space<smem>>
    %228 = vector.broadcast %227 : f32 to vector<2x224xf32>
    %229 = arith.mulf %228, %214 : vector<2x224xf32>
    %230 = arith.addf %207, %229 : vector<2x224xf32>
    %c111 = arith.constant 111 : index
    %231 = memref.load %arg1[%c111] : memref<135xf32, #tpu.memory_space<smem>>
    %232 = vector.broadcast %231 : f32 to vector<2x224xf32>
    %233 = arith.mulf %232, %214 : vector<2x224xf32>
    %234 = arith.addf %211, %233 : vector<2x224xf32>
    %235 = vector.extract_strided_slice %212 {offsets = [0, 1, 0], sizes = [2, 1, 224], strides = [1, 1, 1]} : vector<2x3x224xf32> to vector<2x1x224xf32>
    %236 = vector.shape_cast %235 : vector<2x1x224xf32> to vector<2x224xf32>
    %c12 = arith.constant 12 : index
    %237 = memref.load %arg1[%c12] : memref<135xf32, #tpu.memory_space<smem>>
    %238 = vector.broadcast %237 : f32 to vector<2x224xf32>
    %239 = arith.mulf %238, %236 : vector<2x224xf32>
    %240 = arith.addf %218, %239 : vector<2x224xf32>
    %c39 = arith.constant 39 : index
    %241 = memref.load %arg1[%c39] : memref<135xf32, #tpu.memory_space<smem>>
    %242 = vector.broadcast %241 : f32 to vector<2x224xf32>
    %243 = arith.mulf %242, %236 : vector<2x224xf32>
    %244 = arith.addf %222, %243 : vector<2x224xf32>
    %c66 = arith.constant 66 : index
    %245 = memref.load %arg1[%c66] : memref<135xf32, #tpu.memory_space<smem>>
    %246 = vector.broadcast %245 : f32 to vector<2x224xf32>
    %247 = arith.mulf %246, %236 : vector<2x224xf32>
    %248 = arith.addf %226, %247 : vector<2x224xf32>
    %c93 = arith.constant 93 : index
    %249 = memref.load %arg1[%c93] : memref<135xf32, #tpu.memory_space<smem>>
    %250 = vector.broadcast %249 : f32 to vector<2x224xf32>
    %251 = arith.mulf %250, %236 : vector<2x224xf32>
    %252 = arith.addf %230, %251 : vector<2x224xf32>
    %c120 = arith.constant 120 : index
    %253 = memref.load %arg1[%c120] : memref<135xf32, #tpu.memory_space<smem>>
    %254 = vector.broadcast %253 : f32 to vector<2x224xf32>
    %255 = arith.mulf %254, %236 : vector<2x224xf32>
    %256 = arith.addf %234, %255 : vector<2x224xf32>
    %257 = vector.extract_strided_slice %212 {offsets = [0, 2, 0], sizes = [2, 1, 224], strides = [1, 1, 1]} : vector<2x3x224xf32> to vector<2x1x224xf32>
    %258 = vector.shape_cast %257 : vector<2x1x224xf32> to vector<2x224xf32>
    %c21 = arith.constant 21 : index
    %259 = memref.load %arg1[%c21] : memref<135xf32, #tpu.memory_space<smem>>
    %260 = vector.broadcast %259 : f32 to vector<2x224xf32>
    %261 = arith.mulf %260, %258 : vector<2x224xf32>
    %262 = arith.addf %240, %261 : vector<2x224xf32>
    %c48 = arith.constant 48 : index
    %263 = memref.load %arg1[%c48] : memref<135xf32, #tpu.memory_space<smem>>
    %264 = vector.broadcast %263 : f32 to vector<2x224xf32>
    %265 = arith.mulf %264, %258 : vector<2x224xf32>
    %266 = arith.addf %244, %265 : vector<2x224xf32>
    %c75 = arith.constant 75 : index
    %267 = memref.load %arg1[%c75] : memref<135xf32, #tpu.memory_space<smem>>
    %268 = vector.broadcast %267 : f32 to vector<2x224xf32>
    %269 = arith.mulf %268, %258 : vector<2x224xf32>
    %270 = arith.addf %248, %269 : vector<2x224xf32>
    %c102 = arith.constant 102 : index
    %271 = memref.load %arg1[%c102] : memref<135xf32, #tpu.memory_space<smem>>
    %272 = vector.broadcast %271 : f32 to vector<2x224xf32>
    %273 = arith.mulf %272, %258 : vector<2x224xf32>
    %274 = arith.addf %252, %273 : vector<2x224xf32>
    %c129 = arith.constant 129 : index
    %275 = memref.load %arg1[%c129] : memref<135xf32, #tpu.memory_space<smem>>
    %276 = vector.broadcast %275 : f32 to vector<2x224xf32>
    %277 = arith.mulf %276, %258 : vector<2x224xf32>
    %278 = arith.addf %256, %277 : vector<2x224xf32>
    %279 = vector.extract_strided_slice %0 {offsets = [0, 0, 17], sizes = [2, 3, 224], strides = [1, 1, 1]} : vector<2x3x258xf32> to vector<2x3x224xf32>
    %280 = vector.extract_strided_slice %279 {offsets = [0, 0, 0], sizes = [2, 1, 224], strides = [1, 1, 1]} : vector<2x3x224xf32> to vector<2x1x224xf32>
    %281 = vector.shape_cast %280 : vector<2x1x224xf32> to vector<2x224xf32>
    %c4_7 = arith.constant 4 : index
    %282 = memref.load %arg1[%c4_7] : memref<135xf32, #tpu.memory_space<smem>>
    %283 = vector.broadcast %282 : f32 to vector<2x224xf32>
    %284 = arith.mulf %283, %281 : vector<2x224xf32>
    %285 = arith.addf %262, %284 : vector<2x224xf32>
    %c31 = arith.constant 31 : index
    %286 = memref.load %arg1[%c31] : memref<135xf32, #tpu.memory_space<smem>>
    %287 = vector.broadcast %286 : f32 to vector<2x224xf32>
    %288 = arith.mulf %287, %281 : vector<2x224xf32>
    %289 = arith.addf %266, %288 : vector<2x224xf32>
    %c58 = arith.constant 58 : index
    %290 = memref.load %arg1[%c58] : memref<135xf32, #tpu.memory_space<smem>>
    %291 = vector.broadcast %290 : f32 to vector<2x224xf32>
    %292 = arith.mulf %291, %281 : vector<2x224xf32>
    %293 = arith.addf %270, %292 : vector<2x224xf32>
    %c85 = arith.constant 85 : index
    %294 = memref.load %arg1[%c85] : memref<135xf32, #tpu.memory_space<smem>>
    %295 = vector.broadcast %294 : f32 to vector<2x224xf32>
    %296 = arith.mulf %295, %281 : vector<2x224xf32>
    %297 = arith.addf %274, %296 : vector<2x224xf32>
    %c112 = arith.constant 112 : index
    %298 = memref.load %arg1[%c112] : memref<135xf32, #tpu.memory_space<smem>>
    %299 = vector.broadcast %298 : f32 to vector<2x224xf32>
    %300 = arith.mulf %299, %281 : vector<2x224xf32>
    %301 = arith.addf %278, %300 : vector<2x224xf32>
    %302 = vector.extract_strided_slice %279 {offsets = [0, 1, 0], sizes = [2, 1, 224], strides = [1, 1, 1]} : vector<2x3x224xf32> to vector<2x1x224xf32>
    %303 = vector.shape_cast %302 : vector<2x1x224xf32> to vector<2x224xf32>
    %c13 = arith.constant 13 : index
    %304 = memref.load %arg1[%c13] : memref<135xf32, #tpu.memory_space<smem>>
    %305 = vector.broadcast %304 : f32 to vector<2x224xf32>
    %306 = arith.mulf %305, %303 : vector<2x224xf32>
    %307 = arith.addf %285, %306 : vector<2x224xf32>
    %c40 = arith.constant 40 : index
    %308 = memref.load %arg1[%c40] : memref<135xf32, #tpu.memory_space<smem>>
    %309 = vector.broadcast %308 : f32 to vector<2x224xf32>
    %310 = arith.mulf %309, %303 : vector<2x224xf32>
    %311 = arith.addf %289, %310 : vector<2x224xf32>
    %c67 = arith.constant 67 : index
    %312 = memref.load %arg1[%c67] : memref<135xf32, #tpu.memory_space<smem>>
    %313 = vector.broadcast %312 : f32 to vector<2x224xf32>
    %314 = arith.mulf %313, %303 : vector<2x224xf32>
    %315 = arith.addf %293, %314 : vector<2x224xf32>
    %c94 = arith.constant 94 : index
    %316 = memref.load %arg1[%c94] : memref<135xf32, #tpu.memory_space<smem>>
    %317 = vector.broadcast %316 : f32 to vector<2x224xf32>
    %318 = arith.mulf %317, %303 : vector<2x224xf32>
    %319 = arith.addf %297, %318 : vector<2x224xf32>
    %c121 = arith.constant 121 : index
    %320 = memref.load %arg1[%c121] : memref<135xf32, #tpu.memory_space<smem>>
    %321 = vector.broadcast %320 : f32 to vector<2x224xf32>
    %322 = arith.mulf %321, %303 : vector<2x224xf32>
    %323 = arith.addf %301, %322 : vector<2x224xf32>
    %324 = vector.extract_strided_slice %279 {offsets = [0, 2, 0], sizes = [2, 1, 224], strides = [1, 1, 1]} : vector<2x3x224xf32> to vector<2x1x224xf32>
    %325 = vector.shape_cast %324 : vector<2x1x224xf32> to vector<2x224xf32>
    %c22 = arith.constant 22 : index
    %326 = memref.load %arg1[%c22] : memref<135xf32, #tpu.memory_space<smem>>
    %327 = vector.broadcast %326 : f32 to vector<2x224xf32>
    %328 = arith.mulf %327, %325 : vector<2x224xf32>
    %329 = arith.addf %307, %328 : vector<2x224xf32>
    %c49 = arith.constant 49 : index
    %330 = memref.load %arg1[%c49] : memref<135xf32, #tpu.memory_space<smem>>
    %331 = vector.broadcast %330 : f32 to vector<2x224xf32>
    %332 = arith.mulf %331, %325 : vector<2x224xf32>
    %333 = arith.addf %311, %332 : vector<2x224xf32>
    %c76 = arith.constant 76 : index
    %334 = memref.load %arg1[%c76] : memref<135xf32, #tpu.memory_space<smem>>
    %335 = vector.broadcast %334 : f32 to vector<2x224xf32>
    %336 = arith.mulf %335, %325 : vector<2x224xf32>
    %337 = arith.addf %315, %336 : vector<2x224xf32>
    %c103 = arith.constant 103 : index
    %338 = memref.load %arg1[%c103] : memref<135xf32, #tpu.memory_space<smem>>
    %339 = vector.broadcast %338 : f32 to vector<2x224xf32>
    %340 = arith.mulf %339, %325 : vector<2x224xf32>
    %341 = arith.addf %319, %340 : vector<2x224xf32>
    %c130 = arith.constant 130 : index
    %342 = memref.load %arg1[%c130] : memref<135xf32, #tpu.memory_space<smem>>
    %343 = vector.broadcast %342 : f32 to vector<2x224xf32>
    %344 = arith.mulf %343, %325 : vector<2x224xf32>
    %345 = arith.addf %323, %344 : vector<2x224xf32>
    %346 = vector.extract_strided_slice %0 {offsets = [0, 0, 18], sizes = [2, 3, 224], strides = [1, 1, 1]} : vector<2x3x258xf32> to vector<2x3x224xf32>
    %347 = vector.extract_strided_slice %346 {offsets = [0, 0, 0], sizes = [2, 1, 224], strides = [1, 1, 1]} : vector<2x3x224xf32> to vector<2x1x224xf32>
    %348 = vector.shape_cast %347 : vector<2x1x224xf32> to vector<2x224xf32>
    %c5 = arith.constant 5 : index
    %349 = memref.load %arg1[%c5] : memref<135xf32, #tpu.memory_space<smem>>
    %350 = vector.broadcast %349 : f32 to vector<2x224xf32>
    %351 = arith.mulf %350, %348 : vector<2x224xf32>
    %352 = arith.addf %329, %351 : vector<2x224xf32>
    %c32 = arith.constant 32 : index
    %353 = memref.load %arg1[%c32] : memref<135xf32, #tpu.memory_space<smem>>
    %354 = vector.broadcast %353 : f32 to vector<2x224xf32>
    %355 = arith.mulf %354, %348 : vector<2x224xf32>
    %356 = arith.addf %333, %355 : vector<2x224xf32>
    %c59 = arith.constant 59 : index
    %357 = memref.load %arg1[%c59] : memref<135xf32, #tpu.memory_space<smem>>
    %358 = vector.broadcast %357 : f32 to vector<2x224xf32>
    %359 = arith.mulf %358, %348 : vector<2x224xf32>
    %360 = arith.addf %337, %359 : vector<2x224xf32>
    %c86 = arith.constant 86 : index
    %361 = memref.load %arg1[%c86] : memref<135xf32, #tpu.memory_space<smem>>
    %362 = vector.broadcast %361 : f32 to vector<2x224xf32>
    %363 = arith.mulf %362, %348 : vector<2x224xf32>
    %364 = arith.addf %341, %363 : vector<2x224xf32>
    %c113 = arith.constant 113 : index
    %365 = memref.load %arg1[%c113] : memref<135xf32, #tpu.memory_space<smem>>
    %366 = vector.broadcast %365 : f32 to vector<2x224xf32>
    %367 = arith.mulf %366, %348 : vector<2x224xf32>
    %368 = arith.addf %345, %367 : vector<2x224xf32>
    %369 = vector.extract_strided_slice %346 {offsets = [0, 1, 0], sizes = [2, 1, 224], strides = [1, 1, 1]} : vector<2x3x224xf32> to vector<2x1x224xf32>
    %370 = vector.shape_cast %369 : vector<2x1x224xf32> to vector<2x224xf32>
    %c14 = arith.constant 14 : index
    %371 = memref.load %arg1[%c14] : memref<135xf32, #tpu.memory_space<smem>>
    %372 = vector.broadcast %371 : f32 to vector<2x224xf32>
    %373 = arith.mulf %372, %370 : vector<2x224xf32>
    %374 = arith.addf %352, %373 : vector<2x224xf32>
    %c41 = arith.constant 41 : index
    %375 = memref.load %arg1[%c41] : memref<135xf32, #tpu.memory_space<smem>>
    %376 = vector.broadcast %375 : f32 to vector<2x224xf32>
    %377 = arith.mulf %376, %370 : vector<2x224xf32>
    %378 = arith.addf %356, %377 : vector<2x224xf32>
    %c68 = arith.constant 68 : index
    %379 = memref.load %arg1[%c68] : memref<135xf32, #tpu.memory_space<smem>>
    %380 = vector.broadcast %379 : f32 to vector<2x224xf32>
    %381 = arith.mulf %380, %370 : vector<2x224xf32>
    %382 = arith.addf %360, %381 : vector<2x224xf32>
    %c95 = arith.constant 95 : index
    %383 = memref.load %arg1[%c95] : memref<135xf32, #tpu.memory_space<smem>>
    %384 = vector.broadcast %383 : f32 to vector<2x224xf32>
    %385 = arith.mulf %384, %370 : vector<2x224xf32>
    %386 = arith.addf %364, %385 : vector<2x224xf32>
    %c122 = arith.constant 122 : index
    %387 = memref.load %arg1[%c122] : memref<135xf32, #tpu.memory_space<smem>>
    %388 = vector.broadcast %387 : f32 to vector<2x224xf32>
    %389 = arith.mulf %388, %370 : vector<2x224xf32>
    %390 = arith.addf %368, %389 : vector<2x224xf32>
    %391 = vector.extract_strided_slice %346 {offsets = [0, 2, 0], sizes = [2, 1, 224], strides = [1, 1, 1]} : vector<2x3x224xf32> to vector<2x1x224xf32>
    %392 = vector.shape_cast %391 : vector<2x1x224xf32> to vector<2x224xf32>
    %c23 = arith.constant 23 : index
    %393 = memref.load %arg1[%c23] : memref<135xf32, #tpu.memory_space<smem>>
    %394 = vector.broadcast %393 : f32 to vector<2x224xf32>
    %395 = arith.mulf %394, %392 : vector<2x224xf32>
    %396 = arith.addf %374, %395 : vector<2x224xf32>
    %c50 = arith.constant 50 : index
    %397 = memref.load %arg1[%c50] : memref<135xf32, #tpu.memory_space<smem>>
    %398 = vector.broadcast %397 : f32 to vector<2x224xf32>
    %399 = arith.mulf %398, %392 : vector<2x224xf32>
    %400 = arith.addf %378, %399 : vector<2x224xf32>
    %c77 = arith.constant 77 : index
    %401 = memref.load %arg1[%c77] : memref<135xf32, #tpu.memory_space<smem>>
    %402 = vector.broadcast %401 : f32 to vector<2x224xf32>
    %403 = arith.mulf %402, %392 : vector<2x224xf32>
    %404 = arith.addf %382, %403 : vector<2x224xf32>
    %c104 = arith.constant 104 : index
    %405 = memref.load %arg1[%c104] : memref<135xf32, #tpu.memory_space<smem>>
    %406 = vector.broadcast %405 : f32 to vector<2x224xf32>
    %407 = arith.mulf %406, %392 : vector<2x224xf32>
    %408 = arith.addf %386, %407 : vector<2x224xf32>
    %c131 = arith.constant 131 : index
    %409 = memref.load %arg1[%c131] : memref<135xf32, #tpu.memory_space<smem>>
    %410 = vector.broadcast %409 : f32 to vector<2x224xf32>
    %411 = arith.mulf %410, %392 : vector<2x224xf32>
    %412 = arith.addf %390, %411 : vector<2x224xf32>
    %413 = vector.extract_strided_slice %0 {offsets = [0, 0, 32], sizes = [2, 3, 224], strides = [1, 1, 1]} : vector<2x3x258xf32> to vector<2x3x224xf32>
    %414 = vector.extract_strided_slice %413 {offsets = [0, 0, 0], sizes = [2, 1, 224], strides = [1, 1, 1]} : vector<2x3x224xf32> to vector<2x1x224xf32>
    %415 = vector.shape_cast %414 : vector<2x1x224xf32> to vector<2x224xf32>
    %c6 = arith.constant 6 : index
    %416 = memref.load %arg1[%c6] : memref<135xf32, #tpu.memory_space<smem>>
    %417 = vector.broadcast %416 : f32 to vector<2x224xf32>
    %418 = arith.mulf %417, %415 : vector<2x224xf32>
    %419 = arith.addf %396, %418 : vector<2x224xf32>
    %c33 = arith.constant 33 : index
    %420 = memref.load %arg1[%c33] : memref<135xf32, #tpu.memory_space<smem>>
    %421 = vector.broadcast %420 : f32 to vector<2x224xf32>
    %422 = arith.mulf %421, %415 : vector<2x224xf32>
    %423 = arith.addf %400, %422 : vector<2x224xf32>
    %c60 = arith.constant 60 : index
    %424 = memref.load %arg1[%c60] : memref<135xf32, #tpu.memory_space<smem>>
    %425 = vector.broadcast %424 : f32 to vector<2x224xf32>
    %426 = arith.mulf %425, %415 : vector<2x224xf32>
    %427 = arith.addf %404, %426 : vector<2x224xf32>
    %c87 = arith.constant 87 : index
    %428 = memref.load %arg1[%c87] : memref<135xf32, #tpu.memory_space<smem>>
    %429 = vector.broadcast %428 : f32 to vector<2x224xf32>
    %430 = arith.mulf %429, %415 : vector<2x224xf32>
    %431 = arith.addf %408, %430 : vector<2x224xf32>
    %c114 = arith.constant 114 : index
    %432 = memref.load %arg1[%c114] : memref<135xf32, #tpu.memory_space<smem>>
    %433 = vector.broadcast %432 : f32 to vector<2x224xf32>
    %434 = arith.mulf %433, %415 : vector<2x224xf32>
    %435 = arith.addf %412, %434 : vector<2x224xf32>
    %436 = vector.extract_strided_slice %413 {offsets = [0, 1, 0], sizes = [2, 1, 224], strides = [1, 1, 1]} : vector<2x3x224xf32> to vector<2x1x224xf32>
    %437 = vector.shape_cast %436 : vector<2x1x224xf32> to vector<2x224xf32>
    %c15 = arith.constant 15 : index
    %438 = memref.load %arg1[%c15] : memref<135xf32, #tpu.memory_space<smem>>
    %439 = vector.broadcast %438 : f32 to vector<2x224xf32>
    %440 = arith.mulf %439, %437 : vector<2x224xf32>
    %441 = arith.addf %419, %440 : vector<2x224xf32>
    %c42 = arith.constant 42 : index
    %442 = memref.load %arg1[%c42] : memref<135xf32, #tpu.memory_space<smem>>
    %443 = vector.broadcast %442 : f32 to vector<2x224xf32>
    %444 = arith.mulf %443, %437 : vector<2x224xf32>
    %445 = arith.addf %423, %444 : vector<2x224xf32>
    %c69 = arith.constant 69 : index
    %446 = memref.load %arg1[%c69] : memref<135xf32, #tpu.memory_space<smem>>
    %447 = vector.broadcast %446 : f32 to vector<2x224xf32>
    %448 = arith.mulf %447, %437 : vector<2x224xf32>
    %449 = arith.addf %427, %448 : vector<2x224xf32>
    %c96 = arith.constant 96 : index
    %450 = memref.load %arg1[%c96] : memref<135xf32, #tpu.memory_space<smem>>
    %451 = vector.broadcast %450 : f32 to vector<2x224xf32>
    %452 = arith.mulf %451, %437 : vector<2x224xf32>
    %453 = arith.addf %431, %452 : vector<2x224xf32>
    %c123 = arith.constant 123 : index
    %454 = memref.load %arg1[%c123] : memref<135xf32, #tpu.memory_space<smem>>
    %455 = vector.broadcast %454 : f32 to vector<2x224xf32>
    %456 = arith.mulf %455, %437 : vector<2x224xf32>
    %457 = arith.addf %435, %456 : vector<2x224xf32>
    %458 = vector.extract_strided_slice %413 {offsets = [0, 2, 0], sizes = [2, 1, 224], strides = [1, 1, 1]} : vector<2x3x224xf32> to vector<2x1x224xf32>
    %459 = vector.shape_cast %458 : vector<2x1x224xf32> to vector<2x224xf32>
    %c24 = arith.constant 24 : index
    %460 = memref.load %arg1[%c24] : memref<135xf32, #tpu.memory_space<smem>>
    %461 = vector.broadcast %460 : f32 to vector<2x224xf32>
    %462 = arith.mulf %461, %459 : vector<2x224xf32>
    %463 = arith.addf %441, %462 : vector<2x224xf32>
    %c51 = arith.constant 51 : index
    %464 = memref.load %arg1[%c51] : memref<135xf32, #tpu.memory_space<smem>>
    %465 = vector.broadcast %464 : f32 to vector<2x224xf32>
    %466 = arith.mulf %465, %459 : vector<2x224xf32>
    %467 = arith.addf %445, %466 : vector<2x224xf32>
    %c78 = arith.constant 78 : index
    %468 = memref.load %arg1[%c78] : memref<135xf32, #tpu.memory_space<smem>>
    %469 = vector.broadcast %468 : f32 to vector<2x224xf32>
    %470 = arith.mulf %469, %459 : vector<2x224xf32>
    %471 = arith.addf %449, %470 : vector<2x224xf32>
    %c105 = arith.constant 105 : index
    %472 = memref.load %arg1[%c105] : memref<135xf32, #tpu.memory_space<smem>>
    %473 = vector.broadcast %472 : f32 to vector<2x224xf32>
    %474 = arith.mulf %473, %459 : vector<2x224xf32>
    %475 = arith.addf %453, %474 : vector<2x224xf32>
    %c132 = arith.constant 132 : index
    %476 = memref.load %arg1[%c132] : memref<135xf32, #tpu.memory_space<smem>>
    %477 = vector.broadcast %476 : f32 to vector<2x224xf32>
    %478 = arith.mulf %477, %459 : vector<2x224xf32>
    %479 = arith.addf %457, %478 : vector<2x224xf32>
    %480 = vector.extract_strided_slice %0 {offsets = [0, 0, 33], sizes = [2, 3, 224], strides = [1, 1, 1]} : vector<2x3x258xf32> to vector<2x3x224xf32>
    %481 = vector.extract_strided_slice %480 {offsets = [0, 0, 0], sizes = [2, 1, 224], strides = [1, 1, 1]} : vector<2x3x224xf32> to vector<2x1x224xf32>
    %482 = vector.shape_cast %481 : vector<2x1x224xf32> to vector<2x224xf32>
    %c7 = arith.constant 7 : index
    %483 = memref.load %arg1[%c7] : memref<135xf32, #tpu.memory_space<smem>>
    %484 = vector.broadcast %483 : f32 to vector<2x224xf32>
    %485 = arith.mulf %484, %482 : vector<2x224xf32>
    %486 = arith.addf %463, %485 : vector<2x224xf32>
    %c34 = arith.constant 34 : index
    %487 = memref.load %arg1[%c34] : memref<135xf32, #tpu.memory_space<smem>>
    %488 = vector.broadcast %487 : f32 to vector<2x224xf32>
    %489 = arith.mulf %488, %482 : vector<2x224xf32>
    %490 = arith.addf %467, %489 : vector<2x224xf32>
    %c61 = arith.constant 61 : index
    %491 = memref.load %arg1[%c61] : memref<135xf32, #tpu.memory_space<smem>>
    %492 = vector.broadcast %491 : f32 to vector<2x224xf32>
    %493 = arith.mulf %492, %482 : vector<2x224xf32>
    %494 = arith.addf %471, %493 : vector<2x224xf32>
    %c88 = arith.constant 88 : index
    %495 = memref.load %arg1[%c88] : memref<135xf32, #tpu.memory_space<smem>>
    %496 = vector.broadcast %495 : f32 to vector<2x224xf32>
    %497 = arith.mulf %496, %482 : vector<2x224xf32>
    %498 = arith.addf %475, %497 : vector<2x224xf32>
    %c115 = arith.constant 115 : index
    %499 = memref.load %arg1[%c115] : memref<135xf32, #tpu.memory_space<smem>>
    %500 = vector.broadcast %499 : f32 to vector<2x224xf32>
    %501 = arith.mulf %500, %482 : vector<2x224xf32>
    %502 = arith.addf %479, %501 : vector<2x224xf32>
    %503 = vector.extract_strided_slice %480 {offsets = [0, 1, 0], sizes = [2, 1, 224], strides = [1, 1, 1]} : vector<2x3x224xf32> to vector<2x1x224xf32>
    %504 = vector.shape_cast %503 : vector<2x1x224xf32> to vector<2x224xf32>
    %c16 = arith.constant 16 : index
    %505 = memref.load %arg1[%c16] : memref<135xf32, #tpu.memory_space<smem>>
    %506 = vector.broadcast %505 : f32 to vector<2x224xf32>
    %507 = arith.mulf %506, %504 : vector<2x224xf32>
    %508 = arith.addf %486, %507 : vector<2x224xf32>
    %c43 = arith.constant 43 : index
    %509 = memref.load %arg1[%c43] : memref<135xf32, #tpu.memory_space<smem>>
    %510 = vector.broadcast %509 : f32 to vector<2x224xf32>
    %511 = arith.mulf %510, %504 : vector<2x224xf32>
    %512 = arith.addf %490, %511 : vector<2x224xf32>
    %c70 = arith.constant 70 : index
    %513 = memref.load %arg1[%c70] : memref<135xf32, #tpu.memory_space<smem>>
    %514 = vector.broadcast %513 : f32 to vector<2x224xf32>
    %515 = arith.mulf %514, %504 : vector<2x224xf32>
    %516 = arith.addf %494, %515 : vector<2x224xf32>
    %c97 = arith.constant 97 : index
    %517 = memref.load %arg1[%c97] : memref<135xf32, #tpu.memory_space<smem>>
    %518 = vector.broadcast %517 : f32 to vector<2x224xf32>
    %519 = arith.mulf %518, %504 : vector<2x224xf32>
    %520 = arith.addf %498, %519 : vector<2x224xf32>
    %c124 = arith.constant 124 : index
    %521 = memref.load %arg1[%c124] : memref<135xf32, #tpu.memory_space<smem>>
    %522 = vector.broadcast %521 : f32 to vector<2x224xf32>
    %523 = arith.mulf %522, %504 : vector<2x224xf32>
    %524 = arith.addf %502, %523 : vector<2x224xf32>
    %525 = vector.extract_strided_slice %480 {offsets = [0, 2, 0], sizes = [2, 1, 224], strides = [1, 1, 1]} : vector<2x3x224xf32> to vector<2x1x224xf32>
    %526 = vector.shape_cast %525 : vector<2x1x224xf32> to vector<2x224xf32>
    %c25 = arith.constant 25 : index
    %527 = memref.load %arg1[%c25] : memref<135xf32, #tpu.memory_space<smem>>
    %528 = vector.broadcast %527 : f32 to vector<2x224xf32>
    %529 = arith.mulf %528, %526 : vector<2x224xf32>
    %530 = arith.addf %508, %529 : vector<2x224xf32>
    %c52 = arith.constant 52 : index
    %531 = memref.load %arg1[%c52] : memref<135xf32, #tpu.memory_space<smem>>
    %532 = vector.broadcast %531 : f32 to vector<2x224xf32>
    %533 = arith.mulf %532, %526 : vector<2x224xf32>
    %534 = arith.addf %512, %533 : vector<2x224xf32>
    %c79 = arith.constant 79 : index
    %535 = memref.load %arg1[%c79] : memref<135xf32, #tpu.memory_space<smem>>
    %536 = vector.broadcast %535 : f32 to vector<2x224xf32>
    %537 = arith.mulf %536, %526 : vector<2x224xf32>
    %538 = arith.addf %516, %537 : vector<2x224xf32>
    %c106 = arith.constant 106 : index
    %539 = memref.load %arg1[%c106] : memref<135xf32, #tpu.memory_space<smem>>
    %540 = vector.broadcast %539 : f32 to vector<2x224xf32>
    %541 = arith.mulf %540, %526 : vector<2x224xf32>
    %542 = arith.addf %520, %541 : vector<2x224xf32>
    %c133 = arith.constant 133 : index
    %543 = memref.load %arg1[%c133] : memref<135xf32, #tpu.memory_space<smem>>
    %544 = vector.broadcast %543 : f32 to vector<2x224xf32>
    %545 = arith.mulf %544, %526 : vector<2x224xf32>
    %546 = arith.addf %524, %545 : vector<2x224xf32>
    %547 = vector.extract_strided_slice %0 {offsets = [0, 0, 34], sizes = [2, 3, 224], strides = [1, 1, 1]} : vector<2x3x258xf32> to vector<2x3x224xf32>
    %548 = vector.extract_strided_slice %547 {offsets = [0, 0, 0], sizes = [2, 1, 224], strides = [1, 1, 1]} : vector<2x3x224xf32> to vector<2x1x224xf32>
    %549 = vector.shape_cast %548 : vector<2x1x224xf32> to vector<2x224xf32>
    %c8 = arith.constant 8 : index
    %550 = memref.load %arg1[%c8] : memref<135xf32, #tpu.memory_space<smem>>
    %551 = vector.broadcast %550 : f32 to vector<2x224xf32>
    %552 = arith.mulf %551, %549 : vector<2x224xf32>
    %553 = arith.addf %530, %552 : vector<2x224xf32>
    %c35 = arith.constant 35 : index
    %554 = memref.load %arg1[%c35] : memref<135xf32, #tpu.memory_space<smem>>
    %555 = vector.broadcast %554 : f32 to vector<2x224xf32>
    %556 = arith.mulf %555, %549 : vector<2x224xf32>
    %557 = arith.addf %534, %556 : vector<2x224xf32>
    %c62 = arith.constant 62 : index
    %558 = memref.load %arg1[%c62] : memref<135xf32, #tpu.memory_space<smem>>
    %559 = vector.broadcast %558 : f32 to vector<2x224xf32>
    %560 = arith.mulf %559, %549 : vector<2x224xf32>
    %561 = arith.addf %538, %560 : vector<2x224xf32>
    %c89 = arith.constant 89 : index
    %562 = memref.load %arg1[%c89] : memref<135xf32, #tpu.memory_space<smem>>
    %563 = vector.broadcast %562 : f32 to vector<2x224xf32>
    %564 = arith.mulf %563, %549 : vector<2x224xf32>
    %565 = arith.addf %542, %564 : vector<2x224xf32>
    %c116 = arith.constant 116 : index
    %566 = memref.load %arg1[%c116] : memref<135xf32, #tpu.memory_space<smem>>
    %567 = vector.broadcast %566 : f32 to vector<2x224xf32>
    %568 = arith.mulf %567, %549 : vector<2x224xf32>
    %569 = arith.addf %546, %568 : vector<2x224xf32>
    %570 = vector.extract_strided_slice %547 {offsets = [0, 1, 0], sizes = [2, 1, 224], strides = [1, 1, 1]} : vector<2x3x224xf32> to vector<2x1x224xf32>
    %571 = vector.shape_cast %570 : vector<2x1x224xf32> to vector<2x224xf32>
    %c17 = arith.constant 17 : index
    %572 = memref.load %arg1[%c17] : memref<135xf32, #tpu.memory_space<smem>>
    %573 = vector.broadcast %572 : f32 to vector<2x224xf32>
    %574 = arith.mulf %573, %571 : vector<2x224xf32>
    %575 = arith.addf %553, %574 : vector<2x224xf32>
    %c44 = arith.constant 44 : index
    %576 = memref.load %arg1[%c44] : memref<135xf32, #tpu.memory_space<smem>>
    %577 = vector.broadcast %576 : f32 to vector<2x224xf32>
    %578 = arith.mulf %577, %571 : vector<2x224xf32>
    %579 = arith.addf %557, %578 : vector<2x224xf32>
    %c71 = arith.constant 71 : index
    %580 = memref.load %arg1[%c71] : memref<135xf32, #tpu.memory_space<smem>>
    %581 = vector.broadcast %580 : f32 to vector<2x224xf32>
    %582 = arith.mulf %581, %571 : vector<2x224xf32>
    %583 = arith.addf %561, %582 : vector<2x224xf32>
    %c98 = arith.constant 98 : index
    %584 = memref.load %arg1[%c98] : memref<135xf32, #tpu.memory_space<smem>>
    %585 = vector.broadcast %584 : f32 to vector<2x224xf32>
    %586 = arith.mulf %585, %571 : vector<2x224xf32>
    %587 = arith.addf %565, %586 : vector<2x224xf32>
    %c125 = arith.constant 125 : index
    %588 = memref.load %arg1[%c125] : memref<135xf32, #tpu.memory_space<smem>>
    %589 = vector.broadcast %588 : f32 to vector<2x224xf32>
    %590 = arith.mulf %589, %571 : vector<2x224xf32>
    %591 = arith.addf %569, %590 : vector<2x224xf32>
    %592 = vector.extract_strided_slice %547 {offsets = [0, 2, 0], sizes = [2, 1, 224], strides = [1, 1, 1]} : vector<2x3x224xf32> to vector<2x1x224xf32>
    %593 = vector.shape_cast %592 : vector<2x1x224xf32> to vector<2x224xf32>
    %c26 = arith.constant 26 : index
    %594 = memref.load %arg1[%c26] : memref<135xf32, #tpu.memory_space<smem>>
    %595 = vector.broadcast %594 : f32 to vector<2x224xf32>
    %596 = arith.mulf %595, %593 : vector<2x224xf32>
    %597 = arith.addf %575, %596 : vector<2x224xf32>
    %c53 = arith.constant 53 : index
    %598 = memref.load %arg1[%c53] : memref<135xf32, #tpu.memory_space<smem>>
    %599 = vector.broadcast %598 : f32 to vector<2x224xf32>
    %600 = arith.mulf %599, %593 : vector<2x224xf32>
    %601 = arith.addf %579, %600 : vector<2x224xf32>
    %c80 = arith.constant 80 : index
    %602 = memref.load %arg1[%c80] : memref<135xf32, #tpu.memory_space<smem>>
    %603 = vector.broadcast %602 : f32 to vector<2x224xf32>
    %604 = arith.mulf %603, %593 : vector<2x224xf32>
    %605 = arith.addf %583, %604 : vector<2x224xf32>
    %c107 = arith.constant 107 : index
    %606 = memref.load %arg1[%c107] : memref<135xf32, #tpu.memory_space<smem>>
    %607 = vector.broadcast %606 : f32 to vector<2x224xf32>
    %608 = arith.mulf %607, %593 : vector<2x224xf32>
    %609 = arith.addf %587, %608 : vector<2x224xf32>
    %c134 = arith.constant 134 : index
    %610 = memref.load %arg1[%c134] : memref<135xf32, #tpu.memory_space<smem>>
    %611 = vector.broadcast %610 : f32 to vector<2x224xf32>
    %612 = arith.mulf %611, %593 : vector<2x224xf32>
    %613 = arith.addf %591, %612 : vector<2x224xf32>
    %614 = vector.shape_cast %597 : vector<2x224xf32> to vector<2x1x224xf32>
    %615 = vector.shape_cast %601 : vector<2x224xf32> to vector<2x1x224xf32>
    %616 = vector.shape_cast %605 : vector<2x224xf32> to vector<2x1x224xf32>
    %617 = vector.shape_cast %609 : vector<2x224xf32> to vector<2x1x224xf32>
    %618 = vector.shape_cast %613 : vector<2x224xf32> to vector<2x1x224xf32>
    %619 = tpu.concatenate %614, %615, %616, %617, %618 in 1 : vector<2x1x224xf32>, vector<2x1x224xf32>, vector<2x1x224xf32>, vector<2x1x224xf32>, vector<2x1x224xf32> -> vector<2x5x224xf32>
    %c0_8 = arith.constant 0 : index
    %c0_9 = arith.constant 0 : index
    %c0_10 = arith.constant 0 : index
    %620 = vector.load %arg3[%c0_8, %c0_9, %c0_10] : memref<2x5x224xf32, #tpu.memory_space<vmem>>, vector<2x5x224xf32>
    tpu.vector_store %arg3[%c0_8, %c0_9, %c0_10], %619 {strides = array<i32>} : memref<2x5x224xf32, #tpu.memory_space<vmem>>, vector<2x5x224xf32>,
    return
  }
}

</mosaic_0001>

<bundles_post_ra>
// kernel: tpu_custom_call.1
= control target key start
LH: loop header
LB: loop body
LE: loop exit
PB: predicated region body
PF: predicated region fallthrough
CT: control target
= control target key end

     0   :  { %8 = vsyncpa [#allocation3], 0  ;;  %s6245_s0 = inlined_call_operand.vmem [shape: f32[2,3,258], index: 0, kind: input, shape index: {}]   ;;  %s6246_s1 = inlined_call_operand.vmem [shape: f32[135], index: 1, kind: input, shape index: {}]   ;;  %s6247_s2 = inlined_call_operand.vmem [shape: f32[5], index: 2, kind: input, shape index: {}]   ;;  %s6248_s3 = inlined_call_operand.vmem [shape: f32[2,5,224], index: 3, kind: output, shape index: {}]  }
   0x1   :  { %s18_s14 = sshll.u32 %s6246_s1, 4  ;;  %s19_s14 = int_to_ptr.vmem [resolvable:$true] %s18_s14 }
   0x2   :  { %9 = vsyncpa [#allocation5], 0  ;;  %s28_s17 = sshll.u32 %s6247_s2, 4  ;;  %s3670_s18 = scalar_lea.vmem %s19_s14, 32  ;;  %s29_s17 = int_to_ptr.vmem [resolvable:$true] %s28_s17 }
   0x3   :  { %p3671_p0 = scmp.ne.s32.totalorder %s19_s14, %s3670_s18  ;;  %p3675_p1 = scmp.lt.s32.totalorder %s19_s14, %s19_s14 }
   0x4   :  { %p3676_p2 = scmp.lt.s32.totalorder %s3670_s18, %s3670_s18 }
   0x6   :  { %p3677_p3 = por %p3676_p2, %p3675_p1 }
   0x8   :  { %p3678_p4 = pnand %p3677_p3, %p3671_p0 }
   0xa   :  { %3681 = shalt.err (!%p3678_p4)
}
   0xb   :  { %s3698_s19 = smov [#allocation2]   ;;  %s3682_s20 = scalar_lea.vmem %s29_s17, 16 }
   0xc   :  { %21 = dma.vmem_to_smem %s19_s14, 32, %s3698_s19, [#allocation3]  }
   0xd   :  { %p3683_p5 = scmp.ne.s32.totalorder %s29_s17, %s3682_s20  ;;  %p3687_p6 = scmp.lt.s32.totalorder %s29_s17, %s29_s17 }
   0xe   :  { %p3688_p7 = scmp.lt.s32.totalorder %s3682_s20, %s3682_s20 }
  0x10   :  { %p3689_p8 = por %p3688_p7, %p3687_p6 }
  0x12   :  { %p3690_p9 = pnand %p3689_p8, %p3683_p5 }
  0x14   :  { %3693 = shalt.err (!%p3690_p9)
}
  0x15   :  { %s3699_s1 = smov [#allocation4]  }
  0x16   :  { %31 = dma.vmem_to_smem %s29_s17, 16, %s3699_s1, [#allocation5]  }
  0x17   :  { %3694 = dma.done.wait [#allocation3], 32  }
  0x18   :  { %3695 = vsyncadd [#allocation3], 4294967264 }
  0x19   :  { %3696 = dma.done.wait [#allocation5], 16  }
  0x1a   :  { %3697 = vsyncadd [#allocation5], 4294967280 }
  0x1b   :  { %38 = sfence }
  0x1c   :  { %s3331_s2 = sld [smem:[#allocation2 + $0x1c]]  ;;  %v3737_v0 = vld [vmem:[%s6245_s0] sm:$0x77]  ;;  %v3742_v1 = vld [vmem:[%s6245_s0 + $0xc] sm:$0x77]  ;;  %s3700_s28 = smov 127  }
  0x1d   :  { %s3330_s21 = sld [smem:[#allocation2 + $0x1]]  ;;  %s3701_s17 = smov 126   ;;  %vm235_vm0 = vcmask 1039360   ;;  %vm546_vm1 = vcmask 1031168   ;;  %vm857_vm2 = vcmask 916480   ;;  %vm1168_vm3 = vcmask 908288  }
  0x1e   :  { %s3332_s22 = sld [smem:[#allocation2 + $0x37]]  ;;  %vm1479_vm4 = vcmask 900096   ;;  %vm1790_vm5 = vcmask 785408   ;;  %vm2111_vm6 = vcmask 1043456   ;;  %vm2113_vm7 = vcmask 777216  }
  0x1f   :  { %s3333_s27 = sld [smem:[#allocation2 + $0x52]]  ;;  %vm2644_vm8 = vcmask 769024   ;;  %vm3262_vm9 = vcmask 1040384   ;;  %vm3267_vm10 = vcmask 1041408   ;;  %vm3272_vm11 = vcmask 1042432  }
  0x20   :  { %s3334_s29 = sld [smem:[#allocation2 + $0x6d]]  ;;  %vm3282_vm12 = vcmask 782336  }
  0x21   :  { %s3335_s30 = sld [smem:[#allocation2 + $0xa]] }
  0x22   :  { %v243_v2 = vstv %s3331_s2  ;;  %s3338_s4 = sld [smem:[#allocation2 + $0x25]] }
  0x23   :  { %v244_v3 = vmul.f32 %v243_v2, %v3737_v0  ;;  %v224_v4 = vstv %s3330_s21  ;;  %v245_v6 = vmul.f32 %v243_v2, %v3742_v1  ;;  %s3341_s5 = sld [smem:[#allocation2 + $0x40]] }
  0x24   :  { %v225_v5 = vmul.f32 %v224_v4, %v3737_v0  ;;  %v226_v7 = vmul.f32 %v224_v4, %v3742_v1  ;;  %v261_v8 = vstv %s3332_s22  ;;  %s3344_s6 = sld [smem:[#allocation2 + $0x5b]] }
  0x25   :  { %248 = vrot.lane.b32.xlu1 %v244_v3, %s3700_s28  ;;  %v263_v9 = vmul.f32 %v261_v8, %v3742_v1  ;;  %v262_v10 = vmul.f32 %v261_v8, %v3737_v0  ;;  %v279_v11 = vstv %s3333_s27  ;;  %s3347_s7 = sld [smem:[#allocation2 + $0x76]] }
  0x26   :  { %229 = vrot.lane.b32.xlu0 %v225_v5, %s3700_s28  ;;  %v281_v12 = vmul.f32 %v279_v11, %v3742_v1  ;;  %v280_v13 = vmul.f32 %v279_v11, %v3737_v0  ;;  %v297_v14 = vstv %s3334_s29  ;;  %s3350_s8 = sld [smem:[#allocation2 + $0x13]] }
  0x27   :  { %v315_v15 = vstv %s3335_s30  ;;  %v299_v16 = vmul.f32 %v297_v14, %v3742_v1  ;;  %v298_v18 = vmul.f32 %v297_v14, %v3737_v0  ;;  %s3353_s9 = sld [smem:[#allocation2 + $0x2e]] }
  0x28   :  { %v317_v17 = vmul.f32 %v315_v15, %v3742_v1  ;;  %v316_v19 = vmul.f32 %v315_v15, %v3737_v0  ;;  %v337_v20 = vstv %s3338_s4  ;;  %s3356_s10 = sld [smem:[#allocation2 + $0x49]]  ;;  %s3702_s4 = smov 112  }
  0x29   :  { %250 = vrot.lane.b32.xlu1 %v245_v6, %s3700_s28  ;;  %v339_v22 = vmul.f32 %v337_v20, %v3742_v1  ;;  %v338_v24 = vmul.f32 %v337_v20, %v3737_v0  ;;  %v359_v25 = vstv %s3341_s5  ;;  %s3359_s11 = sld [smem:[#allocation2 + $0x64]] }
  0x2a   :  { %231 = vrot.lane.b32.xlu0 %v226_v7, %s3700_s28  ;;  %v3337_v21 = vrot.slane %v317_v17, 9  ;;  %v3336_v23 = vrot.slane %v316_v19, 9  ;;  %v361_v27 = vmul.f32 %v359_v25, %v3742_v1  ;;  %v360_v29 = vmul.f32 %v359_v25, %v3737_v0  ;;  %s3362_s12 = sld [smem:[#allocation2 + $0x7f]] }
  0x2b   :  { %v3340_v26 = vrot.slane %v339_v22, 9  ;;  %v3339_v28 = vrot.slane %v338_v24, 9  ;;  %v381_v30 = vstv %s3344_s6  ;;  %v403_v35 = vstv %s3347_s7  ;;  %s3365_s13 = sld [smem:[#allocation2 + $0x2]] }
  0x2c   :  { %v3343_v31 = vrot.slane %v361_v27, 9  ;;  %v383_v32 = vmul.f32 %v381_v30, %v3742_v1  ;;  %v3342_v33 = vrot.slane %v360_v29, 9  ;;  %v382_v34 = vmul.f32 %v381_v30, %v3737_v0  ;;  %s3366_s14 = sld [smem:[#allocation2 + $0x1d]] }
  0x2d   :  { %268 = vrot.lane.b32.xlu1 %v263_v9, %s3700_s28  ;;  %v405_v37 = vmul.f32 %v403_v35, %v3742_v1  ;;  %v404_v39 = vmul.f32 %v403_v35, %v3737_v0  ;;  %v425_v40 = vstv %s3350_s8  ;;  %v447_v45 = vstv %s3353_s9  ;;  %s3367_s15 = sld [smem:[#allocation2 + $0x38]] }
  0x2e   :  { %266 = vrot.lane.b32.xlu0 %v262_v10, %s3700_s28  ;;  %v3346_v36 = vrot.slane %v383_v32, 9  ;;  %v3345_v38 = vrot.slane %v382_v34, 9  ;;  %v427_v42 = vmul.f32 %v425_v40, %v3742_v1  ;;  %v426_v44 = vmul.f32 %v425_v40, %v3737_v0  ;;  %s3368_s16 = sld [smem:[#allocation2 + $0x53]] }
  0x2f   :  { %v3349_v41 = vrot.slane %v405_v37, 9  ;;  %v3348_v43 = vrot.slane %v404_v39, 9  ;;  %v449_v47 = vmul.f32 %v447_v45, %v3742_v1  ;;  %v448_v49 = vmul.f32 %v447_v45, %v3737_v0  ;;  %s3369_s18 = sld [smem:[#allocation2 + $0x6e]] }
  0x30   :  { %v3352_v46 = vrot.slane %v427_v42, 10  ;;  %v3351_v48 = vrot.slane %v426_v44, 10  ;;  %v469_v50 = vstv %s3356_s10  ;;  %v491_v55 = vstv %s3359_s11  ;;  %s3370_s19 = sld [smem:[#allocation2 + $0xb]] }
  0x31   :  { %286 = vrot.lane.b32.xlu1 %v281_v12, %s3700_s28  ;;  %v3355_v51 = vrot.slane %v449_v47, 10  ;;  %v471_v52 = vmul.f32 %v469_v50, %v3742_v1  ;;  %v3354_v53 = vrot.slane %v448_v49, 10  ;;  %v470_v54 = vmul.f32 %v469_v50, %v3737_v0  ;;  %s3373_s20 = sld [smem:[#allocation2 + $0x26]] }
  0x32   :  { %284 = vrot.lane.b32.xlu0 %v280_v13, %s3700_s28  ;;  %v493_v57 = vmul.f32 %v491_v55, %v3742_v1  ;;  %v492_v59 = vmul.f32 %v491_v55, %v3737_v0  ;;  %v513_v60 = vstv %s3362_s12  ;;  %v535_v5 = vstv %s3365_s13  ;;  %s3376_s1 = sld [smem:[#allocation2 + $0x41]] }
  0x33   :  { %v3358_v56 = vrot.slane %v471_v52, 10  ;;  %v3357_v58 = vrot.slane %v470_v54, 10  ;;  %v515_v62 = vmul.f32 %v513_v60, %v3742_v1  ;;  %v514_v2 = vmul.f32 %v513_v60, %v3737_v0  ;;  %s3379_s2 = sld [smem:[#allocation2 + $0x5c]] }
  0x34   :  { %v3361_v61 = vrot.slane %v493_v57, 10  ;;  %v3360_v63 = vrot.slane %v492_v59, 10  ;;  %v537_v6 = vmul.f32 %v535_v5, %v3742_v1  ;;  %v536_v7 = vmul.f32 %v535_v5, %v3737_v0  ;;  %s3382_s21 = sld [smem:[#allocation2 + $0x77]] }
  0x35   :  { %304 = vrot.lane.b32.xlu1 %v299_v16, %s3700_s28  ;;  %v3364_v3 = vrot.slane %v515_v62, 10  ;;  %v3363_v4 = vrot.slane %v514_v2, 10  ;;  %v554_v8 = vstv %s3366_s14  ;;  %v572_v11 = vstv %s3367_s15  ;;  %s3385_s22 = sld [smem:[#allocation2 + $0x14]] }
  0x36   :  { %302 = vrot.lane.b32.xlu0 %v298_v18, %s3700_s28  ;;  %v556_v9 = vmul.f32 %v554_v8, %v3742_v1  ;;  %v555_v10 = vmul.f32 %v554_v8, %v3737_v0  ;;  %v574_v12 = vmul.f32 %v572_v11, %v3742_v1  ;;  %v573_v13 = vmul.f32 %v572_v11, %v3737_v0  ;;  %s3388_s23 = sld [smem:[#allocation2 + $0x2f]] }
  0x37   :  { %v590_v14 = vstv %s3368_s16  ;;  %v608_v17 = vstv %s3369_s18  ;;  %v626_v18 = vstv %s3370_s19  ;;  %s3391_s24 = sld [smem:[#allocation2 + $0x4a]] }
  0x38   :  { %v592_v15 = vmul.f32 %v590_v14, %v3742_v1  ;;  %v591_v16 = vmul.f32 %v590_v14, %v3737_v0  ;;  %v610_v19 = vmul.f32 %v608_v17, %v3742_v1  ;;  %v628_v20 = vmul.f32 %v626_v18, %v3742_v1  ;;  %s3394_s25 = sld [smem:[#allocation2 + $0x65]] }
  0x39   :  { %326 = vrot.lane.b32.xlu1 %v3337_v21, %s3700_s28  ;;  %v609_v21 = vmul.f32 %v608_v17, %v3737_v0  ;;  %v627_v22 = vmul.f32 %v626_v18, %v3737_v0  ;;  %s3397_s26 = sld [smem:[#allocation2 + $0x80]] }
  0x3a   :  { %324 = vrot.lane.b32.xlu0 %v3336_v23, %s3700_s28  ;;  %v648_v23 = vstv %s3373_s20  ;;  %v3372_v24 = vrot.slane %v628_v20, 9  ;;  %s3400_s27 = sld [smem:[#allocation2 + $0x3]]  ;;  %s3703_s20 = smov 111  }
  0x3b   :  { %v650_v25 = vmul.f32 %v648_v23, %v3742_v1  ;;  %v649_v27 = vmul.f32 %v648_v23, %v3737_v0  ;;  %s3402_s29 = sld [smem:[#allocation2 + $0x39]] }
  0x3c   :  { %s3403_s30 = sld [smem:[#allocation2 + $0x54]] }
  0x3d   :  { %348 = vrot.lane.b32.xlu1 %v3340_v26, %s3700_s28  ;;  %v3371_v26 = vrot.slane %v627_v22, 9  ;;  %v3375_v29 = vrot.slane %v650_v25, 9  ;;  %s3404_s5 = sld [smem:[#allocation2 + $0x6f]] }
  0x3e   :  { %346 = vrot.lane.b32.xlu0 %v3339_v28, %s3700_s28  ;;  %v670_v28 = vstv %s3376_s1  ;;  %s3405_s6 = sld [smem:[#allocation2 + $0xc]] }
  0x3f   :  { %v672_v30 = vmul.f32 %v670_v28, %v3742_v1  ;;  %v671_v32 = vmul.f32 %v670_v28, %v3737_v0  ;;  %s3408_s7 = sld [smem:[#allocation2 + $0x27]] }
  0x40   :  { %v846_v8 = vstv %s3400_s27  ;;  %s3411_s8 = sld [smem:[#allocation2 + $0x42]] }
  0x41   :  { %370 = vrot.lane.b32.xlu1 %v3343_v31, %s3700_s28  ;;  %v3374_v31 = vrot.slane %v649_v27, 9  ;;  %v3378_v34 = vrot.slane %v672_v30, 9  ;;  %v848_v11 = vmul.f32 %v846_v8, %v3742_v1  ;;  %v883_v18 = vstv %s3402_s29  ;;  %s3414_s9 = sld [smem:[#allocation2 + $0x5d]] }
  0x42   :  { %368 = vrot.lane.b32.xlu0 %v3342_v33, %s3700_s28  ;;  %v692_v33 = vstv %s3379_s2  ;;  %v884_v22 = vmul.f32 %v883_v18, %v3737_v0  ;;  %v901_v23 = vstv %s3403_s30  ;;  %s3417_s10 = sld [smem:[#allocation2 + $0x78]] }
  0x43   :  { %v694_v35 = vmul.f32 %v692_v33, %v3742_v1  ;;  %v693_v37 = vmul.f32 %v692_v33, %v3737_v0  ;;  %v902_v27 = vmul.f32 %v901_v23, %v3737_v0  ;;  %v919_v28 = vstv %s3404_s5  ;;  %s3420_s11 = sld [smem:[#allocation2 + $0x15]] }
  0x44   :  { %s3423_s12 = sld [smem:[#allocation2 + $0x30]] }
  0x45   :  { %392 = vrot.lane.b32.xlu1 %v3346_v36, %s3700_s28  ;;  %v3377_v36 = vrot.slane %v671_v32, 9  ;;  %v3381_v39 = vrot.slane %v694_v35, 9  ;;  %v921_v32 = vmul.f32 %v919_v28, %v3742_v1  ;;  %s3426_s13 = sld [smem:[#allocation2 + $0x4b]] }
  0x46   :  { %390 = vrot.lane.b32.xlu0 %v3345_v38, %s3700_s28  ;;  %v714_v38 = vstv %s3382_s21  ;;  %s3429_s14 = sld [smem:[#allocation2 + $0x66]] }
  0x47   :  { %v716_v40 = vmul.f32 %v714_v38, %v3742_v1  ;;  %v715_v42 = vmul.f32 %v714_v38, %v3737_v0  ;;  %s3432_s15 = sld [smem:[#allocation2 + $0x81]] }
  0x48   :  { %s3435_s16 = sld [smem:[#allocation2 + $0x4]] }
  0x49   :  { %414 = vrot.lane.b32.xlu1 %v3349_v41, %s3700_s28  ;;  %v3380_v41 = vrot.slane %v693_v37, 9  ;;  %v3384_v44 = vrot.slane %v716_v40, 9  ;;  %s3437_s18 = sld [smem:[#allocation2 + $0x3a]] }
  0x4a   :  { %412 = vrot.lane.b32.xlu0 %v3348_v43, %s3700_s28  ;;  %v736_v43 = vstv %s3385_s22  ;;  %s3438_s19 = sld [smem:[#allocation2 + $0x55]] }
  0x4b   :  { %v738_v45 = vmul.f32 %v736_v43, %v3742_v1  ;;  %v737_v47 = vmul.f32 %v736_v43, %v3737_v0  ;;  %v981_v43 = vstv %s3411_s8  ;;  %s3439_s1 = sld [smem:[#allocation2 + $0x70]] }
  0x4c   :  { %s3440_s2 = sld [smem:[#allocation2 + $0xd]] }
  0x4d   :  { %436 = vrot.lane.b32.xlu1 %v3352_v46, %s3700_s28  ;;  %v3383_v46 = vrot.slane %v715_v42, 9  ;;  %v3387_v49 = vrot.slane %v738_v45, 10  ;;  %s3443_s21 = sld [smem:[#allocation2 + $0x28]] }
  0x4e   :  { %434 = vrot.lane.b32.xlu0 %v3351_v48, %s3700_s28  ;;  %v758_v48 = vstv %s3388_s23  ;;  %s3446_s22 = sld [smem:[#allocation2 + $0x43]] }
  0x4f   :  { %v760_v50 = vmul.f32 %v758_v48, %v3742_v1  ;;  %v759_v52 = vmul.f32 %v758_v48, %v3737_v0  ;;  %s3449_s23 = sld [smem:[#allocation2 + $0x5e]] }
  0x50   :  { %s3461_s27 = sld [smem:[#allocation2 + $0x4c]] }
  0x51   :  { %458 = vrot.lane.b32.xlu1 %v3355_v51, %s3700_s28  ;;  %v3386_v51 = vrot.slane %v737_v47, 10  ;;  %v3390_v54 = vrot.slane %v760_v50, 10  ;;  %v983_v47 = vmul.f32 %v981_v43, %v3742_v1  ;;  %v1003_v50 = vstv %s3414_s9  ;;  %s3467_s29 = sld [smem:[#allocation2 + $0x82]] }
  0x52   :  { %456 = vrot.lane.b32.xlu0 %v3354_v53, %s3700_s28  ;;  %v780_v53 = vstv %s3391_s24  ;;  %s3452_s24 = sld [smem:[#allocation2 + $0x79]] }
  0x53   :  { %v782_v55 = vmul.f32 %v780_v53, %v3742_v1  ;;  %v781_v57 = vmul.f32 %v780_v53, %v3737_v0  ;;  %v3413_v53 = vrot.slane %v983_v47, 9  ;;  %s3470_s30 = sld [smem:[#allocation2 + $0x5]] }
  0x54   :  { %s3472_s5 = sld [smem:[#allocation2 + $0x3b]] }
  0x55   :  { %480 = vrot.lane.b32.xlu1 %v3358_v56, %s3700_s28  ;;  %v3389_v56 = vrot.slane %v759_v52, 10  ;;  %v3393_v59 = vrot.slane %v782_v55, 10  ;;  %s4305_s8 = sld [smem:[#allocation2 + $0x2d]] }
  0x56   :  { %478 = vrot.lane.b32.xlu0 %v3357_v58, %s3700_s28  ;;  %v802_v58 = vstv %s3394_s25  ;;  %s3455_s25 = sld [smem:[#allocation2 + $0x16]] }
  0x57   :  { %v804_v60 = vmul.f32 %v802_v58, %v3742_v1  ;;  %v803_v62 = vmul.f32 %v802_v58, %v3737_v0  ;;  %s4312_s9 = sld [smem:[#allocation2 + $0x33]] }
  0x59   :  { %502 = vrot.lane.b32.xlu1 %v3361_v61, %s3700_s28  ;;  %v3392_v61 = vrot.slane %v781_v57, 10  ;;  %v3396_v2 = vrot.slane %v804_v60, 10  ;;  %v1025_v57 = vstv %s3417_s10  ;;  %s3474_s10 = sld [smem:[#allocation2 + $0x71]] }
  0x5a   :  { %500 = vrot.lane.b32.xlu0 %v3360_v63, %s3700_s28  ;;  %v824_v63 = vstv %s3397_s26  ;;  %s3458_s26 = sld [smem:[#allocation2 + $0x31]] }
  0x5b   :  { %v825_v5 = vmul.f32 %v824_v63, %v3737_v0 }
  0x5d   :  { %524 = vrot.lane.b32.xlu1 %v3364_v3, %s3700_s28  ;;  %v826_v3 = vmul.f32 %v824_v63, %v3742_v1  ;;  %v1026_v63 = vmul.f32 %v1025_v57, %v3737_v0 }
  0x5e   :  { %522 = vrot.lane.b32.xlu0 %v3363_v4, %s3700_s28  ;;  %v3395_v4 = vrot.slane %v803_v62, 10  ;;  %s3401_s28 = sld [smem:[#allocation2 + $0x1e]] }
  0x61   :  { %542 = vrot.lane.b32.xlu1 %v537_v6, %s3701_s17  ;;  %v3399_v6 = vrot.slane %v826_v3, 10 }
  0x62   :  { %540 = vrot.lane.b32.xlu0 %v536_v7, %s3701_s17  ;;  %v3398_v7 = vrot.slane %v825_v5, 10 }
  0x65   :  { %561 = vrot.lane.b32.xlu1 %v556_v9, %s3701_s17 }
  0x66   :  { %559 = vrot.lane.b32.xlu0 %v555_v10, %s3701_s17 }
  0x69   :  { %579 = vrot.lane.b32.xlu1 %v574_v12, %s3701_s17  ;;  %v847_v12 = vmul.f32 %v846_v8, %v3737_v0 }
  0x6a   :  { %577 = vrot.lane.b32.xlu0 %v573_v13, %s3701_s17  ;;  %v865_v13 = vstv %s3401_s28  ;;  %s3464_s28 = sld [smem:[#allocation2 + $0x67]] }
  0x6b   :  { %v866_v17 = vmul.f32 %v865_v13, %v3737_v0 }
  0x6d   :  { %597 = vrot.lane.b32.xlu1 %v592_v15, %s3701_s17 }
  0x6e   :  { %595 = vrot.lane.b32.xlu0 %v591_v16, %s3701_s17  ;;  %v867_v16 = vmul.f32 %v865_v13, %v3742_v1 }
  0x71   :  { %615 = vrot.lane.b32.xlu1 %v610_v19, %s3701_s17 }
  0x72   :  { %613 = vrot.lane.b32.xlu0 %v609_v21, %s3701_s17  ;;  %v885_v21 = vmul.f32 %v883_v18, %v3742_v1 }
  0x75   :  { %637 = vrot.lane.b32.xlu1 %v3372_v24, %s3701_s17 }
  0x76   :  { %635 = vrot.lane.b32.xlu0 %v3371_v26, %s3701_s17  ;;  %v903_v26 = vmul.f32 %v901_v23, %v3742_v1 }
  0x79   :  { %659 = vrot.lane.b32.xlu1 %v3375_v29, %s3701_s17  ;;  %v937_v29 = vstv %s3405_s6  ;;  %s3473_s6 = sld [smem:[#allocation2 + $0x56]] }
  0x7a   :  { %657 = vrot.lane.b32.xlu0 %v3374_v31, %s3701_s17  ;;  %v939_v33 = vmul.f32 %v937_v29, %v3742_v1  ;;  %v938_v35 = vmul.f32 %v937_v29, %v3737_v0 }
  0x7d   :  { %681 = vrot.lane.b32.xlu1 %v3378_v34, %s3701_s17  ;;  %v920_v34 = vmul.f32 %v919_v28, %v3737_v0 }
  0x7e   :  { %679 = vrot.lane.b32.xlu0 %v3377_v36, %s3701_s17  ;;  %v959_v36 = vstv %s3408_s7  ;;  %s3704_s7 = smov 110  }
  0x7f   :  { %v961_v40 = vmul.f32 %v959_v36, %v3742_v1  ;;  %v960_v42 = vmul.f32 %v959_v36, %v3737_v0 }
  0x81   :  { %703 = vrot.lane.b32.xlu1 %v3381_v39, %s3701_s17  ;;  %v3407_v39 = vrot.slane %v939_v33, 9  ;;  %v3409_v48 = vrot.slane %v960_v42, 9  ;;  %v1113_v33 = vstv %s3429_s14  ;;  %v1135_v42 = vstv %s3432_s15  ;;  %s3478_s14 = sld [smem:[#allocation2 + $0x29]] }
  0x82   :  { %701 = vrot.lane.b32.xlu0 %v3380_v41, %s3701_s17  ;;  %v3406_v41 = vrot.slane %v938_v35, 9  ;;  %s3481_s15 = sld [smem:[#allocation2 + $0x44]] }
  0x85   :  { %725 = vrot.lane.b32.xlu1 %v3384_v44, %s3701_s17 }
  0x86   :  { %723 = vrot.lane.b32.xlu0 %v3383_v46, %s3701_s17  ;;  %v3410_v46 = vrot.slane %v961_v40, 9 }
  0x89   :  { %747 = vrot.lane.b32.xlu1 %v3387_v49, %s3701_s17  ;;  %v982_v49 = vmul.f32 %v981_v43, %v3737_v0 }
  0x8a   :  { %745 = vrot.lane.b32.xlu0 %v3386_v51, %s3701_s17 }
  0x8b   :  { %v3412_v55 = vrot.slane %v982_v49, 9 }
  0x8d   :  { %769 = vrot.lane.b32.xlu1 %v3390_v54, %s3701_s17  ;;  %v1005_v54 = vmul.f32 %v1003_v50, %v3742_v1 }
  0x8e   :  { %767 = vrot.lane.b32.xlu0 %v3389_v56, %s3701_s17  ;;  %v1004_v56 = vmul.f32 %v1003_v50, %v3737_v0  ;;  %v1136_v50 = vmul.f32 %v1135_v42, %v3737_v0 }
  0x8f   :  { %v3416_v60 = vrot.slane %v1005_v54, 9 }
  0x90   :  { %v3415_v62 = vrot.slane %v1004_v56, 9  ;;  %v3433_v56 = vrot.slane %v1136_v50, 10 }
  0x91   :  { %791 = vrot.lane.b32.xlu1 %v3393_v59, %s3701_s17 }
  0x92   :  { %789 = vrot.lane.b32.xlu0 %v3392_v61, %s3701_s17  ;;  %v1027_v61 = vmul.f32 %v1025_v57, %v3742_v1  ;;  %v1157_v57 = vstv %s3435_s16  ;;  %s3484_s16 = sld [smem:[#allocation2 + $0x5f]] }
  0x94   :  { %v3419_v5 = vrot.slane %v1027_v61, 9 }
  0x95   :  { %813 = vrot.lane.b32.xlu1 %v3396_v2, %s3701_s17  ;;  %v1047_v2 = vstv %s3420_s11  ;;  %s4318_s11 = sld [smem:[#allocation2]] }
  0x96   :  { %811 = vrot.lane.b32.xlu0 %v3395_v4, %s3701_s17  ;;  %v1048_v8 = vmul.f32 %v1047_v2, %v3737_v0 }
  0x97   :  { %v3862_v9 = vpop.permute.xlu1 %248 }
  0x98   :  { %v3864_v10 = vpop.permute.xlu0 %229  ;;  %v3421_v18 = vrot.slane %v1048_v8, 10 }
  0x99   :  { %835 = vrot.lane.b32.xlu1 %v3399_v6, %s3701_s17  ;;  %v1049_v6 = vmul.f32 %v1047_v2, %v3742_v1 }
  0x9a   :  { %833 = vrot.lane.b32.xlu0 %v3398_v7, %s3701_s17  ;;  %v3418_v7 = vrot.slane %v1026_v63, 9  ;;  %s3436_s17 = sld [smem:[#allocation2 + $0x1f]]  ;;  %v1158_v63 = vmul.f32 %v1157_v57, %v3737_v0 }
  0x9b   :  { %v3870_v14 = vpop.permute.xlu1 %250 }
  0x9c   :  { %v3872_v15 = vpop.permute.xlu0 %231 }
  0x9d   :  { %853 = vrot.lane.b32.xlu1 %v848_v11, %s3702_s4  ;;  %v1069_v11 = vstv %s3423_s12  ;;  %s4322_s12 = sld [smem:[#allocation2 + $0x9]] }
  0x9e   :  { %851 = vrot.lane.b32.xlu0 %v847_v12, %s3702_s4 }
  0x9f   :  { %v3878_v19 = vpop.permute.xlu1 %268 }
  0xa0   :  { %v3880_v20 = vpop.permute.xlu0 %266  ;;  %v1176_v2 = vstv %s3436_s17  ;;  %s3487_s17 = sld [smem:[#allocation2 + $0x7a]] }
  0xa1   :  { %872 = vrot.lane.b32.xlu1 %v867_v16, %s3702_s4  ;;  %v3422_v16 = vrot.slane %v1049_v6, 10  ;;  %v1177_v8 = vmul.f32 %v1176_v2, %v3737_v0 }
  0xa2   :  { %870 = vrot.lane.b32.xlu0 %v866_v17, %s3702_s4  ;;  %v1071_v17 = vmul.f32 %v1069_v11, %v3742_v1 }
  0xa3   :  { %v3886_v24 = vpop.permute.xlu1 %286 }
  0xa4   :  { %v3888_v25 = vpop.permute.xlu0 %284 }
  0xa5   :  { %890 = vrot.lane.b32.xlu1 %v885_v21, %s3702_s4  ;;  %v1070_v21 = vmul.f32 %v1069_v11, %v3737_v0  ;;  %v1194_v11 = vstv %s3437_s18  ;;  %s3490_s18 = sld [smem:[#allocation2 + $0x17]] }
  0xa6   :  { %888 = vrot.lane.b32.xlu0 %v884_v22, %s3702_s4  ;;  %v1091_v22 = vstv %s3426_s13  ;;  %s3475_s13 = sld [smem:[#allocation2 + $0xe]] }
  0xa7   :  { %v3894_v30 = vpop.permute.xlu1 %304  ;;  %v1093_v28 = vmul.f32 %v1091_v22, %v3742_v1  ;;  %v3424_v29 = vrot.slane %v1070_v21, 10  ;;  %v1195_v21 = vmul.f32 %v1194_v11, %v3737_v0 }
  0xa8   :  { %v3896_v31 = vpop.permute.xlu0 %302 }
  0xa9   :  { %908 = vrot.lane.b32.xlu1 %v903_v26, %s3702_s4  ;;  %v3428_v36 = vrot.slane %v1093_v28, 10 }
  0xaa   :  { %906 = vrot.lane.b32.xlu0 %v902_v27, %s3702_s4  ;;  %v3425_v27 = vrot.slane %v1071_v17, 10 }
  0xab   :  { %v3904_v37 = vpop.permute.xlu1 %326 }
  0xac   :  { %v3906_v38 = vpop.permute.xlu0 %324 }
  0xad   :  { %926 = vrot.lane.b32.xlu1 %v921_v32, %s3702_s4  ;;  %v1092_v32 = vmul.f32 %v1091_v22, %v3737_v0  ;;  %v1212_v22 = vstv %s3438_s19  ;;  %s3493_s19 = sld [smem:[#allocation2 + $0x32]] }
  0xae   :  { %924 = vrot.lane.b32.xlu0 %v920_v34, %s3702_s4 }
  0xaf   :  { %v3912_v44 = vpop.permute.xlu1 %348  ;;  %v3427_v40 = vrot.slane %v1092_v32, 10  ;;  %v1213_v32 = vmul.f32 %v1212_v22, %v3737_v0 }
  0xb0   :  { %v3914_v45 = vpop.permute.xlu0 %346 }
  0xb1   :  { %948 = vrot.lane.b32.xlu1 %v3407_v39, %s3702_s4  ;;  %v1115_v39 = vmul.f32 %v1113_v33, %v3742_v1 }
  0xb2   :  { %946 = vrot.lane.b32.xlu0 %v3406_v41, %s3702_s4  ;;  %v1114_v41 = vmul.f32 %v1113_v33, %v3737_v0  ;;  %v1230_v33 = vstv %s3439_s1  ;;  %s3499_s1 = sld [smem:[#allocation2 + $0x68]] }
  0xb3   :  { %v3920_v51 = vpop.permute.xlu1 %370  ;;  %v3431_v47 = vrot.slane %v1115_v39, 10 }
  0xb4   :  { %v3922_v52 = vpop.permute.xlu0 %368  ;;  %v3430_v49 = vrot.slane %v1114_v41, 10  ;;  %v1232_v41 = vmul.f32 %v1230_v33, %v3742_v1 }
  0xb5   :  { %970 = vrot.lane.b32.xlu1 %v3410_v46, %s3702_s4 }
  0xb6   :  { %968 = vrot.lane.b32.xlu0 %v3409_v48, %s3702_s4  ;;  %v1137_v48 = vmul.f32 %v1135_v42, %v3742_v1 }
  0xb7   :  { %v3928_v58 = vpop.permute.xlu1 %392 }
  0xb8   :  { %v3930_v59 = vpop.permute.xlu0 %390 }
  0xb9   :  { %6401 = vst [vmem:[#allocation8_spill] sm:$0xff] %v3930_v59  ;;  %992 = vrot.lane.b32.xlu1 %v3413_v53, %s3702_s4 }
  0xba   :  { %990 = vrot.lane.b32.xlu0 %v3412_v55, %s3702_s4  ;;  %v3434_v55 = vrot.slane %v1137_v48, 10 }
  0xbb   :  { %v3936_v3 = vpop.permute.xlu1 %414 }
  0xbc   :  { %6402 = vst [vmem:[#allocation9_spill] sm:$0xff] %v3936_v3  ;;  %v3938_v4 = vpop.permute.xlu0 %412 }
  0xbd   :  { %6403 = vst [vmem:[#allocation10_spill] sm:$0xff] %v3938_v4  ;;  %1014 = vrot.lane.b32.xlu1 %v3416_v60, %s3702_s4 }
  0xbe   :  { %1012 = vrot.lane.b32.xlu0 %v3415_v62, %s3702_s4  ;;  %v1159_v62 = vmul.f32 %v1157_v57, %v3742_v1 }
  0xbf   :  { %v3944_v12 = vpop.permute.xlu1 %436 }
  0xc0   :  { %6404 = vst [vmem:[#allocation11_spill] sm:$0xff] %v3944_v12  ;;  %v3946_v13 = vpop.permute.xlu0 %434 }
  0xc1   :  { %6405 = vst [vmem:[#allocation12_spill] sm:$0xff] %v3946_v13  ;;  %1036 = vrot.lane.b32.xlu1 %v3419_v5, %s3702_s4 }
  0xc2   :  { %1034 = vrot.lane.b32.xlu0 %v3418_v7, %s3702_s4  ;;  %v1178_v7 = vmul.f32 %v1176_v2, %v3742_v1  ;;  %v1292_v2 = vstv %s3446_s22  ;;  %s3506_s22 = sld [smem:[#allocation2 + $0x21]] }
  0xc3   :  { %v3952_v23 = vpop.permute.xlu1 %458 }
  0xc4   :  { %6406 = vst [vmem:[#allocation13_spill] sm:$0xff] %v3952_v23  ;;  %v3954_v26 = vpop.permute.xlu0 %456 }
  0xc5   :  { %6407 = vst [vmem:[#allocation14_spill] sm:$0xff] %v3954_v26  ;;  %1058 = vrot.lane.b32.xlu1 %v3422_v16, %s3702_s4 }
  0xc6   :  { %1056 = vrot.lane.b32.xlu0 %v3421_v18, %s3702_s4  ;;  %v1196_v18 = vmul.f32 %v1194_v11, %v3742_v1 }
  0xc7   :  { %v3960_v34 = vpop.permute.xlu1 %480 }
  0xc8   :  { %6408 = vst [vmem:[#allocation15_spill] sm:$0xff] %v3960_v34  ;;  %v3962_v35 = vpop.permute.xlu0 %478 }
  0xc9   :  { %6409 = vst [vmem:[#allocation16_spill] sm:$0xff] %v3962_v35  ;;  %1080 = vrot.lane.b32.xlu1 %v3425_v27, %s3702_s4 }
  0xca   :  { %1078 = vrot.lane.b32.xlu0 %v3424_v29, %s3702_s4  ;;  %v1214_v29 = vmul.f32 %v1212_v22, %v3742_v1  ;;  %v1293_v22 = vmul.f32 %v1292_v2, %v3737_v0 }
  0xcb   :  { %v3968_v43 = vpop.permute.xlu1 %502 }
  0xcc   :  { %6410 = vst [vmem:[#allocation17_spill] sm:$0xff] %v3968_v43  ;;  %v3970_v46 = vpop.permute.xlu0 %500 }
  0xcd   :  { %6411 = vst [vmem:[#allocation18_spill] sm:$0xff] %v3970_v46  ;;  %1102 = vrot.lane.b32.xlu1 %v3428_v36, %s3702_s4  ;;  %v1248_v36 = vstv %s3440_s2  ;;  %s3502_s2 = sld [smem:[#allocation2 + $0x83]] }
  0xce   :  { %1100 = vrot.lane.b32.xlu0 %v3427_v40, %s3702_s4  ;;  %v1250_v42 = vmul.f32 %v1248_v36, %v3742_v1  ;;  %v1249_v48 = vmul.f32 %v1248_v36, %v3737_v0 }
  0xcf   :  { %v3976_v53 = vpop.permute.xlu1 %524 }
  0xd0   :  { %6412 = vst [vmem:[#allocation19_spill] sm:$0xff] %v3976_v53  ;;  %v3978_v54 = vpop.permute.xlu0 %522 }
  0xd1   :  { %6413 = vst [vmem:[#allocation20_spill] sm:$0xff] %v3978_v54  ;;  %1124 = vrot.lane.b32.xlu1 %v3431_v47, %s3702_s4  ;;  %v1231_v47 = vmul.f32 %v1230_v33, %v3737_v0 }
  0xd2   :  { %1122 = vrot.lane.b32.xlu0 %v3430_v49, %s3702_s4  ;;  %v1270_v49 = vstv %s3443_s21  ;;  %s3505_s21 = sld [smem:[#allocation2 + $0x6]] }
  0xd3   :  { %v3982_v60 = vpop.permute.xlu1 %542  ;;  %v1272_v57 = vmul.f32 %v1270_v49, %v3742_v1 }
  0xd4   :  { %6414 = vst [vmem:[#allocation21_spill] sm:$0xff] %v3982_v60  ;;  %v3984_v61 = vpop.permute.xlu0 %540 }
  0xd5   :  { %6415 = vst [vmem:[#allocation22_spill] sm:$0xff] %v3984_v61  ;;  %1146 = vrot.lane.b32.xlu1 %v3434_v55, %s3702_s4  ;;  %v3445_v11 = vrot.slane %v1272_v57, 9 }
  0xd6   :  { %1144 = vrot.lane.b32.xlu0 %v3433_v56, %s3702_s4  ;;  %v3442_v56 = vrot.slane %v1250_v42, 9  ;;  %v3447_v42 = vrot.slane %v1293_v22, 9  ;;  %s3471_s4 = sld [smem:[#allocation2 + $0x20]] }
  0xd7   :  { %v3990_v5 = vpop.permute.xlu1 %561 }
  0xd8   :  { %6416 = vst [vmem:[#allocation23_spill] sm:$0xff] %v3990_v5  ;;  %v3992_v6 = vpop.permute.xlu0 %559 }
  0xd9   :  { %6417 = vst [vmem:[#allocation24_spill] sm:$0xff] %v3992_v6  ;;  %1164 = vrot.lane.b32.xlu1 %v1159_v62, %s3703_s20  ;;  %v3441_v62 = vrot.slane %v1249_v48, 9  ;;  %v1336_v48 = vstv %s3452_s24  ;;  %s3508_s24 = sld [smem:[#allocation2 + $0x57]] }
  0xda   :  { %1162 = vrot.lane.b32.xlu0 %v1158_v63, %s3703_s20  ;;  %v1271_v63 = vmul.f32 %v1270_v49, %v3737_v0 }
  0xdb   :  { %v3998_v16 = vpop.permute.xlu1 %579 }
  0xdc   :  { %6418 = vst [vmem:[#allocation25_spill] sm:$0xff] %v3998_v16  ;;  %v4000_v17 = vpop.permute.xlu0 %577 }
  0xdd   :  { %6419 = vst [vmem:[#allocation26_spill] sm:$0xff] %v4000_v17  ;;  %1183 = vrot.lane.b32.xlu1 %v1178_v7, %s3703_s20 }
  0xde   :  { %1181 = vrot.lane.b32.xlu0 %v1177_v8, %s3703_s20 }
  0xdf   :  { %v4006_v27 = vpop.permute.xlu1 %597 }
  0xe0   :  { %6420 = vst [vmem:[#allocation27_spill] sm:$0xff] %v4006_v27  ;;  %v4008_v28 = vpop.permute.xlu0 %595 }
  0xe1   :  { %6421 = vst [vmem:[#allocation28_spill] sm:$0xff] %v4008_v28  ;;  %1201 = vrot.lane.b32.xlu1 %v1196_v18, %s3703_s20  ;;  %v1294_v18 = vmul.f32 %v1292_v2, %v3742_v1  ;;  %v1337_v2 = vmul.f32 %v1336_v48, %v3737_v0 }
  0xe2   :  { %1199 = vrot.lane.b32.xlu0 %v1195_v21, %s3703_s20  ;;  %v3444_v21 = vrot.slane %v1271_v63, 9 }
  0xe3   :  { %v4014_v39 = vpop.permute.xlu1 %615  ;;  %v3448_v36 = vrot.slane %v1294_v18, 9 }
  0xe4   :  { %6422 = vst [vmem:[#allocation29_spill] sm:$0xff] %v4014_v39  ;;  %v4016_v40 = vpop.permute.xlu0 %613 }
  0xe5   :  { %6423 = vst [vmem:[#allocation30_spill] sm:$0xff] %v4016_v40  ;;  %1219 = vrot.lane.b32.xlu1 %v1214_v29, %s3703_s20  ;;  %v1314_v29 = vstv %s3449_s23  ;;  %s3507_s23 = sld [smem:[#allocation2 + $0x3c]] }
  0xe6   :  { %1217 = vrot.lane.b32.xlu0 %v1213_v32, %s3703_s20 }
  0xe7   :  { %v4024_v50 = vpop.permute.xlu1 %637 }
  0xe8   :  { %6424 = vst [vmem:[#allocation31_spill] sm:$0xff] %v4024_v50  ;;  %v4026_v55 = vpop.permute.xlu0 %635 }
  0xe9   :  { %6425 = vst [vmem:[#allocation32_spill] sm:$0xff] %v4026_v55  ;;  %1237 = vrot.lane.b32.xlu1 %v1232_v41, %s3703_s20  ;;  %v1316_v41 = vmul.f32 %v1314_v29, %v3742_v1 }
  0xea   :  { %1235 = vrot.lane.b32.xlu0 %v1231_v47, %s3703_s20  ;;  %v1315_v47 = vmul.f32 %v1314_v29, %v3737_v0 }
  0xeb   :  { %v4032_v7 = vpop.permute.xlu1 %659  ;;  %v3451_v57 = vrot.slane %v1316_v41, 9 }
  0xec   :  { %6426 = vst [vmem:[#allocation33_spill] sm:$0xff] %v4032_v7  ;;  %v4034_v8 = vpop.permute.xlu0 %657  ;;  %v3450_v63 = vrot.slane %v1315_v47, 9 }
  0xed   :  { %6427 = vst [vmem:[#allocation34_spill] sm:$0xff] %v4034_v8  ;;  %1259 = vrot.lane.b32.xlu1 %v3442_v56, %s3703_s20 }
  0xee   :  { %1257 = vrot.lane.b32.xlu0 %v3441_v62, %s3703_s20  ;;  %v1338_v62 = vmul.f32 %v1336_v48, %v3742_v1 }
  0xef   :  { %v4040_v32 = vpop.permute.xlu1 %681 }
  0xf0   :  { %6428 = vst [vmem:[#allocation35_spill] sm:$0xff] %v4040_v32  ;;  %v4042_v33 = vpop.permute.xlu0 %679  ;;  %v3454_v22 = vrot.slane %v1338_v62, 9 }
  0xf1   :  { %6429 = vst [vmem:[#allocation36_spill] sm:$0xff] %v4042_v33  ;;  %1281 = vrot.lane.b32.xlu1 %v3445_v11, %s3703_s20  ;;  %v1358_v11 = vstv %s3455_s25  ;;  %s3705_s25 = smov 96  }
  0xf2   :  { %1279 = vrot.lane.b32.xlu0 %v3444_v21, %s3703_s20  ;;  %v1360_v29 = vmul.f32 %v1358_v11, %v3742_v1  ;;  %v1359_v41 = vmul.f32 %v1358_v11, %v3737_v0 }
  0xf3   :  { %v4048_v49 = vpop.permute.xlu1 %703 }
  0xf4   :  { %6430 = vst [vmem:[#allocation37_spill] sm:$0xff] %v4048_v49  ;;  %v4050_v56 = vpop.permute.xlu0 %701 }
  0xf5   :  { %6431 = vst [vmem:[#allocation38_spill] sm:$0xff] %v4050_v56  ;;  %1303 = vrot.lane.b32.xlu1 %v3448_v36, %s3703_s20  ;;  %v3453_v36 = vrot.slane %v1337_v2, 9  ;;  %v1446_v56 = vstv %s3467_s29  ;;  %s3516_s29 = sld [smem:[#allocation2 + $0x45]] }
  0xf6   :  { %1301 = vrot.lane.b32.xlu0 %v3447_v42, %s3703_s20  ;;  %v1380_v42 = vstv %s3458_s26  ;;  %s3509_s26 = sld [smem:[#allocation2 + $0x72]] }
  0xf7   :  { %v4056_v18 = vpop.permute.xlu1 %725  ;;  %v1381_v62 = vmul.f32 %v1380_v42, %v3737_v0 }
  0xf8   :  { %6432 = vst [vmem:[#allocation39_spill] sm:$0xff] %v4056_v18  ;;  %v4058_v21 = vpop.permute.xlu0 %723  ;;  %v3457_v18 = vrot.slane %v1360_v29, 10 }
  0xf9   :  { %6433 = vst [vmem:[#allocation40_spill] sm:$0xff] %v4058_v21  ;;  %1325 = vrot.lane.b32.xlu1 %v3451_v57, %s3703_s20  ;;  %v1382_v21 = vmul.f32 %v1380_v42, %v3742_v1  ;;  %v3456_v57 = vrot.slane %v1359_v41, 10 }
  0xfa   :  { %1323 = vrot.lane.b32.xlu0 %v3450_v63, %s3703_s20  ;;  %v1402_v63 = vstv %s3461_s27  ;;  %s3510_s27 = sld [smem:[#allocation2 + $0xf]] }
  0xfb   :  { %v4064_v47 = vpop.permute.xlu1 %747  ;;  %v1403_v29 = vmul.f32 %v1402_v63, %v3737_v0 }
  0xfc   :  { %6434 = vst [vmem:[#allocation41_spill] sm:$0xff] %v4064_v47  ;;  %v4066_v48 = vpop.permute.xlu0 %745  ;;  %v3460_v47 = vrot.slane %v1382_v21, 10 }
  0xfd   :  { %6435 = vst [vmem:[#allocation42_spill] sm:$0xff] %v4066_v48  ;;  %1347 = vrot.lane.b32.xlu1 %v3454_v22, %s3703_s20  ;;  %v1404_v48 = vmul.f32 %v1402_v63, %v3742_v1  ;;  %v3459_v22 = vrot.slane %v1381_v62, 10 }
  0xfe   :  { %1345 = vrot.lane.b32.xlu0 %v3453_v36, %s3703_s20  ;;  %v1424_v36 = vstv %s3464_s28  ;;  %s3513_s28 = sld [smem:[#allocation2 + $0x2a]] }
  0xff   :  { %v4072_v2 = vpop.permute.xlu1 %769  ;;  %v1425_v21 = vmul.f32 %v1424_v36, %v3737_v0 }
 0x100   :  { %6436 = vst [vmem:[#allocation43_spill] sm:$0xff] %v4072_v2  ;;  %v4074_v11 = vpop.permute.xlu0 %767  ;;  %v3463_v2 = vrot.slane %v1404_v48, 10  ;;  %v1447_v48 = vmul.f32 %v1446_v56, %v3737_v0 }
 0x101   :  { %6437 = vst [vmem:[#allocation44_spill] sm:$0xff] %v4074_v11  ;;  %1369 = vrot.lane.b32.xlu1 %v3457_v18, %s3703_s20  ;;  %v1426_v11 = vmul.f32 %v1424_v36, %v3742_v1  ;;  %v3462_v18 = vrot.slane %v1403_v29, 10 }
 0x102   :  { %1367 = vrot.lane.b32.xlu0 %v3456_v57, %s3703_s20 }
 0x103   :  { %v4080_v41 = vpop.permute.xlu1 %791  ;;  %v3466_v63 = vrot.slane %v1426_v11, 10 }
 0x104   :  { %6438 = vst [vmem:[#allocation45_spill] sm:$0xff] %v4080_v41  ;;  %v4082_v42 = vpop.permute.xlu0 %789  ;;  %v1757_v41 = vstv %s3502_s2  ;;  %s4386_s2 = sld [smem:[#allocation4 + $0x3]] }
 0x105   :  { %6439 = vst [vmem:[#allocation46_spill] sm:$0xff] %v4082_v42  ;;  %1391 = vrot.lane.b32.xlu1 %v3460_v47, %s3703_s20  ;;  %v1448_v42 = vmul.f32 %v1446_v56, %v3742_v1  ;;  %v3465_v47 = vrot.slane %v1425_v21, 10  ;;  %v1487_v21 = vstv %s3471_s4  ;;  %s4284_s4 = sld [smem:[#allocation2 + $0x7b]] }
 0x106   :  { %1389 = vrot.lane.b32.xlu0 %v3459_v22, %s3703_s20 }
 0x107   :  { %v4088_v57 = vpop.permute.xlu1 %813  ;;  %v3469_v36 = vrot.slane %v1448_v42, 10 }
 0x108   :  { %6440 = vst [vmem:[#allocation47_spill] sm:$0xff] %v4088_v57  ;;  %v4090_v62 = vpop.permute.xlu0 %811 }
 0x109   :  { %6441 = vst [vmem:[#allocation48_spill] sm:$0xff] %v4090_v62  ;;  %1413 = vrot.lane.b32.xlu1 %v3463_v2, %s3703_s20  ;;  %v3468_v62 = vrot.slane %v1447_v48, 10  ;;  %v1468_v2 = vstv %s3470_s30  ;;  %v1505_v48 = vstv %s3472_s5  ;;  %s4274_s30 = sld [smem:[#allocation2 + $0x60]] }
 0x10a   :  { %1411 = vrot.lane.b32.xlu0 %v3462_v18, %s3703_s20  ;;  %v1470_v56 = vmul.f32 %v1468_v2, %v3742_v1  ;;  %v1469_v18 = vmul.f32 %v1468_v2, %v3737_v0  ;;  %v4125_v0 = vld [vmem:[%s6245_s0] sm:$0x77]  ;;  %s4295_s5 = sld [smem:[#allocation2 + $0x18]] }
 0x10b   :  { %v4096_v22 = vpop.permute.xlu1 %835 }
 0x10c   :  { %6442 = vst [vmem:[#allocation49_spill] sm:$0xff] %v4096_v22  ;;  %v4098_v29 = vpop.permute.xlu0 %833  ;;  %v1603_v22 = vstv %s3481_s15  ;;  %s4340_s15 = sld [smem:[#allocation4]] }
 0x10d   :  { %6443 = vst [vmem:[#allocation50_spill] sm:$0xff] %v4098_v29  ;;  %1435 = vrot.lane.b32.xlu1 %v3466_v63, %s3703_s20 }
 0x10e   :  { %1433 = vrot.lane.b32.xlu0 %v3465_v47, %s3703_s20  ;;  %v4118_v47 = vld [vmem:[%s6245_s0 + $0xc] sm:$0x77] }
 0x10f   :  { %v4102_v11 = vpop.permute.xlu1 %853  ;;  %v1489_v1 = vmul.f32 %v4118_v47, %v1487_v21 }
 0x110   :  { %6444 = vst [vmem:[#allocation51_spill] sm:$0xff] %v4102_v11  ;;  %v4104_v57 = vpop.permute.xlu0 %851 }
 0x111   :  { %6445 = vst [vmem:[#allocation52_spill] sm:$0xff] %v4104_v57  ;;  %1457 = vrot.lane.b32.xlu1 %v3469_v36, %s3703_s20 }
 0x112   :  { %1455 = vrot.lane.b32.xlu0 %v3468_v62, %s3703_s20  ;;  %v1488_v62 = vmul.f32 %v4125_v0, %v1487_v21  ;;  %s3496_s20 = sld [smem:[#allocation2 + $0x4d]]  ;;  %v44_v39 = vstv %s4340_s15 }
 0x113   :  { %v4110_v42 = vpop.permute.xlu1 %872  ;;  %s5521_s15 = sld [smem:[#allocation2 + $0x35]] }
 0x114   :  { %6446 = vst [vmem:[#allocation53_spill] sm:$0xff] %v4110_v42  ;;  %v4112_v63 = vpop.permute.xlu0 %870 }
 0x115   :  { %6447 = vst [vmem:[#allocation54_spill] sm:$0xff] %v4112_v63  ;;  %1475 = vrot.lane.b32.xlu1 %v1470_v56, %s3704_s7  ;;  %v1507_v56 = vmul.f32 %v4118_v47, %v1505_v48  ;;  %v1523_v63 = vstv %s3473_s6  ;;  %s4297_s6 = sld [smem:[#allocation2 + $0x1b]] }
 0x116   :  { %1473 = vrot.lane.b32.xlu0 %v1469_v18, %s3704_s7  ;;  %v1506_v18 = vmul.f32 %v4125_v0, %v1505_v48  ;;  %v1525_v21 = vmul.f32 %v4118_v47, %v1523_v63 }
 0x117   :  { %v4128_v36 = vpop.permute.xlu1 %890 }
 0x118   :  { %6448 = vst [vmem:[#allocation55_spill] sm:$0xff] %v4128_v36  ;;  %v4130_v2 = vpop.permute.xlu0 %888  ;;  %v1559_v36 = vstv %s3475_s13  ;;  %s4329_s13 = sld [smem:[#allocation2 + $0x4e]] }
 0x119   :  { %6449 = vst [vmem:[#allocation56_spill] sm:$0xff] %v4130_v2  ;;  %1494 = vrot.lane.b32.xlu1 %v1489_v1, %s3704_s7  ;;  %v1524_v1 = vmul.f32 %v4125_v0, %v1523_v63  ;;  %v1541_v2 = vstv %s3474_s10  ;;  %v1581_v63 = vstv %s3478_s14  ;;  %s4314_s10 = sld [smem:[#allocation4 + $0x1]] }
 0x11a   :  { %1492 = vrot.lane.b32.xlu0 %v1488_v62, %s3704_s7  ;;  %s4331_s14 = sld [smem:[#allocation2 + $0x12]] }
 0x11b   :  { %v4136_v42 = vpop.permute.xlu1 %908 }
 0x11c   :  { %6450 = vst [vmem:[#allocation57_spill] sm:$0xff] %v4136_v42  ;;  %v4138_v57 = vpop.permute.xlu0 %906  ;;  %v1543_v42 = vmul.f32 %v4118_v47, %v1541_v2 }
 0x11d   :  { %6451 = vst [vmem:[#allocation58_spill] sm:$0xff] %v4138_v57  ;;  %1512 = vrot.lane.b32.xlu1 %v1507_v56, %s3704_s7  ;;  %v1561_v57 = vmul.f32 %v4118_v47, %v1559_v36  ;;  %v1542_v56 = vmul.f32 %v4125_v0, %v1541_v2 }
 0x11e   :  { %1510 = vrot.lane.b32.xlu0 %v1506_v18, %s3704_s7  ;;  %v1560_v18 = vmul.f32 %v4125_v0, %v1559_v36  ;;  %v2024_v7 = vstv %s4329_s13  ;;  %s5394_s13 = sld [smem:[#allocation2 + $0x62]] }
 0x11f   :  { %v4144_v62 = vpop.permute.xlu1 %926 }
 0x120   :  { %6452 = vst [vmem:[#allocation59_spill] sm:$0xff] %v4144_v62  ;;  %v4146_v48 = vpop.permute.xlu0 %924  ;;  %v3476_v62 = vrot.slane %v1560_v18, 9  ;;  %v154_v55 = vstv %s4331_s14  ;;  %s4690_s14 = sld [smem:[#allocation2 + $0x2b]] }
 0x121   :  { %6453 = vst [vmem:[#allocation60_spill] sm:$0xff] %v4146_v48  ;;  %1530 = vrot.lane.b32.xlu1 %v1525_v21, %s3704_s7  ;;  %v3477_v48 = vrot.slane %v1561_v57, 9  ;;  %v1583_v21 = vmul.f32 %v4118_v47, %v1581_v63  ;;  %v4397_v28 = vmul.f32 %v4125_v0, %v154_v55 }
 0x122   :  { %1528 = vrot.lane.b32.xlu0 %v1524_v1, %s3704_s7  ;;  %v1582_v1 = vmul.f32 %v4125_v0, %v1581_v63 }
 0x123   :  { %v4154_v11 = vpop.permute.xlu1 %948 }
 0x124   :  { %6454 = vst [vmem:[#allocation61_spill] sm:$0xff] %v4154_v11  ;;  %v4156_v29 = vpop.permute.xlu0 %946  ;;  %v3480_v11 = vrot.slane %v1583_v21, 9  ;;  %v3479_v57 = vrot.slane %v1582_v1, 9 }
 0x125   :  { %6455 = vst [vmem:[#allocation62_spill] sm:$0xff] %v4156_v29  ;;  %1548 = vrot.lane.b32.xlu1 %v1543_v42, %s3704_s7  ;;  %v1605_v29 = vmul.f32 %v4118_v47, %v1603_v22  ;;  %v1604_v42 = vmul.f32 %v4125_v0, %v1603_v22 }
 0x126   :  { %1546 = vrot.lane.b32.xlu0 %v1542_v56, %s3704_s7  ;;  %v1625_v56 = vstv %s3484_s16  ;;  %s4347_s16 = sld [smem:[#allocation2 + $0x69]] }
 0x127   :  { %v4162_v2 = vpop.permute.xlu1 %970  ;;  %v1626_v21 = vmul.f32 %v4125_v0, %v1625_v56 }
 0x128   :  { %6456 = vst [vmem:[#allocation63_spill] sm:$0xff] %v4162_v2  ;;  %v4164_v36 = vpop.permute.xlu0 %968  ;;  %v3483_v2 = vrot.slane %v1605_v29, 9 }
 0x129   :  { %6457 = vst [vmem:[#allocation64_spill] sm:$0xff] %v4164_v36  ;;  %1570 = vrot.lane.b32.xlu1 %v3477_v48, %s3704_s7  ;;  %v1627_v36 = vmul.f32 %v4118_v47, %v1625_v56  ;;  %v3482_v48 = vrot.slane %v1604_v42, 9  ;;  %v3485_v29 = vrot.slane %v1626_v21, 9 }
 0x12a   :  { %1568 = vrot.lane.b32.xlu0 %v3476_v62, %s3704_s7  ;;  %v1647_v62 = vstv %s3487_s17  ;;  %s4357_s17 = sld [smem:[#allocation2 + $0x36]] }
 0x12b   :  { %v4170_v18 = vpop.permute.xlu1 %992 }
 0x12c   :  { %6458 = vst [vmem:[#allocation65_spill] sm:$0xff] %v4170_v18  ;;  %v4172_v63 = vpop.permute.xlu0 %990  ;;  %v3486_v18 = vrot.slane %v1627_v36, 9 }
 0x12d   :  { %6459 = vst [vmem:[#allocation66_spill] sm:$0xff] %v4172_v63  ;;  %1592 = vrot.lane.b32.xlu1 %v3480_v11, %s3704_s7  ;;  %v1649_v63 = vmul.f32 %v4118_v47, %v1647_v62  ;;  %v1648_v11 = vmul.f32 %v4125_v0, %v1647_v62 }
 0x12e   :  { %1590 = vrot.lane.b32.xlu0 %v3479_v57, %s3704_s7  ;;  %v1669_v57 = vstv %s3490_s18  ;;  %s4363_s18 = sld [smem:[#allocation2 + $0x3f]] }
 0x12f   :  { %v4178_v1 = vpop.permute.xlu1 %1014  ;;  %v1670_v36 = vmul.f32 %v4125_v0, %v1669_v57 }
 0x130   :  { %6460 = vst [vmem:[#allocation67_spill] sm:$0xff] %v4178_v1  ;;  %v4180_v22 = vpop.permute.xlu0 %1012  ;;  %v3489_v1 = vrot.slane %v1649_v63, 9 }
 0x131   :  { %6461 = vst [vmem:[#allocation68_spill] sm:$0xff] %v4180_v22  ;;  %1614 = vrot.lane.b32.xlu1 %v3483_v2, %s3704_s7  ;;  %v1671_v22 = vmul.f32 %v4118_v47, %v1669_v57  ;;  %v3488_v2 = vrot.slane %v1648_v11, 9 }
 0x132   :  { %1612 = vrot.lane.b32.xlu0 %v3482_v48, %s3704_s7  ;;  %v1691_v48 = vstv %s3493_s19  ;;  %s4370_s19 = sld [smem:[#allocation2 + $0x84]] }
 0x133   :  { %v4186_v42 = vpop.permute.xlu1 %1036  ;;  %v1692_v63 = vmul.f32 %v4125_v0, %v1691_v48 }
 0x134   :  { %6462 = vst [vmem:[#allocation69_spill] sm:$0xff] %v4186_v42  ;;  %v4188_v56 = vpop.permute.xlu0 %1034  ;;  %v3492_v42 = vrot.slane %v1671_v22, 10 }
 0x135   :  { %6463 = vst [vmem:[#allocation70_spill] sm:$0xff] %v4188_v56  ;;  %1636 = vrot.lane.b32.xlu1 %v3486_v18, %s3704_s7  ;;  %v1693_v56 = vmul.f32 %v4118_v47, %v1691_v48  ;;  %v3491_v18 = vrot.slane %v1670_v36, 10 }
 0x136   :  { %1634 = vrot.lane.b32.xlu0 %v3485_v29, %s3704_s7  ;;  %v1713_v29 = vstv %s3496_s20  ;;  %s4374_s20 = sld [smem:[#allocation4 + $0x2]] }
 0x137   :  { %v4194_v21 = vpop.permute.xlu1 %1058  ;;  %v1714_v22 = vmul.f32 %v4125_v0, %v1713_v29 }
 0x138   :  { %6464 = vst [vmem:[#allocation71_spill] sm:$0xff] %v4194_v21  ;;  %v4196_v62 = vpop.permute.xlu0 %1056  ;;  %v3495_v21 = vrot.slane %v1693_v56, 10 }
 0x139   :  { %6465 = vst [vmem:[#allocation72_spill] sm:$0xff] %v4196_v62  ;;  %1658 = vrot.lane.b32.xlu1 %v3489_v1, %s3704_s7  ;;  %v1715_v62 = vmul.f32 %v4118_v47, %v1713_v29  ;;  %v3494_v1 = vrot.slane %v1692_v63, 10 }
 0x13a   :  { %1656 = vrot.lane.b32.xlu0 %v3488_v2, %s3704_s7  ;;  %v1735_v2 = vstv %s3499_s1  ;;  %s4380_s1 = sld [smem:[#allocation2 + $0x48]] }
 0x13b   :  { %v4202_v11 = vpop.permute.xlu1 %1080  ;;  %v1736_v56 = vmul.f32 %v4125_v0, %v1735_v2 }
 0x13c   :  { %6466 = vst [vmem:[#allocation73_spill] sm:$0xff] %v4202_v11  ;;  %v4204_v57 = vpop.permute.xlu0 %1078  ;;  %v3498_v11 = vrot.slane %v1715_v62, 10  ;;  %v1758_v62 = vmul.f32 %v4125_v0, %v1757_v41 }
 0x13d   :  { %6467 = vst [vmem:[#allocation74_spill] sm:$0xff] %v4204_v57  ;;  %1680 = vrot.lane.b32.xlu1 %v3492_v42, %s3704_s7  ;;  %v1737_v57 = vmul.f32 %v4118_v47, %v1735_v2  ;;  %v3497_v42 = vrot.slane %v1714_v22, 10 }
 0x13e   :  { %1678 = vrot.lane.b32.xlu0 %v3491_v18, %s3704_s7 }
 0x13f   :  { %v4210_v36 = vpop.permute.xlu1 %1102  ;;  %v3501_v29 = vrot.slane %v1737_v57, 10 }
 0x140   :  { %6468 = vst [vmem:[#allocation75_spill] sm:$0xff] %v4210_v36  ;;  %v4212_v48 = vpop.permute.xlu0 %1100  ;;  %v46_v36 = vstv %s4314_s10  ;;  %s4616_s10 = sld [smem:[#allocation2 + $0x73]] }
 0x141   :  { %6469 = vst [vmem:[#allocation76_spill] sm:$0xff] %v4212_v48  ;;  %1702 = vrot.lane.b32.xlu1 %v3495_v21, %s3704_s7  ;;  %v1759_v48 = vmul.f32 %v4118_v47, %v1757_v41  ;;  %v3500_v21 = vrot.slane %v1736_v56, 10  ;;  %v1798_v56 = vstv %s3506_s22  ;;  %s4401_s22 = sld [smem:[#allocation2 + $0x5a]] }
 0x142   :  { %1700 = vrot.lane.b32.xlu0 %v3494_v1, %s3704_s7 }
 0x143   :  { %v4218_v18 = vpop.permute.xlu1 %1124  ;;  %v3504_v2 = vrot.slane %v1759_v48, 10 }
 0x144   :  { %6470 = vst [vmem:[#allocation77_spill] sm:$0xff] %v4218_v18  ;;  %v4220_v63 = vpop.permute.xlu0 %1122 }
 0x145   :  { %6471 = vst [vmem:[#allocation78_spill] sm:$0xff] %v4220_v63  ;;  %1724 = vrot.lane.b32.xlu1 %v3498_v11, %s3704_s7  ;;  %v3503_v63 = vrot.slane %v1758_v62, 10  ;;  %v1779_v11 = vstv %s3505_s21  ;;  %v1799_v62 = vmul.f32 %v4125_v0, %v1798_v56  ;;  %s4391_s21 = sld [smem:[#allocation2 + $0x51]] }
 0x146   :  { %1722 = vrot.lane.b32.xlu0 %v3497_v42, %s3704_s7  ;;  %v1781_v41 = vmul.f32 %v4118_v47, %v1779_v11  ;;  %v1780_v42 = vmul.f32 %v4125_v0, %v1779_v11 }
 0x147   :  { %v4226_v1 = vpop.permute.xlu1 %1146 }
 0x148   :  { %6472 = vst [vmem:[#allocation79_spill] sm:$0xff] %v4226_v1  ;;  %v4228_v22 = vpop.permute.xlu0 %1144 }
 0x149   :  { %6473 = vst [vmem:[#allocation80_spill] sm:$0xff] %v4228_v22  ;;  %1746 = vrot.lane.b32.xlu1 %v3501_v29, %s3704_s7  ;;  %v1914_v22 = vstv %s3516_s29  ;;  %s4446_s29 = sld [smem:[#allocation2 + $0x7e]] }
 0x14a   :  { %1744 = vrot.lane.b32.xlu0 %v3500_v21, %s3704_s7  ;;  %v1800_v21 = vmul.f32 %v4118_v47, %v1798_v56 }
 0x14b   :  { %v4232_v57 = vpop.permute.xlu1 %1164  ;;  %v72_v6 = vstv %s4391_s21  ;;  %s4984_s21 = sld [smem:[#allocation2 + $0x6a]] }
 0x14c   :  { %6474 = vst [vmem:[#allocation81_spill] sm:$0xff] %v4232_v57  ;;  %v4234_v18 = vpop.permute.xlu0 %1162 }
 0x14d   :  { %6475 = vst [vmem:[#allocation82_spill] sm:$0xff] %v4234_v18  ;;  %1768 = vrot.lane.b32.xlu1 %v3504_v2, %s3704_s7  ;;  %v1816_v2 = vstv %s3507_s23  ;;  %s4410_s23 = sld [smem:[#allocation2 + $0x6c]] }
 0x14e   :  { %1766 = vrot.lane.b32.xlu0 %v3503_v63, %s3704_s7  ;;  %s4301_s7 = sld [smem:[#allocation2 + $0x24]] }
 0x14f   :  { %v4240_v48 = vpop.permute.xlu1 %1183  ;;  %v210_v46 = vstv %s4446_s29  ;;  %s5148_s29 = sld [smem:[#allocation2 + $0x23]] }
 0x150   :  { %6476 = vst [vmem:[#allocation83_spill] sm:$0xff] %v4240_v48  ;;  %v4242_v29 = vpop.permute.xlu0 %1181  ;;  %v1834_v48 = vstv %s3508_s24  ;;  %s4416_s24 = sld [smem:[#allocation2 + $0x75]]  ;;  %v212_v13 = vmul.f32 %v4118_v47, %v210_v46 }
 0x151   :  { %6477 = vst [vmem:[#allocation84_spill] sm:$0xff] %v4242_v29  ;;  %1786 = vrot.lane.b32.xlu1 %v1781_v41, %s3705_s25  ;;  %v1818_v29 = vmul.f32 %v4118_v47, %v1816_v2  ;;  %v1817_v41 = vmul.f32 %v4125_v0, %v1816_v2  ;;  %v1836_v56 = vmul.f32 %v4118_v47, %v1834_v48 }
 0x152   :  { %1784 = vrot.lane.b32.xlu0 %v1780_v42, %s3705_s25 }
 0x153   :  { %v4248_v63 = vpop.permute.xlu1 %1201 }
 0x154   :  { %6478 = vst [vmem:[#allocation85_spill] sm:$0xff] %v4248_v63  ;;  %v4250_v11 = vpop.permute.xlu0 %1199  ;;  %v1870_v63 = vstv %s3510_s27  ;;  %s4429_s27 = sld [smem:[#allocation2 + $0x63]] }
 0x155   :  { %6479 = vst [vmem:[#allocation86_spill] sm:$0xff] %v4250_v11  ;;  %1805 = vrot.lane.b32.xlu1 %v1800_v21, %s3705_s25  ;;  %v1835_v21 = vmul.f32 %v4125_v0, %v1834_v48  ;;  %v1852_v11 = vstv %s3509_s26  ;;  %v1892_v48 = vstv %s3513_s28  ;;  %s4423_s26 = sld [smem:[#allocation2 + $0x7]] }
 0x156   :  { %1803 = vrot.lane.b32.xlu0 %v1799_v62, %s3705_s25  ;;  %s4440_s28 = sld [smem:[#allocation4 + $0x4]] }
 0x157   :  { %v4256_v18 = vpop.permute.xlu1 %1219 }
 0x158   :  { %6480 = vst [vmem:[#allocation87_spill] sm:$0xff] %v4256_v18  ;;  %v4258_v42 = vpop.permute.xlu0 %1217  ;;  %v1854_v18 = vmul.f32 %v4118_v47, %v1852_v11 }
 0x159   :  { %6481 = vst [vmem:[#allocation88_spill] sm:$0xff] %v4258_v42  ;;  %1823 = vrot.lane.b32.xlu1 %v1818_v29, %s3705_s25  ;;  %v1872_v42 = vmul.f32 %v4118_v47, %v1870_v63  ;;  %v1853_v29 = vmul.f32 %v4125_v0, %v1852_v11  ;;  %v1893_v11 = vmul.f32 %v4125_v0, %v1892_v48 }
 0x15a   :  { %1821 = vrot.lane.b32.xlu0 %v1817_v41, %s3705_s25  ;;  %v1871_v41 = vmul.f32 %v4125_v0, %v1870_v63 }
 0x15b   :  { %v4264_v62 = vpop.permute.xlu1 %1237 }
 0x15c   :  { %6482 = vst [vmem:[#allocation89_spill] sm:$0xff] %v4264_v62  ;;  %v4266_v2 = vpop.permute.xlu0 %1235 }
 0x15d   :  { %6483 = vst [vmem:[#allocation90_spill] sm:$0xff] %v4266_v2  ;;  %1841 = vrot.lane.b32.xlu1 %v1836_v56, %s3705_s25  ;;  %v3512_v56 = vrot.slane %v1872_v42, 9  ;;  %v1894_v2 = vmul.f32 %v4118_v47, %v1892_v48  ;;  %v3514_v42 = vrot.slane %v1893_v11, 9  ;;  %v1958_v11 = vstv %s4284_s4  ;;  %s5188_s4 = sld [smem:[#allocation2 + $0x3e]] }
 0x15e   :  { %1839 = vrot.lane.b32.xlu0 %v1835_v21, %s3705_s25  ;;  %v3511_v21 = vrot.slane %v1871_v41, 9  ;;  %v1936_v41 = vstv %s4274_s30  ;;  %s3707_s30 = smov 94  }
 0x15f   :  { %v4276_v57 = vpop.permute.xlu1 %1259 }
 0x160   :  { %6484 = vst [vmem:[#allocation91_spill] sm:$0xff] %v4276_v57  ;;  %v4278_v62 = vpop.permute.xlu0 %1257 }
 0x161   :  { %6485 = vst [vmem:[#allocation92_spill] sm:$0xff] %v4278_v62  ;;  %1859 = vrot.lane.b32.xlu1 %v1854_v18, %s3705_s25  ;;  %v3515_v62 = vrot.slane %v1894_v2, 9  ;;  %v1916_v18 = vmul.f32 %v4118_v47, %v1914_v22 }
 0x162   :  { %1857 = vrot.lane.b32.xlu0 %v1853_v29, %s3705_s25  ;;  %v1915_v29 = vmul.f32 %v4125_v0, %v1914_v22 }
 0x163   :  { %v4286_v63 = vpop.permute.xlu1 %1281  ;;  %v3518_v2 = vrot.slane %v1916_v18, 9 }
 0x164   :  { %6486 = vst [vmem:[#allocation93_spill] sm:$0xff] %v4286_v63  ;;  %v4288_v1 = vpop.permute.xlu0 %1279  ;;  %v3517_v22 = vrot.slane %v1915_v29, 9 }
 0x165   :  { %6487 = vst [vmem:[#allocation94_spill] sm:$0xff] %v4288_v1  ;;  %1881 = vrot.lane.b32.xlu1 %v3512_v56, %s3705_s25  ;;  %v1938_v56 = vmul.f32 %v4118_v47, %v1936_v41 }
 0x166   :  { %1879 = vrot.lane.b32.xlu0 %v3511_v21, %s3705_s25  ;;  %v1937_v21 = vmul.f32 %v4125_v0, %v1936_v41  ;;  %v1959_v41 = vmul.f32 %v4125_v0, %v1958_v11 }
 0x167   :  { %v4299_v48 = vpop.permute.xlu1 %1303  ;;  %v3521_v18 = vrot.slane %v1938_v56, 9  ;;  %v168_v56 = vstv %s4305_s8  ;;  %s4521_s8 = sld [smem:[#allocation2 + $0x3d]] }
 0x168   :  { %6488 = vst [vmem:[#allocation95_spill] sm:$0xff] %v4299_v48  ;;  %v4303_v1 = vpop.permute.xlu0 %1301  ;;  %v3520_v29 = vrot.slane %v1937_v21, 9  ;;  %v60_v48 = vstv %s4297_s6  ;;  %s5249_s6 = sld [smem:[#allocation2 + $0x74]] }
 0x169   :  { %6489 = vst [vmem:[#allocation96_spill] sm:$0xff] %v4303_v1  ;;  %1903 = vrot.lane.b32.xlu1 %v3515_v62, %s3705_s25  ;;  %v61_v49 = vmul.f32 %v4125_v0, %v60_v48 }
 0x16a   :  { %1901 = vrot.lane.b32.xlu0 %v3514_v42, %s3705_s25  ;;  %v1960_v42 = vmul.f32 %v4118_v47, %v1958_v11  ;;  %v3523_v11 = vrot.slane %v1959_v41, 9  ;;  %v84_v41 = vstv %s4322_s12  ;;  %s5335_s12 = sld [smem:[#allocation2 + $0x47]] }
 0x16b   :  { %v4316_v1 = vpop.permute.xlu1 %1325 }
 0x16c   :  { %6490 = vst [vmem:[#allocation97_spill] sm:$0xff] %v4316_v1  ;;  %v4320_v62 = vpop.permute.xlu0 %1323  ;;  %v1980_v1 = vstv %s4295_s5  ;;  %s4481_s5 = sld [smem:[#allocation2 + $0x22]] }
 0x16d   :  { %6491 = vst [vmem:[#allocation98_spill] sm:$0xff] %v4320_v62  ;;  %1925 = vrot.lane.b32.xlu1 %v3518_v2, %s3705_s25  ;;  %v98_v2 = vstv %s4301_s7  ;;  %v1982_v21 = vmul.f32 %v4118_v47, %v1980_v1  ;;  %v1981_v57 = vmul.f32 %v4125_v0, %v1980_v1  ;;  %v54_v1 = vstv %s4318_s11  ;;  %s4633_s11 = sld [smem:[#allocation2 + $0x10]] }
 0x16e   :  { %1923 = vrot.lane.b32.xlu0 %v3517_v22, %s3705_s25  ;;  %v3524_v22 = vrot.slane %v1960_v42, 9  ;;  %v4355_v42 = vmul.f32 %v4125_v0, %v168_v56  ;;  %v55_v40 = vmul.f32 %v4125_v0, %v54_v1  ;;  %s5258_s7 = sld [smem:[#allocation2 + $0x11]] }
 0x16f   :  { %v4333_v62 = vpop.permute.xlu1 %1347  ;;  %v3526_v32 = vrot.slane %v1981_v57, 10 }
 0x170   :  { %6492 = vst [vmem:[#allocation99_spill] sm:$0xff] %v4333_v62  ;;  %v4336_v63 = vpop.permute.xlu0 %1345  ;;  %v2002_v62 = vstv %s4312_s9  ;;  %s4564_s9 = sld [smem:[#allocation2 + $0x58]] }
 0x171   :  { %6493 = vst [vmem:[#allocation100_spill] sm:$0xff] %v4336_v63  ;;  %1947 = vrot.lane.b32.xlu1 %v3521_v18, %s3705_s25  ;;  %v99_v18 = vmul.f32 %v4125_v0, %v98_v2  ;;  %v2004_v33 = vmul.f32 %v4118_v47, %v2002_v62  ;;  %v2003_v8 = vmul.f32 %v4125_v0, %v2002_v62  ;;  %v2046_v62 = vstv %s4347_s16  ;;  %s5563_s16 = sld [smem:[#allocation2 + $0x7d]] }
 0x172   :  { %1945 = vrot.lane.b32.xlu0 %v3520_v29, %s3705_s25 }
 0x173   :  { %v4349_v63 = vpop.permute.xlu1 %1369 }
 0x174   :  { %6494 = vst [vmem:[#allocation101_spill] sm:$0xff] %v4349_v63  ;;  %v4359_v29 = vpop.permute.xlu0 %1367  ;;  %v3527_v63 = vrot.slane %v1982_v21, 10  ;;  %v3304_v21 = vrot.slane %v99_v18, 9  ;;  %v100_v18 = vmul.f32 %v4118_v47, %v98_v2 }
 0x175   :  { %6495 = vst [vmem:[#allocation102_spill] sm:$0xff] %v4359_v29  ;;  %1969 = vrot.lane.b32.xlu1 %v3524_v22, %s3705_s25  ;;  %v62_v29 = vmul.f32 %v4118_v47, %v60_v48  ;;  %v63_v22 = vadd.f32 %v61_v49, %v46_v36  ;;  %v3530_v48 = vrot.slane %v2004_v33, 10  ;;  %v2026_v49 = vmul.f32 %v4118_v47, %v2024_v7 }
 0x176   :  { %1967 = vrot.lane.b32.xlu0 %v3523_v11, %s3705_s25  ;;  %v85_v11 = vmul.f32 %v4125_v0, %v84_v41  ;;  %v56_v33 = vmul.f32 %v4118_v47, %v54_v1 }
 0x177   :  { %v4376_v50 = vpop.permute.xlu1 %1391  ;;  %v64_v27 = vadd.f32 %v62_v29, %v46_v36  ;;  %v4405_v17 = vadd.f32 %v3304_v21, %v63_v22  ;;  %v66_v36 = vstv %s4357_s17  ;;  %v112_v29 = vstv %s4363_s18  ;;  %s4730_s17 = sld [smem:[#allocation2 + $0x46]] }
 0x178   :  { %6496 = vst [vmem:[#allocation103_spill] sm:$0xff] %v4376_v50  ;;  %v4382_v57 = vpop.permute.xlu0 %1389  ;;  %v3529_v50 = vrot.slane %v2003_v8, 10  ;;  %v57_v8 = vadd.f32 %v55_v40, %v44_v39  ;;  %v3533_v1 = vrot.slane %v2026_v49, 10  ;;  %v3305_v22 = vrot.slane %v100_v18, 9  ;;  %s4775_s18 = sld [smem:[#allocation2 + $0x61]] }
 0x179   :  { %6497 = vst [vmem:[#allocation104_spill] sm:$0xff] %v4382_v57  ;;  %1991 = vrot.lane.b32.xlu1 %v3527_v63, %s3705_s25  ;;  %v2025_v57 = vmul.f32 %v4125_v0, %v2024_v7  ;;  %v86_v63 = vmul.f32 %v4118_v47, %v84_v41  ;;  %v4408_v7 = vmul.f32 %v4118_v47, %v168_v56  ;;  %v2068_v21 = vstv %s4370_s19  ;;  %s4822_s19 = sld [smem:[#allocation2 + $0x7c]] }
 0x17a   :  { %1989 = vrot.lane.b32.xlu0 %v3526_v32, %s3705_s25  ;;  %v3301_v32 = vrot.slane %v85_v11, 9  ;;  %v2048_v41 = vmul.f32 %v4118_v47, %v2046_v62  ;;  %v2047_v56 = vmul.f32 %v4125_v0, %v2046_v62  ;;  %v4438_v62 = vmul.f32 %v4118_v47, %v112_v29 }
 0x17b   :  { %v4403_v2 = vpop.permute.xlu1 %1413  ;;  %v3532_v40 = vrot.slane %v2025_v57, 10  ;;  %v68_v57 = vmul.f32 %v4118_v47, %v66_v36 }
 0x17c   :  { %6498 = vst [vmem:[#allocation105_spill] sm:$0xff] %v4403_v2  ;;  %v4412_v16 = vpop.permute.xlu0 %1411  ;;  %v3302_v2 = vrot.slane %v86_v63, 9  ;;  %v4433_v18 = vadd.f32 %v3301_v32, %v57_v8  ;;  %v3536_v63 = vrot.slane %v2048_v41, 10  ;;  %v2070_v8 = vmul.f32 %v4118_v47, %v2068_v21 }
 0x17d   :  { %6499 = vst [vmem:[#allocation106_spill] sm:$0xff] %v4412_v16  ;;  %2013 = vrot.lane.b32.xlu1 %v3530_v48, %s3705_s25  ;;  %v58_v16 = vadd.f32 %v56_v33, %v44_v39  ;;  %v4427_v48 = vmul.f32 %v4118_v47, %v154_v55  ;;  %v182_v33 = vstv %s4380_s1  ;;  %v67_v55 = vmul.f32 %v4125_v0, %v66_v36  ;;  %s4901_s1 = sld [smem:[#allocation2 + $0x34]] }
 0x17e   :  { %2011 = vrot.lane.b32.xlu0 %v3529_v50, %s3705_s25  ;;  %v48_v50 = vstv %s4374_s20  ;;  %v4450_v32 = vadd.f32 %v3305_v22, %v64_v27  ;;  %v113_v41 = vmul.f32 %v4125_v0, %v112_v29  ;;  %v3308_v22 = vrot.slane %v4438_v62, 9  ;;  %v4478_v62 = vld [vmem:[%s6245_s0 + $0x8] sm:$0x7]  ;;  %s4858_s20 = sld [smem:[#allocation2 + $0x19]] }
 0x17f   :  { %v4431_v49 = vpop.permute.xlu1 %1435  ;;  %v4455_v36 = vadd.f32 %v3302_v2, %v58_v16  ;;  %v70_v27 = vadd.f32 %v68_v57, %v48_v50  ;;  %v4464_v11 = vmul.f32 %v4118_v47, %v182_v33  ;;  %v69_v16 = vadd.f32 %v67_v55, %v48_v50 }
 0x180   :  { %6500 = vst [vmem:[#allocation107_spill] sm:$0xff] %v4431_v49  ;;  %v4442_v39 = vpop.permute.xlu0 %1433  ;;  %v2069_v49 = vmul.f32 %v4125_v0, %v2068_v21  ;;  %v78_v2 = vstv %s4410_s23  ;;  %v140_v21 = vstv %s4416_s24  ;;  %v3539_v29 = vrot.slane %v2070_v8, 10 }
 0x181   :  { %6501 = vst [vmem:[#allocation108_spill] sm:$0xff] %v4442_v39  ;;  %2035 = vrot.lane.b32.xlu1 %v3533_v1, %s3705_s25  ;;  %v3535_v39 = vrot.slane %v2047_v56, 10  ;;  %v50_v1 = vstv %s4386_s2  ;;  %v196_v55 = vstv %s4429_s27  ;;  %v3307_v60 = vrot.slane %v113_v41, 9  ;;  %s4949_s2 = sld [smem:[#allocation2 + $0x4f]] }
 0x182   :  { %2033 = vrot.lane.b32.xlu0 %v3532_v40, %s3705_s25  ;;  %v126_v40 = vstv %s4401_s22  ;;  %v3538_v57 = vrot.slane %v2069_v49, 10  ;;  %v80_v49 = vmul.f32 %v4118_v47, %v78_v2  ;;  %v142_v54 = vmul.f32 %v4118_v47, %v140_v21  ;;  %s5029_s22 = sld [smem:[#allocation2 + $0x85]] }
 0x183   :  { %v4460_v5 = vpop.permute.xlu1 %1457  ;;  %v128_v50 = vmul.f32 %v4118_v47, %v126_v40  ;;  %v127_v8 = vmul.f32 %v4125_v0, %v126_v40  ;;  %v79_v43 = vmul.f32 %v4125_v0, %v78_v2  ;;  %v141_v35 = vmul.f32 %v4125_v0, %v140_v21  ;;  %v4506_v2 = vld [vmem:[%s6245_s0 + $0x14] sm:$0x7] }
 0x184   :  { %6502 = vst [vmem:[#allocation109_spill] sm:$0xff] %v4460_v5  ;;  %v4467_v56 = vpop.permute.xlu0 %1455  ;;  %v74_v5 = vmul.f32 %v4118_v47, %v72_v6  ;;  %v183_v40 = vmul.f32 %v4125_v0, %v182_v33  ;;  %v197_v26 = vmul.f32 %v4125_v0, %v196_v55  ;;  %v3314_v33 = vrot.slane %v142_v54, 9 }
 0x185   :  { %6503 = vst [vmem:[#allocation110_spill] sm:$0xff] %v4467_v56  ;;  %2057 = vrot.lane.b32.xlu1 %v3536_v63, %s3705_s25  ;;  %v2090_v56 = vstv %s4423_s26  ;;  %v73_v63 = vmul.f32 %v4125_v0, %v72_v6  ;;  %v3311_v21 = vrot.slane %v128_v50, 9  ;;  %v124_v4 = vadd.f32 %v3308_v22, %v70_v27 }
 0x186   :  { %2055 = vrot.lane.b32.xlu0 %v3535_v39, %s3705_s25  ;;  %v52_v39 = vstv %s4440_s28  ;;  %v2092_v6 = vmul.f32 %v2090_v56, %v4478_v62  ;;  %v76_v41 = vadd.f32 %v74_v5, %v50_v1  ;;  %v2091_v34 = vmul.f32 %v4125_v0, %v2090_v56  ;;  %s5101_s28 = sld [smem:[#allocation2 + $0x8]] }
 0x187   :  { %v4487_v61 = vpop.permute.xlu1 %1475  ;;  %v82_v5 = vadd.f32 %v80_v49, %v52_v39  ;;  %v81_v3 = vadd.f32 %v79_v43, %v52_v39  ;;  %v3313_v59 = vrot.slane %v141_v35, 9  ;;  %v3323_v50 = vrot.slane %v4464_v11, 10 }
 0x188   :  { %6504 = vst [vmem:[#allocation111_spill] sm:$0xff] %v4487_v61  ;;  %v4492_v53 = vpop.permute.xlu0 %1473  ;;  %v198_v61 = vmul.f32 %v4118_v47, %v196_v55  ;;  %v123_v55 = vadd.f32 %v3307_v60, %v69_v16  ;;  %v2093_v54 = vmul.f32 %v4118_v47, %v2090_v56  ;;  %v3325_v43 = vrot.slane %v197_v26, 10 }
 0x189   :  { %6505 = vst [vmem:[#allocation112_spill] sm:$0xff] %v4492_v53  ;;  %2079 = vrot.lane.b32.xlu1 %v3539_v29, %s3705_s25  ;;  %v75_v53 = vadd.f32 %v73_v63, %v50_v1  ;;  %v3310_v29 = vrot.slane %v127_v8, 9  ;;  %v2094_v1 = vmul.f32 %v2090_v56, %v4506_v2  ;;  %v2122_v63 = vstv %s4481_s5  ;;  %s5219_s5 = sld [smem:[#allocation2 + $0x59]] }
 0x18a   :  { %2077 = vrot.lane.b32.xlu0 %v3538_v57, %s3705_s25  ;;  %v211_v57 = vmul.f32 %v4125_v0, %v210_v46  ;;  %s3706_s25 = smov 95   ;;  %v3322_v46 = vrot.slane %v183_v40, 10  ;;  %v138_v8 = vadd.f32 %v3311_v21, %v76_v41  ;;  %v3326_v27 = vrot.slane %v198_v61, 10 }
 0x18b   :  { %v4509_v23 = vpop.permute.xlu1 %1494  ;;  %v137_v22 = vadd.f32 %v3310_v29, %v75_v53  ;;  %v152_v39 = vadd.f32 %v3314_v33, %v82_v5  ;;  %v3329_v49 = vrot.slane %v212_v13, 10  ;;  %v252_v60 = vrot.slane %v3862_v9, 4 }
 0x18c   :  { %v4513_v12 = vpop.permute.xlu0 %1492  ;;  %v151_v11 = vadd.f32 %v3313_v59, %v81_v3  ;;  %v2124_v56 = vmul.f32 %v2122_v63, %v4478_v62  ;;  %v6507_v26 = vrot.slane %v4355_v42, 10  ;;  %v253_v53 = vrot.slane %v3870_v14, 4 }
 0x18d   :  { %6506 = vst [vmem:[#allocation113_spill] sm:$0xff] %v4513_v12  ;;  %2101 = vrot.lane.b32.xlu1 %v2092_v6, %s3706_s25  ;;  %v3328_v6 = vrot.slane %v211_v57, 10  ;;  %v234_v13 = vrot.slane %v3872_v15, 4  ;;  %v2123_v16 = vmul.f32 %v4125_v0, %v2122_v63  ;;  %v6508_v40 = vrot.slane %v4397_v28, 10 }
 0x18e   :  { %2099 = vrot.lane.b32.xlu0 %v2091_v34, %s3706_s25  ;;  %v233_v34 = vrot.slane %v3864_v10, 4  ;;  %v179_v61 = vadd.f32 %v6507_v26, %v4405_v17  ;;  %v6509_v3 = vrot.slane %v4408_v7, 10  ;;  %v6510_v42 = vrot.slane %v4427_v48, 10 }
 0x18f   :  { %v4523_v35 = vpop.permute.xlu1 %1512  ;;  %v165_v59 = vadd.f32 %v6508_v40, %v4433_v18  ;;  %v194_v21 = vadd.f32 %v3323_v50, %v124_v4  ;;  %v193_v5 = vadd.f32 %v3322_v46, %v123_v55  ;;  %v208_v33 = vadd.f32 %v3326_v27, %v138_v8 }
 0x190   :  { %v4525_v12 = vpop.permute.xlu0 %1510  ;;  %v180_v41 = vadd.f32 %v6509_v3, %v4450_v32  ;;  %v166_v17 = vadd.f32 %v6510_v42, %v4455_v36  ;;  %v207_v57 = vadd.f32 %v3325_v43, %v137_v22  ;;  %v254_v28 = vsel %vm235_vm0, %v3862_v9, %v252_v60 }
 0x191   :  { %2105 = vrot.lane.b32.xlu1 %v2094_v1, %s3706_s25  ;;  %v222_v1 = vadd.f32 %v3329_v49, %v152_v39  ;;  %v236_v7 = vsel %vm235_vm0, %v3864_v10, %v233_v34  ;;  %v221_v18 = vadd.f32 %v3328_v6, %v151_v11  ;;  %v2126_v4 = vmul.f32 %v2122_v63, %v4506_v2 }
 0x192   :  { %2103 = vrot.lane.b32.xlu0 %v2093_v54, %s3706_s25  ;;  %v255_v48 = vsel %vm235_vm0, %v3870_v14, %v253_v53  ;;  %v237_v32 = vsel %vm235_vm0, %v3872_v15, %v234_v13  ;;  %v2125_v36 = vmul.f32 %v4118_v47, %v2122_v63  ;;  %v2152_v50 = vstv %s4521_s8 }
 0x193   :  { %v4547_v29 = vpop.permute.xlu1 %1530  ;;  %v271_v9 = vrot.slane %v3878_v19, 4  ;;  %v270_v10 = vrot.slane %v3880_v20, 4  ;;  %v289_v55 = vrot.slane %v3886_v24, 4  ;;  %v288_v46 = vrot.slane %v3888_v25, 4 }
 0x194   :  { %v4549_v54 = vpop.permute.xlu0 %1528  ;;  %v307_v14 = vrot.slane %v3894_v30, 4  ;;  %v306_v15 = vrot.slane %v3896_v31, 4  ;;  %v329_v27 = vrot.slane %v3904_v37, 4  ;;  %v328_v63 = vrot.slane %v3906_v38, 4 }
 0x195   :  { %2133 = vrot.lane.b32.xlu1 %v2124_v56, %s3706_s25  ;;  %v258_v22 = vadd.f32 %v254_v28, %v179_v61  ;;  %v351_v39 = vrot.slane %v3912_v44, 4  ;;  %v350_v49 = vrot.slane %v3914_v45, 4  ;;  %v2154_v6 = vmul.f32 %v2152_v50, %v4478_v62  ;;  %v6511_v28 = vld [vmem:[#allocation8_spill] sm:$0xff] }
 0x196   :  { %2131 = vrot.lane.b32.xlu0 %v2123_v16, %s3706_s25  ;;  %v240_v60 = vadd.f32 %v236_v7, %v165_v59  ;;  %v259_v34 = vadd.f32 %v255_v48, %v180_v41  ;;  %v241_v11 = vadd.f32 %v237_v32, %v166_v17  ;;  %v2153_v56 = vmul.f32 %v4125_v0, %v2152_v50 }
 0x197   :  { %v4570_v8 = vpop.permute.xlu1 %1548  ;;  %v273_v26 = vsel %vm235_vm0, %v3878_v19, %v271_v9  ;;  %v272_v61 = vsel %vm235_vm0, %v3880_v20, %v270_v10  ;;  %v291_v53 = vsel %vm235_vm0, %v3886_v24, %v289_v55  ;;  %v290_v13 = vsel %vm235_vm0, %v3888_v25, %v288_v46 }
 0x198   :  { %v4576_v43 = vpop.permute.xlu0 %1546  ;;  %v309_v40 = vsel %vm235_vm0, %v3894_v30, %v307_v14  ;;  %v308_v59 = vsel %vm235_vm0, %v3896_v31, %v306_v15  ;;  %v331_v19 = vsel %vm235_vm0, %v3904_v37, %v329_v27  ;;  %v330_v20 = vsel %vm235_vm0, %v3906_v38, %v328_v63  ;;  %v6513_v27 = vld [vmem:[#allocation10_spill] sm:$0xff] }
 0x199   :  { %2137 = vrot.lane.b32.xlu1 %v2126_v4, %s3706_s25  ;;  %v353_v24 = vsel %vm235_vm0, %v3912_v44, %v351_v39  ;;  %v352_v25 = vsel %vm235_vm0, %v3914_v45, %v350_v49  ;;  %v373_v41 = vrot.slane %v3920_v51, 4  ;;  %v2156_v30 = vmul.f32 %v2152_v50, %v4506_v2  ;;  %v6515_v39 = vld [vmem:[#allocation12_spill] sm:$0xff]  ;;  %v6516_v49 = vld [vmem:[#allocation13_spill] sm:$0xff] }
 0x19a   :  { %2135 = vrot.lane.b32.xlu0 %v2125_v36, %s3706_s25  ;;  %v372_v31 = vrot.slane %v3922_v52, 4  ;;  %v395_v37 = vrot.slane %v3928_v58, 4  ;;  %v2155_v38 = vmul.f32 %v4118_v47, %v2152_v50  ;;  %v2182_v42 = vstv %s4564_s9 }
 0x19b   :  { %v4592_v16 = vpop.permute.xlu1 %1570  ;;  %v277_v44 = vadd.f32 %v273_v26, %v194_v21  ;;  %v276_v17 = vadd.f32 %v272_v61, %v193_v5  ;;  %v295_v45 = vadd.f32 %v291_v53, %v208_v33  ;;  %v394_v7 = vrot.slane %v6511_v28, 4  ;;  %v6519_v61 = vld [vmem:[#allocation16_spill] sm:$0xff] }
 0x19c   :  { %v4602_v3 = vpop.permute.xlu0 %1568  ;;  %v294_v48 = vadd.f32 %v290_v13, %v207_v57  ;;  %v313_v32 = vadd.f32 %v309_v40, %v222_v1  ;;  %v312_v36 = vadd.f32 %v308_v59, %v221_v18  ;;  %v335_v9 = vadd.f32 %v331_v19, %v241_v11  ;;  %v6512_v18 = vld [vmem:[#allocation9_spill] sm:$0xff] }
 0x19d   :  { %2163 = vrot.lane.b32.xlu1 %v2154_v6, %s3706_s25  ;;  %v334_v55 = vadd.f32 %v330_v20, %v240_v60  ;;  %v357_v46 = vadd.f32 %v353_v24, %v259_v34  ;;  %v356_v14 = vadd.f32 %v352_v25, %v258_v22  ;;  %v2184_v50 = vmul.f32 %v2182_v42, %v4478_v62  ;;  %v6517_v60 = vld [vmem:[#allocation14_spill] sm:$0xff]  ;;  %v6518_v34 = vld [vmem:[#allocation15_spill] sm:$0xff]  ;;  %v6520_v13 = vld [vmem:[#allocation17_spill] sm:$0xff] }
 0x19e   :  { %2161 = vrot.lane.b32.xlu0 %v2153_v56, %s3706_s25  ;;  %v375_v21 = vsel %vm235_vm0, %v3920_v51, %v373_v41  ;;  %v374_v5 = vsel %vm235_vm0, %v3922_v52, %v372_v31  ;;  %v397_v33 = vsel %vm235_vm0, %v3928_v58, %v395_v37  ;;  %v2183_v57 = vmul.f32 %v4125_v0, %v2182_v42  ;;  %v6514_v51 = vld [vmem:[#allocation11_spill] sm:$0xff] }
 0x19f   :  { %v4619_v4 = vpop.permute.xlu1 %1592  ;;  %v396_v1 = vsel %vm235_vm0, %v6511_v28, %v394_v7  ;;  %v417_v15 = vrot.slane %v6512_v18, 4  ;;  %v416_v63 = vrot.slane %v6513_v27, 4  ;;  %v439_v22 = vrot.slane %v6514_v51, 4 }
 0x1a0   :  { %v4621_v10 = vpop.permute.xlu0 %1590  ;;  %v438_v58 = vrot.slane %v6515_v39, 4  ;;  %v461_v6 = vrot.slane %v6516_v49, 4  ;;  %v460_v0 = vrot.slane %v6517_v60, 4  ;;  %v483_v11 = vrot.slane %v6518_v34, 4 }
 0x1a1   :  { %2167 = vrot.lane.b32.xlu1 %v2156_v30, %s3706_s25  ;;  %v379_v26 = vadd.f32 %v375_v21, %v277_v44  ;;  %v482_v53 = vrot.slane %v6519_v61, 4  ;;  %v505_v40 = vrot.slane %v6520_v13, 4  ;;  %v2186_v59 = vmul.f32 %v2182_v42, %v4506_v2 }
 0x1a2   :  { %2165 = vrot.lane.b32.xlu0 %v2155_v38, %s3706_s25  ;;  %v378_v19 = vadd.f32 %v374_v5, %v276_v17  ;;  %v401_v20 = vadd.f32 %v397_v33, %v295_v45  ;;  %v2185_v24 = vmul.f32 %v4118_v47, %v2182_v42  ;;  %v2212_v25 = vstv %s4616_s10  ;;  %v6522_v5 = vld [vmem:[#allocation19_spill] sm:$0xff] }
 0x1a3   :  { %v4640_v52 = vpop.permute.xlu1 %1614  ;;  %v400_v41 = vadd.f32 %v396_v1, %v294_v48  ;;  %v419_v30 = vsel %vm235_vm0, %v6512_v18, %v417_v15  ;;  %v418_v31 = vsel %vm235_vm0, %v6513_v27, %v416_v63  ;;  %v441_v37 = vsel %vm235_vm0, %v6514_v51, %v439_v22  ;;  %v6521_v48 = vld [vmem:[#allocation18_spill] sm:$0xff]  ;;  %v4686_v18 = vld [vmem:[%s6245_s0] sm:$0x77] }
 0x1a4   :  { %v4646_v56 = vpop.permute.xlu0 %1612  ;;  %v440_v44 = vsel %vm235_vm0, %v6515_v39, %v438_v58  ;;  %v463_v47 = vsel %vm235_vm0, %v6516_v49, %v461_v6  ;;  %v462_v42 = vsel %vm235_vm0, %v6517_v60, %v460_v0  ;;  %v485_v17 = vsel %vm235_vm0, %v6518_v34, %v483_v11 }
 0x1a5   :  { %2193 = vrot.lane.b32.xlu1 %v2184_v50, %s3706_s25  ;;  %v484_v28 = vsel %vm235_vm0, %v6519_v61, %v482_v53  ;;  %v507_v7 = vsel %vm235_vm0, %v6520_v13, %v505_v40  ;;  %v504_v50 = vrot.slane %v6521_v48, 4  ;;  %v2214_v21 = vmul.f32 %v2212_v25, %v4478_v62  ;;  %v6527_v40 = vld [vmem:[#allocation22_spill] sm:$0xff] }
 0x1a6   :  { %2191 = vrot.lane.b32.xlu0 %v2183_v57, %s3706_s25  ;;  %v527_v33 = vrot.slane %v6522_v5, 4  ;;  %v6523_v57 = vld [vmem:[#allocation20_spill] sm:$0xff]  ;;  %v2213_v15 = vmul.f32 %v4686_v18, %v2212_v25  ;;  %v2242_v27 = vstv %s4633_s11  ;;  %v423_v63 = vadd.f32 %v419_v30, %v313_v32  ;;  %s5297_s11 = sld [smem:[#allocation2 + $0x2c]] }
 0x1a7   :  { %v4661_v38 = vpop.permute.xlu1 %1636  ;;  %v526_v1 = vrot.slane %v6523_v57, 4  ;;  %v422_v51 = vadd.f32 %v418_v31, %v312_v36  ;;  %v445_v22 = vadd.f32 %v441_v37, %v335_v9  ;;  %v444_v39 = vadd.f32 %v440_v44, %v334_v55  ;;  %v4709_v55 = vld [vmem:[%s6245_s0 + $0xc] sm:$0x77] }
 0x1a8   :  { %v4671_v45 = vpop.permute.xlu0 %1634  ;;  %v467_v49 = vadd.f32 %v463_v47, %v357_v46  ;;  %v466_v6 = vadd.f32 %v462_v42, %v356_v14  ;;  %v489_v60 = vadd.f32 %v485_v17, %v379_v26  ;;  %v488_v0 = vadd.f32 %v484_v28, %v378_v19  ;;  %v6526_v26 = vld [vmem:[#allocation21_spill] sm:$0xff]  ;;  %v6528_v19 = vld [vmem:[#allocation23_spill] sm:$0xff]  ;;  %v6532_v47 = vld [vmem:[#allocation26_spill] sm:$0xff] }
 0x1a9   :  { %2197 = vrot.lane.b32.xlu1 %v2186_v59, %s3706_s25  ;;  %v511_v11 = vadd.f32 %v507_v7, %v401_v20  ;;  %v506_v61 = vsel %vm235_vm0, %v6521_v48, %v504_v50  ;;  %v2216_v53 = vmul.f32 %v2212_v25, %v4506_v2  ;;  %v2244_v32 = vmul.f32 %v2242_v27, %v4478_v62  ;;  %v6531_v37 = vld [vmem:[#allocation25_spill] sm:$0xff]  ;;  %v6533_v17 = vld [vmem:[#allocation27_spill] sm:$0xff] }
 0x1aa   :  { %2195 = vrot.lane.b32.xlu0 %v2185_v24, %s3706_s25  ;;  %v529_v36 = vsel %vm235_vm0, %v6522_v5, %v527_v33  ;;  %v528_v9 = vsel %vm235_vm0, %v6523_v57, %v526_v1  ;;  %v2215_v46 = vmul.f32 %v4709_v55, %v2212_v25  ;;  %v2243_v14 = vmul.f32 %v4686_v18, %v2242_v27  ;;  %v6529_v24 = vld [vmem:[#allocation24_spill] sm:$0xff] }
 0x1ab   :  { %v4692_v58 = vpop.permute.xlu1 %1658  ;;  %v545_v13 = vrot.slane %v6526_v26, 4  ;;  %v544_v59 = vrot.slane %v6527_v40, 4  ;;  %v564_v20 = vrot.slane %v6528_v19, 4  ;;  %v563_v30 = vrot.slane %v6529_v24, 4  ;;  %v6534_v25 = vld [vmem:[#allocation28_spill] sm:$0xff] }
 0x1ac   :  { %6524 = vst [vmem:[#allocation8_spill] sm:$0xff] %v4692_v58  ;;  %v4694_v34 = vpop.permute.xlu0 %1656  ;;  %v582_v44 = vrot.slane %v6531_v37, 4  ;;  %v581_v42 = vrot.slane %v6532_v47, 4  ;;  %v600_v28 = vrot.slane %v6533_v17, 4  ;;  %v599_v7 = vrot.slane %v6534_v25, 4 }
 0x1ad   :  { %6525 = vst [vmem:[#allocation9_spill] sm:$0xff] %v4694_v34  ;;  %2223 = vrot.lane.b32.xlu1 %v2214_v21, %s3706_s25  ;;  %v510_v50 = vadd.f32 %v506_v61, %v400_v41  ;;  %v533_v21 = vadd.f32 %v529_v36, %v423_v63  ;;  %v3547_v5 = vrot.slane %v2244_v32, 9  ;;  %v2246_v33 = vmul.f32 %v2242_v27, %v4506_v2 }
 0x1ae   :  { %2221 = vrot.lane.b32.xlu0 %v2213_v15, %s3706_s25  ;;  %v532_v57 = vadd.f32 %v528_v9, %v422_v51  ;;  %v3546_v1 = vrot.slane %v2243_v14, 9  ;;  %v2245_v15 = vmul.f32 %v4709_v55, %v2242_v27  ;;  %v548_v34 = vsel %vm546_vm1, %v6526_v26, %v545_v13  ;;  %v6539_v26 = vld [vmem:[#allocation30_spill] sm:$0xff] }
 0x1af   :  { %v4717_v31 = vpop.permute.xlu1 %1680  ;;  %v547_v41 = vsel %vm546_vm1, %v6527_v40, %v544_v59  ;;  %v566_v63 = vsel %vm546_vm1, %v6528_v19, %v564_v20  ;;  %v565_v51 = vsel %vm546_vm1, %v6529_v24, %v563_v30  ;;  %v584_v27 = vsel %vm546_vm1, %v6531_v37, %v582_v44  ;;  %v6540_v20 = vld [vmem:[#allocation31_spill] sm:$0xff] }
 0x1b0   :  { %6530 = vst [vmem:[#allocation10_spill] sm:$0xff] %v4717_v31  ;;  %v4723_v48 = vpop.permute.xlu0 %1678  ;;  %v2280_v31 = vstv %s4690_s14  ;;  %v602_v32 = vsel %vm546_vm1, %v6533_v17, %v600_v28  ;;  %v601_v36 = vsel %vm546_vm1, %v6534_v25, %v599_v7  ;;  %v617_v13 = vrot.slane %v6539_v26, 4  ;;  %v6541_v17 = vld [vmem:[#allocation32_spill] sm:$0xff]  ;;  %s5449_s14 = sld [smem:[#allocation2 + $0x1a]] }
 0x1b1   :  { %6535 = vst [vmem:[#allocation11_spill] sm:$0xff] %v4723_v48  ;;  %2227 = vrot.lane.b32.xlu1 %v2216_v53, %s3706_s25  ;;  %v583_v53 = vsel %vm546_vm1, %v6532_v47, %v581_v42  ;;  %v3549_v40 = vrot.slane %v2246_v33, 9  ;;  %v2282_v59 = vmul.f32 %v2280_v31, %v4478_v62  ;;  %v552_v19 = vadd.f32 %v548_v34, %v445_v22 }
 0x1b2   :  { %2225 = vrot.lane.b32.xlu0 %v2215_v46, %s3706_s25  ;;  %v6538_v46 = vld [vmem:[#allocation29_spill] sm:$0xff]  ;;  %v640_v24 = vrot.slane %v6540_v20, 4  ;;  %v3548_v30 = vrot.slane %v2245_v15, 9  ;;  %v2281_v37 = vmul.f32 %v4686_v18, %v2280_v31  ;;  %v551_v44 = vadd.f32 %v547_v41, %v444_v39 }
 0x1b3   :  { %v4740_v61 = vpop.permute.xlu1 %1702  ;;  %v618_v14 = vrot.slane %v6538_v46, 4  ;;  %v570_v47 = vadd.f32 %v566_v63, %v467_v49  ;;  %v569_v42 = vadd.f32 %v565_v51, %v466_v6  ;;  %v639_v28 = vrot.slane %v6541_v17, 4  ;;  %v6544_v15 = vld [vmem:[#allocation33_spill] sm:$0xff]  ;;  %v6545_v63 = vld [vmem:[#allocation34_spill] sm:$0xff] }
 0x1b4   :  { %6536 = vst [vmem:[#allocation12_spill] sm:$0xff] %v4740_v61  ;;  %v4750_v9 = vpop.permute.xlu0 %1700  ;;  %v588_v7 = vadd.f32 %v584_v27, %v489_v60  ;;  %v606_v33 = vadd.f32 %v602_v32, %v511_v11  ;;  %v3552_v39 = vrot.slane %v2282_v59, 9  ;;  %v2284_v49 = vmul.f32 %v2280_v31, %v4506_v2  ;;  %v6546_v27 = vld [vmem:[#allocation35_spill] sm:$0xff] }
 0x1b5   :  { %6537 = vst [vmem:[#allocation13_spill] sm:$0xff] %v4750_v9  ;;  %2261 = vrot.lane.b32.xlu1 %v3547_v5, %s3706_s25  ;;  %v587_v5 = vadd.f32 %v583_v53, %v488_v0  ;;  %v605_v9 = vadd.f32 %v601_v36, %v510_v50  ;;  %v620_v34 = vsel %vm546_vm1, %v6538_v46, %v618_v14  ;;  %v3551_v60 = vrot.slane %v2281_v37, 9  ;;  %v6548_v36 = vld [vmem:[#allocation36_spill] sm:$0xff]  ;;  %v6549_v14 = vld [vmem:[#allocation37_spill] sm:$0xff] }
 0x1b6   :  { %2259 = vrot.lane.b32.xlu0 %v3546_v1, %s3706_s25  ;;  %v619_v1 = vsel %vm546_vm1, %v6539_v26, %v617_v13  ;;  %v642_v6 = vsel %vm546_vm1, %v6540_v20, %v640_v24  ;;  %v2283_v0 = vmul.f32 %v4709_v55, %v2280_v31  ;;  %v2318_v11 = vstv %s4730_s17  ;;  %v6550_v13 = vld [vmem:[#allocation38_spill] sm:$0xff]  ;;  %s5623_s17 = sld [smem:[#allocation2 + $0x50]] }
 0x1b7   :  { %v4760_v25 = vpop.permute.xlu1 %1724  ;;  %v641_v50 = vsel %vm546_vm1, %v6541_v17, %v639_v28  ;;  %v662_v41 = vrot.slane %v6544_v15, 4  ;;  %v661_v51 = vrot.slane %v6545_v63, 4  ;;  %v684_v53 = vrot.slane %v6546_v27, 4 }
 0x1b8   :  { %6542 = vst [vmem:[#allocation14_spill] sm:$0xff] %v4760_v25  ;;  %v4762_v22 = vpop.permute.xlu0 %1722  ;;  %v683_v46 = vrot.slane %v6548_v36, 4  ;;  %v706_v26 = vrot.slane %v6549_v14, 4  ;;  %v705_v31 = vrot.slane %v6550_v13, 4  ;;  %v624_v24 = vadd.f32 %v620_v34, %v533_v21 }
 0x1b9   :  { %6543 = vst [vmem:[#allocation15_spill] sm:$0xff] %v4762_v22  ;;  %2265 = vrot.lane.b32.xlu1 %v3549_v40, %s3706_s25  ;;  %v6551_v40 = vld [vmem:[#allocation39_spill] sm:$0xff]  ;;  %v3554_v17 = vrot.slane %v2284_v49, 9  ;;  %v2320_v28 = vmul.f32 %v2318_v11, %v4478_v62  ;;  %v623_v22 = vadd.f32 %v619_v1, %v532_v57  ;;  %v3553_v25 = vrot.slane %v2283_v0, 9 }
 0x1ba   :  { %2263 = vrot.lane.b32.xlu0 %v3548_v30, %s3706_s25  ;;  %v728_v59 = vrot.slane %v6551_v40, 4  ;;  %v6552_v30 = vld [vmem:[#allocation40_spill] sm:$0xff]  ;;  %v2319_v61 = vmul.f32 %v4686_v18, %v2318_v11  ;;  %v645_v48 = vadd.f32 %v641_v50, %v551_v44  ;;  %v664_v58 = vsel %vm546_vm1, %v6544_v15, %v662_v41  ;;  %v6556_v41 = vld [vmem:[#allocation42_spill] sm:$0xff] }
 0x1bb   :  { %v4782_v32 = vpop.permute.xlu1 %1746  ;;  %v727_v37 = vrot.slane %v6552_v30, 4  ;;  %v663_v21 = vsel %vm546_vm1, %v6545_v63, %v661_v51  ;;  %v686_v34 = vsel %vm546_vm1, %v6546_v27, %v684_v53  ;;  %v685_v57 = vsel %vm546_vm1, %v6548_v36, %v683_v46 }
 0x1bc   :  { %6547 = vst [vmem:[#allocation16_spill] sm:$0xff] %v4782_v32  ;;  %v4788_v20 = vpop.permute.xlu0 %1744  ;;  %v646_v32 = vadd.f32 %v642_v6, %v552_v19  ;;  %v708_v19 = vsel %vm546_vm1, %v6549_v14, %v706_v26  ;;  %v707_v44 = vsel %vm546_vm1, %v6550_v13, %v705_v31  ;;  %v730_v1 = vsel %vm546_vm1, %v6551_v40, %v728_v59 }
 0x1bd   :  { %2299 = vrot.lane.b32.xlu1 %v3552_v39, %s3706_s25  ;;  %v729_v6 = vsel %vm546_vm1, %v6552_v30, %v727_v37  ;;  %v3557_v50 = vrot.slane %v2320_v28, 9  ;;  %v2322_v15 = vmul.f32 %v2318_v11, %v4506_v2  ;;  %v749_v63 = vrot.slane %v6556_v41, 4 }
 0x1be   :  { %2297 = vrot.lane.b32.xlu0 %v3551_v60, %s3706_s25  ;;  %v6555_v60 = vld [vmem:[#allocation41_spill] sm:$0xff]  ;;  %v3556_v51 = vrot.slane %v2319_v61, 9  ;;  %v2321_v27 = vmul.f32 %v4709_v55, %v2318_v11  ;;  %v2356_v53 = vstv %s4775_s18  ;;  %v668_v36 = vadd.f32 %v664_v58, %v570_v47  ;;  %s5720_s18 = sld [smem:[#allocation2 + $0x6b]] }
 0x1bf   :  { %v4801_v39 = vpop.permute.xlu1 %1768  ;;  %v750_v0 = vrot.slane %v6555_v60, 4  ;;  %v667_v46 = vadd.f32 %v663_v21, %v569_v42  ;;  %v690_v14 = vadd.f32 %v686_v34, %v588_v7  ;;  %v689_v26 = vadd.f32 %v685_v57, %v587_v5  ;;  %v6560_v42 = vld [vmem:[#allocation44_spill] sm:$0xff]  ;;  %v6563_v21 = vld [vmem:[#allocation47_spill] sm:$0xff] }
 0x1c0   :  { %6553 = vst [vmem:[#allocation17_spill] sm:$0xff] %v4801_v39  ;;  %v4811_v49 = vpop.permute.xlu0 %1766  ;;  %v712_v31 = vadd.f32 %v708_v19, %v606_v33  ;;  %v711_v40 = vadd.f32 %v707_v44, %v605_v9  ;;  %v734_v59 = vadd.f32 %v730_v1, %v624_v24  ;;  %v733_v30 = vadd.f32 %v729_v6, %v623_v22  ;;  %v6561_v33 = vld [vmem:[#allocation45_spill] sm:$0xff]  ;;  %v6562_v24 = vld [vmem:[#allocation46_spill] sm:$0xff]  ;;  %v6564_v57 = vld [vmem:[#allocation48_spill] sm:$0xff] }
 0x1c1   :  { %6554 = vst [vmem:[#allocation18_spill] sm:$0xff] %v4811_v49  ;;  %2303 = vrot.lane.b32.xlu1 %v3554_v17, %s3706_s25  ;;  %v752_v61 = vsel %vm546_vm1, %v6555_v60, %v750_v0  ;;  %v3559_v17 = vrot.slane %v2322_v15, 9  ;;  %v2358_v58 = vmul.f32 %v2356_v53, %v4478_v62  ;;  %v751_v47 = vsel %vm546_vm1, %v6556_v41, %v749_v63  ;;  %v6566_v6 = vld [vmem:[#allocation49_spill] sm:$0xff]  ;;  %v6567_v0 = vld [vmem:[#allocation50_spill] sm:$0xff]  ;;  %v6568_v15 = vld [vmem:[#allocation51_spill] sm:$0xff] }
 0x1c2   :  { %2301 = vrot.lane.b32.xlu0 %v3553_v25, %s3706_s25  ;;  %v6559_v25 = vld [vmem:[#allocation43_spill] sm:$0xff]  ;;  %v771_v7 = vrot.slane %v6560_v42, 4  ;;  %v3558_v9 = vrot.slane %v2321_v27, 9  ;;  %v2357_v5 = vmul.f32 %v4686_v18, %v2356_v53  ;;  %v794_v22 = vrot.slane %v6561_v33, 4 }
 0x1c3   :  { %v4824_v13 = vpop.permute.xlu1 %1786  ;;  %v772_v11 = vrot.slane %v6559_v25, 4  ;;  %v793_v28 = vrot.slane %v6562_v24, 4  ;;  %v816_v34 = vrot.slane %v6563_v21, 4  ;;  %v815_v19 = vrot.slane %v6564_v57, 4 }
 0x1c4   :  { %6557 = vst [vmem:[#allocation19_spill] sm:$0xff] %v4824_v13  ;;  %v4826_v37 = vpop.permute.xlu0 %1784  ;;  %v756_v1 = vadd.f32 %v752_v61, %v646_v32  ;;  %v838_v60 = vrot.slane %v6566_v6, 4  ;;  %v856_v41 = vrot.slane %v6568_v15, 4  ;;  %v2360_v13 = vmul.f32 %v2356_v53, %v4506_v2 }
 0x1c5   :  { %6558 = vst [vmem:[#allocation20_spill] sm:$0xff] %v4826_v37  ;;  %2337 = vrot.lane.b32.xlu1 %v3557_v50, %s3706_s25  ;;  %v837_v50 = vrot.slane %v6567_v0, 4  ;;  %v774_v27 = vsel %vm546_vm1, %v6559_v25, %v772_v11  ;;  %v3562_v37 = vrot.slane %v2358_v58, 9  ;;  %v773_v32 = vsel %vm546_vm1, %v6560_v42, %v771_v7  ;;  %v6571_v7 = vld [vmem:[#allocation52_spill] sm:$0xff] }
 0x1c6   :  { %2335 = vrot.lane.b32.xlu0 %v3556_v51, %s3706_s25  ;;  %v755_v51 = vadd.f32 %v751_v47, %v645_v48  ;;  %v3561_v61 = vrot.slane %v2357_v5, 9  ;;  %v2394_v49 = vstv %s4822_s19  ;;  %v796_v48 = vsel %vm546_vm1, %v6561_v33, %v794_v22  ;;  %v6573_v33 = vld [vmem:[#allocation53_spill] sm:$0xff] }
 0x1c7   :  { %v4842_v44 = vpop.permute.xlu1 %1805  ;;  %v795_v25 = vsel %vm546_vm1, %v6562_v24, %v793_v28  ;;  %v818_v11 = vsel %vm546_vm1, %v6563_v21, %v816_v34  ;;  %v839_v47 = vsel %vm546_vm1, %v6567_v0, %v837_v50  ;;  %v859_v42 = vsel %vm857_vm2, %v6568_v15, %v856_v41  ;;  %v6574_v24 = vld [vmem:[#allocation54_spill] sm:$0xff] }
 0x1c8   :  { %6565 = vst [vmem:[#allocation21_spill] sm:$0xff] %v4842_v44  ;;  %v4847_v63 = vpop.permute.xlu0 %1803  ;;  %v2359_v44 = vmul.f32 %v4709_v55, %v2356_v53  ;;  %v840_v53 = vsel %vm546_vm1, %v6566_v6, %v838_v60  ;;  %v875_v22 = vrot.slane %v6573_v33, 4  ;;  %v874_v28 = vrot.slane %v6574_v24, 4 }
 0x1c9   :  { %6569 = vst [vmem:[#allocation22_spill] sm:$0xff] %v4847_v63  ;;  %2341 = vrot.lane.b32.xlu1 %v3559_v17, %s3706_s25  ;;  %v817_v17 = vsel %vm546_vm1, %v6564_v57, %v815_v19  ;;  %v3564_v21 = vrot.slane %v2360_v13, 9  ;;  %v2396_v34 = vmul.f32 %v2394_v49, %v4478_v62  ;;  %v778_v57 = vadd.f32 %v774_v27, %v668_v36  ;;  %v6578_v27 = vld [vmem:[#allocation56_spill] sm:$0xff] }
 0x1ca   :  { %2339 = vrot.lane.b32.xlu0 %v3558_v9, %s3706_s25  ;;  %v855_v9 = vrot.slane %v6571_v7, 4  ;;  %v777_v19 = vadd.f32 %v773_v32, %v667_v46  ;;  %v3563_v6 = vrot.slane %v2359_v44, 9  ;;  %v2395_v60 = vmul.f32 %v4686_v18, %v2394_v49 }
 0x1cb   :  { %v4868_v58 = vpop.permute.xlu1 %1823  ;;  %v800_v0 = vadd.f32 %v796_v48, %v690_v14  ;;  %v799_v50 = vadd.f32 %v795_v25, %v689_v26  ;;  %v822_v15 = vadd.f32 %v818_v11, %v712_v31  ;;  %v821_v41 = vadd.f32 %v817_v17, %v711_v40  ;;  %v6577_v40 = vld [vmem:[#allocation55_spill] sm:$0xff]  ;;  %v6580_v25 = vld [vmem:[#allocation58_spill] sm:$0xff] }
 0x1cc   :  { %6570 = vst [vmem:[#allocation23_spill] sm:$0xff] %v4868_v58  ;;  %v4877_v5 = vpop.permute.xlu0 %1821  ;;  %v844_v58 = vadd.f32 %v840_v53, %v734_v59  ;;  %v843_v63 = vadd.f32 %v839_v47, %v733_v30  ;;  %v858_v13 = vsel %vm857_vm2, %v6571_v7, %v855_v9  ;;  %v877_v46 = vsel %vm857_vm2, %v6573_v33, %v875_v22  ;;  %v6581_v17 = vld [vmem:[#allocation59_spill] sm:$0xff]  ;;  %v6583_v7 = vld [vmem:[#allocation60_spill] sm:$0xff]  ;;  %v6584_v33 = vld [vmem:[#allocation61_spill] sm:$0xff] }
 0x1cd   :  { %6572 = vst [vmem:[#allocation24_spill] sm:$0xff] %v4877_v5  ;;  %2375 = vrot.lane.b32.xlu1 %v3562_v37, %s3706_s25  ;;  %v863_v37 = vadd.f32 %v859_v42, %v756_v1  ;;  %v876_v14 = vsel %vm857_vm2, %v6574_v24, %v874_v28  ;;  %v3567_v26 = vrot.slane %v2396_v34, 9  ;;  %v2398_v31 = vmul.f32 %v2394_v49, %v4506_v2  ;;  %v6585_v24 = vld [vmem:[#allocation62_spill] sm:$0xff]  ;;  %v6587_v34 = vld [vmem:[#allocation63_spill] sm:$0xff] }
 0x1ce   :  { %2373 = vrot.lane.b32.xlu0 %v3561_v61, %s3706_s25  ;;  %v893_v59 = vrot.slane %v6577_v40, 4  ;;  %v3566_v30 = vrot.slane %v2395_v60, 9  ;;  %v2397_v44 = vmul.f32 %v4709_v55, %v2394_v49  ;;  %v2432_v1 = vstv %s4858_s20  ;;  %v6579_v61 = vld [vmem:[#allocation57_spill] sm:$0xff] }
 0x1cf   :  { %v4885_v5 = vpop.permute.xlu1 %1841  ;;  %v892_v32 = vrot.slane %v6578_v27, 4  ;;  %v911_v48 = vrot.slane %v6579_v61, 4  ;;  %v910_v11 = vrot.slane %v6580_v25, 4  ;;  %v929_v53 = vrot.slane %v6581_v17, 4 }
 0x1d0   :  { %6575 = vst [vmem:[#allocation25_spill] sm:$0xff] %v4885_v5  ;;  %v4889_v36 = vpop.permute.xlu0 %1839  ;;  %v862_v42 = vadd.f32 %v858_v13, %v755_v51  ;;  %v928_v9 = vrot.slane %v6583_v7, 4  ;;  %v951_v22 = vrot.slane %v6584_v33, 4  ;;  %v950_v49 = vrot.slane %v6585_v24, 4 }
 0x1d1   :  { %6576 = vst [vmem:[#allocation26_spill] sm:$0xff] %v4889_v36  ;;  %2379 = vrot.lane.b32.xlu1 %v3564_v21, %s3706_s25  ;;  %v881_v21 = vadd.f32 %v877_v46, %v778_v57  ;;  %v3569_v60 = vrot.slane %v2398_v31, 9  ;;  %v2434_v36 = vmul.f32 %v2432_v1, %v4478_v62  ;;  %v880_v5 = vadd.f32 %v876_v14, %v777_v19 }
 0x1d2   :  { %2377 = vrot.lane.b32.xlu0 %v3563_v6, %s3706_s25  ;;  %v973_v6 = vrot.slane %v6587_v34, 4  ;;  %v895_v51 = vsel %vm857_vm2, %v6577_v40, %v893_v59  ;;  %v3568_v13 = vrot.slane %v2397_v44, 9  ;;  %v913_v57 = vsel %vm857_vm2, %v6579_v61, %v911_v48  ;;  %v6589_v59 = vld [vmem:[#allocation64_spill] sm:$0xff] }
 0x1d3   :  { %v4907_v47 = vpop.permute.xlu1 %1859  ;;  %v912_v46 = vsel %vm857_vm2, %v6580_v25, %v910_v11  ;;  %v931_v19 = vsel %vm857_vm2, %v6581_v17, %v929_v53  ;;  %v953_v31 = vsel %vm857_vm2, %v6584_v33, %v951_v22  ;;  %v952_v40 = vsel %vm857_vm2, %v6585_v24, %v950_v49  ;;  %v6592_v11 = vld [vmem:[#allocation66_spill] sm:$0xff] }
 0x1d4   :  { %6582 = vst [vmem:[#allocation27_spill] sm:$0xff] %v4907_v47  ;;  %v4912_v28 = vpop.permute.xlu0 %1857  ;;  %v2433_v47 = vmul.f32 %v4686_v18, %v2432_v1  ;;  %v3572_v48 = vrot.slane %v2434_v36, 10  ;;  %v2436_v25 = vmul.f32 %v2432_v1, %v4506_v2  ;;  %v994_v17 = vrot.slane %v6592_v11, 4 }
 0x1d5   :  { %6586 = vst [vmem:[#allocation28_spill] sm:$0xff] %v4912_v28  ;;  %2413 = vrot.lane.b32.xlu1 %v3567_v26, %s3706_s25  ;;  %v894_v28 = vsel %vm857_vm2, %v6578_v27, %v892_v32  ;;  %v930_v26 = vsel %vm857_vm2, %v6583_v7, %v928_v9  ;;  %v975_v27 = vsel %vm857_vm2, %v6587_v34, %v973_v6  ;;  %v6591_v32 = vld [vmem:[#allocation65_spill] sm:$0xff]  ;;  %v2470_v9 = vstv %s4901_s1 }
 0x1d6   :  { %2411 = vrot.lane.b32.xlu0 %v3566_v30, %s3706_s25  ;;  %v972_v30 = vrot.slane %v6589_v59, 4  ;;  %v995_v61 = vrot.slane %v6591_v32, 4  ;;  %v3571_v53 = vrot.slane %v2433_v47, 10  ;;  %v2435_v7 = vmul.f32 %v4709_v55, %v2432_v1 }
 0x1d7   :  { %v4929_v14 = vpop.permute.xlu1 %1881  ;;  %v899_v33 = vadd.f32 %v895_v51, %v800_v0  ;;  %v898_v22 = vadd.f32 %v894_v28, %v799_v50  ;;  %v917_v24 = vadd.f32 %v913_v57, %v822_v15  ;;  %v916_v49 = vadd.f32 %v912_v46, %v821_v41  ;;  %v6594_v41 = vld [vmem:[#allocation67_spill] sm:$0xff] }
 0x1d8   :  { %6588 = vst [vmem:[#allocation29_spill] sm:$0xff] %v4929_v14  ;;  %v4938_v44 = vpop.permute.xlu0 %1879  ;;  %v935_v6 = vadd.f32 %v931_v19, %v844_v58  ;;  %v934_v36 = vadd.f32 %v930_v26, %v843_v63  ;;  %v979_v39 = vadd.f32 %v975_v27, %v881_v21  ;;  %v974_v47 = vsel %vm857_vm2, %v6589_v59, %v972_v30  ;;  %v6596_v21 = vld [vmem:[#allocation69_spill] sm:$0xff]  ;;  %v6599_v19 = vld [vmem:[#allocation71_spill] sm:$0xff]  ;;  %v6602_v27 = vld [vmem:[#allocation74_spill] sm:$0xff] }
 0x1d9   :  { %6590 = vst [vmem:[#allocation30_spill] sm:$0xff] %v4938_v44  ;;  %2417 = vrot.lane.b32.xlu1 %v3569_v60, %s3706_s25  ;;  %v957_v60 = vadd.f32 %v953_v31, %v863_v37  ;;  %v956_v44 = vadd.f32 %v952_v40, %v862_v42  ;;  %v3574_v1 = vrot.slane %v2436_v25, 10  ;;  %v2472_v0 = vmul.f32 %v2470_v9, %v4478_v62  ;;  %v6595_v42 = vld [vmem:[#allocation68_spill] sm:$0xff]  ;;  %v6601_v59 = vld [vmem:[#allocation73_spill] sm:$0xff] }
 0x1da   :  { %2415 = vrot.lane.b32.xlu0 %v3568_v13, %s3706_s25  ;;  %v997_v50 = vsel %vm857_vm2, %v6591_v32, %v995_v61  ;;  %v996_v58 = vsel %vm857_vm2, %v6592_v11, %v994_v17  ;;  %v3573_v63 = vrot.slane %v2435_v7, 10  ;;  %v2471_v15 = vmul.f32 %v4686_v18, %v2470_v9  ;;  %v6597_v13 = vld [vmem:[#allocation70_spill] sm:$0xff]  ;;  %v6600_v31 = vld [vmem:[#allocation72_spill] sm:$0xff] }
 0x1db   :  { %v4951_v34 = vpop.permute.xlu1 %1903  ;;  %v1017_v37 = vrot.slane %v6594_v41, 4  ;;  %v1016_v28 = vrot.slane %v6595_v42, 4  ;;  %v1039_v51 = vrot.slane %v6596_v21, 4  ;;  %v1038_v57 = vrot.slane %v6597_v13, 4 }
 0x1dc   :  { %v4953_v14 = vpop.permute.xlu0 %1901  ;;  %v1061_v26 = vrot.slane %v6599_v19, 4  ;;  %v1060_v40 = vrot.slane %v6600_v31, 4  ;;  %v1083_v30 = vrot.slane %v6601_v59, 4  ;;  %v1082_v32 = vrot.slane %v6602_v27, 4 }
 0x1dd   :  { %6593 = vst [vmem:[#allocation31_spill] sm:$0xff] %v4953_v14  ;;  %2451 = vrot.lane.b32.xlu1 %v3572_v48, %s3706_s25  ;;  %v978_v48 = vadd.f32 %v974_v47, %v880_v5  ;;  %v1001_v25 = vadd.f32 %v997_v50, %v899_v33  ;;  %v3577_v11 = vrot.slane %v2472_v0, 10  ;;  %v2474_v17 = vmul.f32 %v2470_v9, %v4506_v2 }
 0x1de   :  { %2449 = vrot.lane.b32.xlu0 %v3571_v53, %s3706_s25  ;;  %v4979_v53 = vadd.f32 %v996_v58, %v898_v22  ;;  %v3576_v7 = vrot.slane %v2471_v15, 10  ;;  %v2508_v14 = vstv %s4949_s2  ;;  %v1018_v5 = vsel %vm857_vm2, %v6595_v42, %v1016_v28 }
 0x1df   :  { %v4969_v46 = vpop.permute.xlu1 %1925  ;;  %v1041_v33 = vsel %vm857_vm2, %v6596_v21, %v1039_v51  ;;  %v1040_v22 = vsel %vm857_vm2, %v6597_v13, %v1038_v57  ;;  %v1085_v0 = vsel %vm857_vm2, %v6601_v59, %v1083_v30  ;;  %v1084_v50 = vsel %vm857_vm2, %v6602_v27, %v1082_v32  ;;  %v6608_v51 = vld [vmem:[#allocation77_spill] sm:$0xff]  ;;  %v6609_v59 = vld [vmem:[#allocation78_spill] sm:$0xff] }
 0x1e0   :  { %6598 = vst [vmem:[#allocation32_spill] sm:$0xff] %v4969_v46  ;;  %v4975_v61 = vpop.permute.xlu0 %1923  ;;  %v2473_v46 = vmul.f32 %v4709_v55, %v2470_v9  ;;  %v1063_v9 = vsel %vm857_vm2, %v6599_v19, %v1061_v26  ;;  %v3579_v42 = vrot.slane %v2474_v17, 10  ;;  %v2510_v28 = vmul.f32 %v2508_v14, %v4478_v62 }
 0x1e1   :  { %6603 = vst [vmem:[#allocation33_spill] sm:$0xff] %v4975_v61  ;;  %2455 = vrot.lane.b32.xlu1 %v3574_v1, %s3706_s25  ;;  %v1019_v61 = vsel %vm857_vm2, %v6594_v41, %v1017_v37  ;;  %v1062_v1 = vsel %vm857_vm2, %v6600_v31, %v1060_v40  ;;  %v6607_v41 = vld [vmem:[#allocation76_spill] sm:$0xff]  ;;  %v1127_v13 = vrot.slane %v6608_v51, 4  ;;  %v2509_v19 = vmul.f32 %v4686_v18, %v2508_v14 }
 0x1e2   :  { %2453 = vrot.lane.b32.xlu0 %v3573_v63, %s3706_s25  ;;  %v6606_v63 = vld [vmem:[#allocation75_spill] sm:$0xff]  ;;  %v1104_v37 = vrot.slane %v6607_v41, 4  ;;  %v1023_v21 = vadd.f32 %v1019_v61, %v917_v24  ;;  %v3578_v57 = vrot.slane %v2473_v46, 10  ;;  %v1022_v26 = vadd.f32 %v1018_v5, %v916_v49 }
 0x1e3   :  { %v4994_v47 = vpop.permute.xlu1 %1947  ;;  %v1105_v15 = vrot.slane %v6606_v63, 4  ;;  %v1045_v31 = vadd.f32 %v1041_v33, %v935_v6  ;;  %v1044_v40 = vadd.f32 %v1040_v22, %v934_v36  ;;  %v1126_v30 = vrot.slane %v6609_v59, 4  ;;  %v6613_v33 = vld [vmem:[#allocation80_spill] sm:$0xff] }
 0x1e4   :  { %6604 = vst [vmem:[#allocation34_spill] sm:$0xff] %v4994_v47  ;;  %v5004_v58 = vpop.permute.xlu0 %1945  ;;  %v1067_v32 = vadd.f32 %v1063_v9, %v957_v60  ;;  %v1089_v17 = vadd.f32 %v1085_v0, %v979_v39  ;;  %v1088_v62 = vadd.f32 %v1084_v50, %v978_v48  ;;  %v1106_v46 = vsel %vm857_vm2, %v6607_v41, %v1104_v37  ;;  %v6614_v9 = vld [vmem:[#allocation81_spill] sm:$0xff]  ;;  %v6616_v0 = vld [vmem:[#allocation82_spill] sm:$0xff]  ;;  %v6618_v41 = vld [vmem:[#allocation84_spill] sm:$0xff] }
 0x1e5   :  { %6605 = vst [vmem:[#allocation35_spill] sm:$0xff] %v5004_v58  ;;  %2489 = vrot.lane.b32.xlu1 %v3577_v11, %s3706_s25  ;;  %v1066_v11 = vadd.f32 %v1062_v1, %v956_v44  ;;  %v1107_v61 = vsel %vm857_vm2, %v6606_v63, %v1105_v15  ;;  %v3582_v49 = vrot.slane %v2510_v28, 10  ;;  %v2512_v6 = vmul.f32 %v2508_v14, %v4506_v2  ;;  %v6617_v63 = vld [vmem:[#allocation83_spill] sm:$0xff]  ;;  %v6619_v37 = vld [vmem:[#allocation85_spill] sm:$0xff] }
 0x1e6   :  { %2487 = vrot.lane.b32.xlu0 %v3576_v7, %s3706_s25  ;;  %v1129_v36 = vsel %vm857_vm2, %v6608_v51, %v1127_v13  ;;  %v3581_v39 = vrot.slane %v2509_v19, 10  ;;  %v2511_v44 = vmul.f32 %v4709_v55, %v2508_v14  ;;  %v2546_v60 = vstv %s4984_s21  ;;  %v6612_v7 = vld [vmem:[#allocation79_spill] sm:$0xff]  ;;  %v6621_v13 = vld [vmem:[#allocation86_spill] sm:$0xff]  ;;  %s5890_s21 = sld [smem:[#allocation2 + $0x86]] }
 0x1e7   :  { %v5014_v27 = vpop.permute.xlu1 %1969  ;;  %v1128_v48 = vsel %vm857_vm2, %v6609_v59, %v1126_v30  ;;  %v1149_v5 = vrot.slane %v6612_v7, 4  ;;  %v1148_v22 = vrot.slane %v6613_v33, 4  ;;  %v1167_v2 = vrot.slane %v6614_v9, 4  ;;  %v5049_v59 = vld [vmem:[%s6245_s0 + $0x8] sm:$0x7] }
 0x1e8   :  { %6610 = vst [vmem:[#allocation36_spill] sm:$0xff] %v5014_v27  ;;  %v5016_v24 = vpop.permute.xlu0 %1967  ;;  %v1166_v50 = vrot.slane %v6616_v0, 4  ;;  %v1186_v15 = vrot.slane %v6617_v63, 4  ;;  %v1185_v14 = vrot.slane %v6618_v41, 4  ;;  %v1111_v51 = vadd.f32 %v1107_v61, %v1001_v25 }
 0x1e9   :  { %6611 = vst [vmem:[#allocation37_spill] sm:$0xff] %v5016_v24  ;;  %2493 = vrot.lane.b32.xlu1 %v3579_v42, %s3706_s25  ;;  %v1204_v42 = vrot.slane %v6619_v37, 4  ;;  %v3584_v19 = vrot.slane %v2512_v6, 10  ;;  %v2548_v30 = vmul.f32 %v5049_v59, %v2546_v60  ;;  %v1110_v24 = vadd.f32 %v1106_v46, %v4979_v53 }
 0x1ea   :  { %2491 = vrot.lane.b32.xlu0 %v3578_v57, %s3706_s25  ;;  %v1203_v57 = vrot.slane %v6621_v13, 4  ;;  %v1133_v27 = vadd.f32 %v1129_v36, %v1023_v21  ;;  %v2547_v25 = vmul.f32 %v4686_v18, %v2546_v60  ;;  %v1132_v61 = vadd.f32 %v1128_v48, %v1022_v26 }
 0x1eb   :  { %v5036_v1 = vpop.permute.xlu1 %1991  ;;  %v1150_v6 = vsel %vm857_vm2, %v6613_v33, %v1148_v22  ;;  %v1169_v53 = vsel %vm1168_vm3, %v6616_v0, %v1166_v50  ;;  %v1188_v21 = vsel %vm1168_vm3, %v6617_v63, %v1186_v15  ;;  %v1187_v26 = vsel %vm1168_vm3, %v6618_v41, %v1185_v14  ;;  %v6625_v22 = vld [vmem:[#allocation88_spill] sm:$0xff]  ;;  %v6626_v14 = vld [vmem:[#allocation89_spill] sm:$0xff] }
 0x1ec   :  { %6615 = vst [vmem:[#allocation38_spill] sm:$0xff] %v5036_v1  ;;  %v5042_v28 = vpop.permute.xlu0 %1989  ;;  %v3583_v1 = vrot.slane %v2511_v44, 10  ;;  %v1206_v46 = vsel %vm1168_vm3, %v6619_v37, %v1204_v42  ;;  %v6624_v44 = vld [vmem:[#allocation87_spill] sm:$0xff]  ;;  %v2549_v0 = vmul.f32 %v4709_v55, %v2546_v60  ;;  %v2584_v50 = vstv %s5029_s22 }
 0x1ed   :  { %6620 = vst [vmem:[#allocation39_spill] sm:$0xff] %v5042_v28  ;;  %2527 = vrot.lane.b32.xlu1 %v3582_v49, %s3706_s25  ;;  %v1151_v49 = vsel %vm857_vm2, %v6612_v7, %v1149_v5  ;;  %v1170_v28 = vsel %vm1168_vm3, %v6614_v9, %v1167_v2  ;;  %v1222_v48 = vrot.slane %v6624_v44, 4  ;;  %v3587_v7 = vrot.slane %v2548_v30, 10  ;;  %v5080_v5 = vld [vmem:[%s6245_s0 + $0x14] sm:$0x7] }
 0x1ee   :  { %2525 = vrot.lane.b32.xlu0 %v3581_v39, %s3706_s25  ;;  %v1205_v39 = vsel %vm1168_vm3, %v6621_v13, %v1203_v57  ;;  %v2550_v33 = vmul.f32 %v5080_v5, %v2546_v60  ;;  %v1221_v9 = vrot.slane %v6625_v22, 4  ;;  %v3586_v2 = vrot.slane %v2547_v25, 10  ;;  %v6628_v30 = vld [vmem:[#allocation90_spill] sm:$0xff] }
 0x1ef   :  { %v5061_v58 = vpop.permute.xlu1 %2013  ;;  %v1155_v63 = vadd.f32 %v1151_v49, %v1045_v31  ;;  %v1154_v15 = vadd.f32 %v1150_v6, %v1044_v40  ;;  %v1174_v41 = vadd.f32 %v1170_v28, %v1067_v32  ;;  %v1240_v37 = vrot.slane %v6626_v14, 4  ;;  %v6632_v49 = vld [vmem:[#allocation93_spill] sm:$0xff] }
 0x1f0   :  { %6622 = vst [vmem:[#allocation40_spill] sm:$0xff] %v5061_v58  ;;  %v5071_v36 = vpop.permute.xlu0 %2011  ;;  %v1173_v13 = vadd.f32 %v1169_v53, %v1066_v11  ;;  %v1192_v57 = vadd.f32 %v1188_v21, %v1089_v17  ;;  %v1239_v58 = vrot.slane %v6628_v30, 4  ;;  %v1210_v47 = vadd.f32 %v1206_v46, %v1111_v51  ;;  %v6631_v51 = vld [vmem:[#allocation92_spill] sm:$0xff] }
 0x1f1   :  { %6623 = vst [vmem:[#allocation41_spill] sm:$0xff] %v5071_v36  ;;  %2531 = vrot.lane.b32.xlu1 %v3584_v19, %s3706_s25  ;;  %v1191_v19 = vadd.f32 %v1187_v26, %v1088_v62  ;;  %v3589_v60 = vrot.slane %v2550_v33, 10  ;;  %v2586_v31 = vmul.f32 %v5049_v59, %v2584_v50  ;;  %v1224_v40 = vsel %vm1168_vm3, %v6624_v44, %v1222_v48  ;;  %v6634_v26 = vld [vmem:[#allocation94_spill] sm:$0xff]  ;;  %v6636_v48 = vld [vmem:[#allocation96_spill] sm:$0xff] }
 0x1f2   :  { %2529 = vrot.lane.b32.xlu0 %v3583_v1, %s3706_s25  ;;  %v1209_v1 = vadd.f32 %v1205_v39, %v1110_v24  ;;  %v1223_v32 = vsel %vm1168_vm3, %v6625_v22, %v1221_v9  ;;  %v3588_v11 = vrot.slane %v2549_v0, 10  ;;  %v2585_v17 = vmul.f32 %v4686_v18, %v2584_v50  ;;  %v6630_v24 = vld [vmem:[#allocation91_spill] sm:$0xff]  ;;  %v6638_v9 = vld [vmem:[#allocation97_spill] sm:$0xff] }
 0x1f3   :  { %v5088_v42 = vpop.permute.xlu1 %2035  ;;  %v1242_v62 = vsel %vm1168_vm3, %v6626_v14, %v1240_v37  ;;  %v1262_v28 = vrot.slane %v6630_v24, 4  ;;  %v1261_v25 = vrot.slane %v6631_v51, 4  ;;  %v1284_v6 = vrot.slane %v6632_v49, 4  ;;  %v6635_v39 = vld [vmem:[#allocation95_spill] sm:$0xff] }
 0x1f4   :  { %6627 = vst [vmem:[#allocation42_spill] sm:$0xff] %v5088_v42  ;;  %v5091_v36 = vpop.permute.xlu0 %2033  ;;  %v1241_v21 = vsel %vm1168_vm3, %v6628_v30, %v1239_v58  ;;  %v1283_v46 = vrot.slane %v6634_v26, 4  ;;  %v1306_v44 = vrot.slane %v6635_v39, 4  ;;  %v1228_v22 = vadd.f32 %v1224_v40, %v1133_v27 }
 0x1f5   :  { %6629 = vst [vmem:[#allocation43_spill] sm:$0xff] %v5091_v36  ;;  %2565 = vrot.lane.b32.xlu1 %v3587_v7, %s3706_s25  ;;  %v1305_v7 = vrot.slane %v6636_v48, 4  ;;  %v3592_v0 = vrot.slane %v2586_v31, 10  ;;  %v2588_v14 = vmul.f32 %v5080_v5, %v2584_v50  ;;  %v1227_v37 = vadd.f32 %v1223_v32, %v1132_v61 }
 0x1f6   :  { %2563 = vrot.lane.b32.xlu0 %v3586_v2, %s3706_s25  ;;  %v1328_v2 = vrot.slane %v6638_v9, 4  ;;  %v3591_v58 = vrot.slane %v2585_v17, 10  ;;  %v2587_v30 = vmul.f32 %v4709_v55, %v2584_v50  ;;  %v1245_v42 = vadd.f32 %v1241_v21, %v1154_v15  ;;  %v6640_v15 = vld [vmem:[#allocation98_spill] sm:$0xff]  ;;  %v6642_v17 = vld [vmem:[#allocation99_spill] sm:$0xff] }
 0x1f7   :  { %v5108_v53 = vpop.permute.xlu1 %2057  ;;  %v1264_v36 = vsel %vm1168_vm3, %v6630_v24, %v1262_v28  ;;  %v1263_v27 = vsel %vm1168_vm3, %v6631_v51, %v1261_v25  ;;  %v1285_v61 = vsel %vm1168_vm3, %v6634_v26, %v1283_v46  ;;  %v1307_v50 = vsel %vm1168_vm3, %v6636_v48, %v1305_v7  ;;  %v6643_v24 = vld [vmem:[#allocation100_spill] sm:$0xff]  ;;  %v6644_v25 = vld [vmem:[#allocation101_spill] sm:$0xff]  ;;  %v6646_v7 = vld [vmem:[#allocation103_spill] sm:$0xff] }
 0x1f8   :  { %6633 = vst [vmem:[#allocation44_spill] sm:$0xff] %v5108_v53  ;;  %v5115_v33 = vpop.permute.xlu0 %2055  ;;  %v1246_v53 = vadd.f32 %v1242_v62, %v1155_v63  ;;  %v1308_v63 = vsel %vm1168_vm3, %v6635_v39, %v1306_v44  ;;  %v1327_v40 = vrot.slane %v6640_v15, 4  ;;  %v1350_v62 = vrot.slane %v6642_v17, 4 }
 0x1f9   :  { %6637 = vst [vmem:[#allocation45_spill] sm:$0xff] %v5115_v33  ;;  %2569 = vrot.lane.b32.xlu1 %v3589_v60, %s3706_s25  ;;  %v1286_v60 = vsel %vm1168_vm3, %v6632_v49, %v1284_v6  ;;  %v1349_v28 = vrot.slane %v6643_v24, 4  ;;  %v3594_v51 = vrot.slane %v2588_v14, 10  ;;  %v1372_v49 = vrot.slane %v6644_v25, 4  ;;  %v6645_v6 = vld [vmem:[#allocation102_spill] sm:$0xff] }
 0x1fa   :  { %2567 = vrot.lane.b32.xlu0 %v3588_v11, %s3706_s25  ;;  %v1330_v11 = vsel %vm1168_vm3, %v6638_v9, %v1328_v2  ;;  %v1371_v21 = vrot.slane %v6645_v6, 4  ;;  %v3593_v26 = vrot.slane %v2587_v30, 10  ;;  %v2622_v46 = vstv %s5101_s28 }
 0x1fb   :  { %v5128_v31 = vpop.permute.xlu1 %2079  ;;  %v1268_v39 = vadd.f32 %v1264_v36, %v1174_v41  ;;  %v1267_v44 = vadd.f32 %v1263_v27, %v1173_v13  ;;  %v1290_v48 = vadd.f32 %v1286_v60, %v1192_v57  ;;  %v1394_v9 = vrot.slane %v6646_v7, 4  ;;  %v6649_v57 = vld [vmem:[#allocation104_spill] sm:$0xff]  ;;  %v6650_v27 = vld [vmem:[#allocation105_spill] sm:$0xff] }
 0x1fc   :  { %6639 = vst [vmem:[#allocation46_spill] sm:$0xff] %v5128_v31  ;;  %v5137_v32 = vpop.permute.xlu0 %2077  ;;  %v1289_v31 = vadd.f32 %v1285_v61, %v1191_v19  ;;  %v1311_v14 = vadd.f32 %v1307_v50, %v1209_v1  ;;  %v1352_v30 = vsel %vm1168_vm3, %v6642_v17, %v1350_v62  ;;  %v1351_v36 = vsel %vm1168_vm3, %v6643_v24, %v1349_v28  ;;  %v6651_v61 = vld [vmem:[#allocation106_spill] sm:$0xff]  ;;  %v6652_v50 = vld [vmem:[#allocation107_spill] sm:$0xff]  ;;  %v6653_v24 = vld [vmem:[#allocation108_spill] sm:$0xff] }
 0x1fd   :  { %6641 = vst [vmem:[#allocation47_spill] sm:$0xff] %v5137_v32  ;;  %2603 = vrot.lane.b32.xlu1 %v3592_v0, %s3706_s25  ;;  %v1312_v0 = vadd.f32 %v1308_v63, %v1210_v47  ;;  %v1334_v32 = vadd.f32 %v1330_v11, %v1228_v22  ;;  %v2624_v41 = vmul.f32 %v5049_v59, %v2622_v46  ;;  %v1393_v19 = vrot.slane %v6649_v57, 4 }
 0x1fe   :  { %2601 = vrot.lane.b32.xlu0 %v3591_v58, %s3706_s25  ;;  %v1329_v58 = vsel %vm1168_vm3, %v6640_v15, %v1327_v40  ;;  %v1374_v47 = vsel %vm1168_vm3, %v6644_v25, %v1372_v49  ;;  %v1373_v13 = vsel %vm1168_vm3, %v6645_v6, %v1371_v21  ;;  %v2623_v1 = vmul.f32 %v4686_v18, %v2622_v46  ;;  %v6654_v6 = vld [vmem:[#allocation109_spill] sm:$0xff] }
 0x1ff   :  { %v5151_v2 = vpop.permute.xlu1 %2101  ;;  %v1396_v22 = vsel %vm1168_vm3, %v6646_v7, %v1394_v9  ;;  %v1416_v60 = vrot.slane %v6650_v27, 4  ;;  %v1415_v63 = vrot.slane %v6651_v61, 4  ;;  %v1438_v15 = vrot.slane %v6652_v50, 4 }
 0x200   :  { %6647 = vst [vmem:[#allocation48_spill] sm:$0xff] %v5151_v2  ;;  %v5153_v33 = vpop.permute.xlu0 %2099  ;;  %v1333_v11 = vadd.f32 %v1329_v58, %v1227_v37  ;;  %v1356_v17 = vadd.f32 %v1352_v30, %v1246_v53  ;;  %v1355_v62 = vadd.f32 %v1351_v36, %v1245_v42  ;;  %v1437_v28 = vrot.slane %v6653_v24, 4 }
 0x201   :  { %6648 = vst [vmem:[#allocation49_spill] sm:$0xff] %v5153_v33  ;;  %2607 = vrot.lane.b32.xlu1 %v3594_v51, %s3706_s25  ;;  %v1378_v25 = vadd.f32 %v1374_v47, %v1268_v39  ;;  %v1377_v49 = vadd.f32 %v1373_v13, %v1267_v44  ;;  %v1460_v21 = vrot.slane %v6654_v6, 4  ;;  %v1400_v7 = vadd.f32 %v1396_v22, %v1290_v48  ;;  %v6655_v48 = vld [vmem:[#allocation110_spill] sm:$0xff]  ;;  %v6657_v47 = vld [vmem:[#allocation112_spill] sm:$0xff] }
 0x202   :  { %2605 = vrot.lane.b32.xlu0 %v3593_v26, %s3706_s25  ;;  %v2626_v26 = vmul.f32 %v5080_v5, %v2622_v46  ;;  %v1395_v9 = vsel %vm1168_vm3, %v6649_v57, %v1393_v19  ;;  %v2625_v42 = vmul.f32 %v4709_v55, %v2622_v46  ;;  %v2653_v53 = vstv %s5148_s29  ;;  %v6656_v46 = vld [vmem:[#allocation111_spill] sm:$0xff] }
 0x203   :  { %v5175_v40 = vpop.permute.xlu1 %2105  ;;  %v1418_v37 = vsel %vm1168_vm3, %v6650_v27, %v1416_v60  ;;  %v1417_v39 = vsel %vm1168_vm3, %v6651_v61, %v1415_v63  ;;  %v1440_v44 = vsel %vm1168_vm3, %v6652_v50, %v1438_v15  ;;  %v1459_v58 = vrot.slane %v6655_v48, 4  ;;  %v6658_v27 = vld [vmem:[#allocation113_spill] sm:$0xff] }
 0x204   :  { %v5178_v51 = vpop.permute.xlu0 %2103  ;;  %v1439_v36 = vsel %vm1168_vm3, %v6653_v24, %v1437_v28  ;;  %v1477_v13 = vrot.slane %v6657_v47, 4  ;;  %v1497_v57 = vrot.slane %v4509_v23, 4  ;;  %v1462_v22 = vsel %vm1168_vm3, %v6654_v6, %v1460_v21 }
 0x205   :  { %2633 = vrot.lane.b32.xlu1 %v2624_v41, %s3707_s30  ;;  %v1478_v41 = vrot.slane %v6656_v46, 4  ;;  %v1496_v60 = vrot.slane %v6658_v27, 4  ;;  %v2655_v61 = vmul.f32 %v5049_v59, %v2653_v53  ;;  %v1422_v63 = vadd.f32 %v1418_v37, %v1312_v0 }
 0x206   :  { %2631 = vrot.lane.b32.xlu0 %v2623_v1, %s3707_s30  ;;  %v1399_v1 = vadd.f32 %v1395_v9, %v1289_v31  ;;  %v1421_v50 = vadd.f32 %v1417_v39, %v1311_v14  ;;  %v1444_v15 = vadd.f32 %v1440_v44, %v1334_v32  ;;  %v2654_v24 = vmul.f32 %v4686_v18, %v2653_v53 }
 0x207   :  { %v5197_v30 = vpop.permute.xlu1 %2133  ;;  %v1443_v28 = vadd.f32 %v1439_v36, %v1333_v11  ;;  %v1461_v31 = vsel %vm1168_vm3, %v6655_v48, %v1459_v58  ;;  %v1515_v9 = vrot.slane %v4523_v35, 4  ;;  %v1514_v6 = vrot.slane %v4525_v12, 4 }
 0x208   :  { %v5204_v19 = vpop.permute.xlu0 %2131  ;;  %v1466_v0 = vadd.f32 %v1462_v22, %v1356_v17  ;;  %v1481_v32 = vsel %vm1479_vm4, %v6656_v46, %v1478_v41  ;;  %v1480_v18 = vsel %vm1479_vm4, %v6657_v47, %v1477_v13  ;;  %v1499_v14 = vsel %vm1479_vm4, %v4509_v23, %v1497_v57 }
 0x209   :  { %2637 = vrot.lane.b32.xlu1 %v2626_v26, %s3707_s30  ;;  %v1498_v26 = vsel %vm1479_vm4, %v6658_v27, %v1496_v60  ;;  %v1532_v37 = vrot.slane %v4549_v54, 4  ;;  %v2657_v17 = vmul.f32 %v5080_v5, %v2653_v53  ;;  %v1465_v39 = vadd.f32 %v1461_v31, %v1355_v62 }
 0x20a   :  { %2635 = vrot.lane.b32.xlu0 %v2625_v42, %s3707_s30  ;;  %v1533_v42 = vrot.slane %v4547_v29, 4  ;;  %v1551_v44 = vrot.slane %v4570_v8, 4  ;;  %v2656_v23 = vmul.f32 %v4709_v55, %v2653_v53  ;;  %v2683_v48 = vstv %s5188_s4 }
 0x20b   :  { %v5217_v21 = vpop.permute.xlu1 %2137  ;;  %v1485_v58 = vadd.f32 %v1481_v32, %v1378_v25  ;;  %v1517_v36 = vsel %vm1479_vm4, %v4523_v35, %v1515_v9  ;;  %v1516_v46 = vsel %vm1479_vm4, %v4525_v12, %v1514_v6  ;;  %v1550_v41 = vrot.slane %v4576_v43, 4 }
 0x20c   :  { %v5227_v11 = vpop.permute.xlu0 %2135  ;;  %v1484_v13 = vadd.f32 %v1480_v18, %v1377_v49  ;;  %v1503_v62 = vadd.f32 %v1499_v14, %v1400_v7  ;;  %v1502_v57 = vadd.f32 %v1498_v26, %v1399_v1  ;;  %v1573_v22 = vrot.slane %v4592_v16, 4 }
 0x20d   :  { %2664 = vrot.lane.b32.xlu1 %v2655_v61, %s3707_s30  ;;  %v1535_v55 = vsel %vm1479_vm4, %v4547_v29, %v1533_v42  ;;  %v1534_v12 = vsel %vm1479_vm4, %v4549_v54, %v1532_v37  ;;  %v1572_v35 = vrot.slane %v4602_v3, 4  ;;  %v2685_v25 = vmul.f32 %v5049_v59, %v2683_v48  ;;  %v5266_v29 = vld [vmem:[%s6245_s0] sm:$0x77] }
 0x20e   :  { %2662 = vrot.lane.b32.xlu0 %v2654_v24, %s3707_s30  ;;  %v1521_v49 = vadd.f32 %v1517_v36, %v1422_v63  ;;  %v1520_v7 = vadd.f32 %v1516_v46, %v1421_v50  ;;  %v1553_v53 = vsel %vm1479_vm4, %v4570_v8, %v1551_v44  ;;  %v2684_v54 = vmul.f32 %v5266_v29, %v2683_v48  ;;  %v6660_v46 = vld [vmem:[#allocation8_spill] sm:$0xff] }
 0x20f   :  { %v5244_v47 = vpop.permute.xlu1 %2163  ;;  %v1552_v1 = vsel %vm1479_vm4, %v4576_v43, %v1550_v41  ;;  %v1595_v60 = vrot.slane %v4619_v4, 4  ;;  %v1594_v61 = vrot.slane %v4621_v10, 4  ;;  %v2713_v50 = vstv %s5219_s5 }
 0x210   :  { %v5247_v27 = vpop.permute.xlu0 %2161  ;;  %v1539_v8 = vadd.f32 %v1535_v55, %v1444_v15  ;;  %v1538_v24 = vadd.f32 %v1534_v12, %v1443_v28  ;;  %v1575_v31 = vsel %vm1479_vm4, %v4592_v16, %v1573_v22  ;;  %v1617_v9 = vrot.slane %v4640_v52, 4  ;;  %v5290_v15 = vld [vmem:[%s6245_s0 + $0xc] sm:$0x77] }
 0x211   :  { %2668 = vrot.lane.b32.xlu1 %v2657_v17, %s3707_s30  ;;  %v5281_v32 = vadd.f32 %v1553_v53, %v1466_v0  ;;  %v1574_v43 = vsel %vm1479_vm4, %v4602_v3, %v1572_v35  ;;  %v2687_v18 = vmul.f32 %v5080_v5, %v2683_v48  ;;  %v2686_v16 = vmul.f32 %v5290_v15, %v2683_v48  ;;  %v6661_v12 = vld [vmem:[#allocation9_spill] sm:$0xff] }
 0x212   :  { %2666 = vrot.lane.b32.xlu0 %v2656_v23, %s3707_s30  ;;  %v1556_v28 = vadd.f32 %v1552_v1, %v1465_v39  ;;  %v1616_v14 = vrot.slane %v4646_v56, 4  ;;  %v2715_v0 = vmul.f32 %v5049_v59, %v2713_v50  ;;  %v2714_v3 = vmul.f32 %v5266_v29, %v2713_v50 }
 0x213   :  { %v5273_v63 = vpop.permute.xlu1 %2167  ;;  %v1579_v26 = vadd.f32 %v1575_v31, %v1485_v58  ;;  %v1597_v42 = vsel %vm1479_vm4, %v4619_v4, %v1595_v60  ;;  %v1596_v37 = vsel %vm1479_vm4, %v4621_v10, %v1594_v61  ;;  %v1639_v17 = vrot.slane %v4661_v38, 4 }
 0x214   :  { %v5279_v6 = vpop.permute.xlu0 %2165  ;;  %v5306_v44 = vadd.f32 %v1574_v43, %v1484_v13  ;;  %v1619_v23 = vsel %vm1479_vm4, %v4640_v52, %v1617_v9  ;;  %v1638_v48 = vrot.slane %v4671_v45, 4  ;;  %v2743_v58 = vstv %s5249_s6 }
 0x215   :  { %2694 = vrot.lane.b32.xlu1 %v2685_v25, %s3707_s30  ;;  %v1661_v41 = vrot.slane %v6660_v46, 4  ;;  %v2717_v4 = vmul.f32 %v5080_v5, %v2713_v50  ;;  %v2716_v10 = vmul.f32 %v5290_v15, %v2713_v50  ;;  %v2773_v22 = vstv %s5258_s7 }
 0x216   :  { %2692 = vrot.lane.b32.xlu0 %v2684_v54, %s3707_s30  ;;  %v5319_v55 = vadd.f32 %v1597_v42, %v1503_v62  ;;  %v5321_v13 = vadd.f32 %v1596_v37, %v1502_v57  ;;  %v1618_v52 = vsel %vm1479_vm4, %v4646_v56, %v1616_v14  ;;  %v1660_v35 = vrot.slane %v6661_v12, 4  ;;  %v6663_v57 = vld [vmem:[#allocation10_spill] sm:$0xff]  ;;  %v6666_v37 = vld [vmem:[#allocation12_spill] sm:$0xff] }
 0x217   :  { %v5304_v39 = vpop.permute.xlu1 %2193  ;;  %v5327_v25 = vadd.f32 %v1619_v23, %v1521_v49  ;;  %v1641_v53 = vsel %vm1479_vm4, %v4661_v38, %v1639_v17  ;;  %v2745_v1 = vmul.f32 %v5049_v59, %v2743_v58  ;;  %v2744_v62 = vmul.f32 %v5266_v29, %v2743_v58 }
 0x218   :  { %v5311_v36 = vpop.permute.xlu0 %2191  ;;  %v1640_v56 = vsel %vm1479_vm4, %v4671_v45, %v1638_v48  ;;  %v1683_v60 = vrot.slane %v6663_v57, 4  ;;  %v5343_v49 = vmul.f32 %v5049_v59, %v2773_v22  ;;  %v5346_v38 = vmul.f32 %v5266_v29, %v2773_v22 }
 0x219   :  { %6659 = vst [vmem:[#allocation50_spill] sm:$0xff] %v5311_v36  ;;  %2698 = vrot.lane.b32.xlu1 %v2687_v18, %s3707_s30  ;;  %v5348_v50 = vadd.f32 %v1618_v52, %v1520_v7  ;;  %v1663_v31 = vsel %vm1479_vm4, %v6660_v46, %v1661_v41  ;;  %v5354_v9 = vmul.f32 %v5080_v5, %v2743_v58  ;;  %v6665_v18 = vld [vmem:[#allocation11_spill] sm:$0xff]  ;;  %v2811_v14 = vstv %s5297_s11  ;;  %v6668_v41 = vld [vmem:[#allocation13_spill] sm:$0xff] }
 0x21a   :  { %2696 = vrot.lane.b32.xlu0 %v2686_v16, %s3707_s30  ;;  %v5357_v45 = vmul.f32 %v5080_v5, %v2773_v22  ;;  %v1662_v43 = vsel %vm1479_vm4, %v6661_v12, %v1660_v35  ;;  %v1682_v16 = vrot.slane %v6665_v18, 4  ;;  %v5364_v7 = vmul.f32 %v5290_v15, %v2773_v22 }
 0x21b   :  { %v5331_v54 = vpop.permute.xlu1 %2197  ;;  %v5367_v42 = vadd.f32 %v1641_v53, %v1539_v8  ;;  %v1705_v17 = vrot.slane %v6666_v37, 4  ;;  %v2746_v48 = vmul.f32 %v5290_v15, %v2743_v58  ;;  %v1685_v46 = vsel %vm1479_vm4, %v6663_v57, %v1683_v60 }
 0x21c   :  { %6662 = vst [vmem:[#allocation51_spill] sm:$0xff] %v5331_v54  ;;  %v5340_v61 = vpop.permute.xlu0 %2195  ;;  %v1704_v52 = vrot.slane %v6668_v41, 4  ;;  %v5385_v12 = vadd.f32 %v1662_v43, %v1556_v28  ;;  %v5389_v58 = vmul.f32 %v5049_v59, %v2811_v14  ;;  %v5392_v35 = vmul.f32 %v5266_v29, %v2811_v14 }
 0x21d   :  { %6664 = vst [vmem:[#allocation52_spill] sm:$0xff] %v5340_v61  ;;  %2724 = vrot.lane.b32.xlu1 %v2715_v0, %s3707_s30  ;;  %v5369_v0 = vadd.f32 %v1640_v56, %v1538_v24  ;;  %v5383_v24 = vadd.f32 %v1663_v31, %v5281_v32  ;;  %v1684_v53 = vsel %vm1479_vm4, %v6665_v18, %v1682_v16  ;;  %v6670_v56 = vld [vmem:[#allocation14_spill] sm:$0xff]  ;;  %v6671_v31 = vld [vmem:[#allocation15_spill] sm:$0xff]  ;;  %v2849_v22 = vstv %s5335_s12  ;;  %v6673_v16 = vld [vmem:[#allocation16_spill] sm:$0xff] }
 0x21e   :  { %2722 = vrot.lane.b32.xlu0 %v2714_v3, %s3707_s30  ;;  %v1727_v57 = vrot.slane %v6670_v56, 4  ;;  %v1707_v60 = vsel %vm1479_vm4, %v6666_v37, %v1705_v17  ;;  %v1726_v43 = vrot.slane %v6671_v31, 4  ;;  %v1706_v18 = vsel %vm1479_vm4, %v6668_v41, %v1704_v52 }
 0x21f   :  { %v5372_v23 = vpop.permute.xlu1 %2223  ;;  %v1748_v32 = vrot.slane %v4788_v20, 4  ;;  %v5420_v37 = vadd.f32 %v1684_v53, %v5306_v44  ;;  %v5426_v41 = vmul.f32 %v5290_v15, %v2811_v14  ;;  %v5429_v52 = vadd.f32 %v1707_v60, %v5319_v55 }
 0x220   :  { %6667 = vst [vmem:[#allocation53_spill] sm:$0xff] %v5372_v23  ;;  %v5378_v3 = vpop.permute.xlu0 %2221  ;;  %v1729_v28 = vsel %vm1479_vm4, %v6670_v56, %v1727_v57  ;;  %v5435_v44 = vmul.f32 %v5049_v59, %v2849_v22  ;;  %v5441_v53 = vadd.f32 %v1706_v18, %v5321_v13  ;;  %v1728_v55 = vsel %vm1479_vm4, %v6671_v31, %v1726_v43 }
 0x221   :  { %6669 = vst [vmem:[#allocation54_spill] sm:$0xff] %v5378_v3  ;;  %2728 = vrot.lane.b32.xlu1 %v2717_v4, %s3707_s30  ;;  %v5402_v4 = vadd.f32 %v1685_v46, %v1579_v26  ;;  %v5417_v26 = vmul.f32 %v5080_v5, %v2811_v14  ;;  %v6675_v14 = vld [vmem:[#allocation17_spill] sm:$0xff]  ;;  %v6676_v46 = vld [vmem:[#allocation18_spill] sm:$0xff]  ;;  %v1750_v13 = vsel %vm1479_vm4, %v4788_v20, %v1748_v32  ;;  %v6679_v32 = vld [vmem:[#allocation19_spill] sm:$0xff]  ;;  %v6686_v23 = vrot.slane %v5357_v45, 9 }
 0x222   :  { %2726 = vrot.lane.b32.xlu0 %v2716_v10, %s3707_s30  ;;  %v1749_v10 = vrot.slane %v6673_v16, 4  ;;  %v1771_v60 = vrot.slane %v6675_v14, 4  ;;  %v1770_v56 = vrot.slane %v6676_v46, 4  ;;  %v5459_v31 = vmul.f32 %v5080_v5, %v2849_v22 }
 0x223   :  { %v5407_v8 = vpop.permute.xlu1 %2227  ;;  %v5462_v43 = vadd.f32 %v1729_v28, %v5327_v25  ;;  %v5472_v20 = vadd.f32 %v1728_v55, %v5348_v50  ;;  %v1789_v17 = vrot.slane %v6679_v32, 4  ;;  %v6683_v25 = vld [vmem:[#allocation22_spill] sm:$0xff] }
 0x224   :  { %6672 = vst [vmem:[#allocation55_spill] sm:$0xff] %v5407_v8  ;;  %v5414_v33 = vpop.permute.xlu0 %2225  ;;  %v1772_v50 = vsel %vm1479_vm4, %v6676_v46, %v1770_v56  ;;  %v1807_v8 = vrot.slane %v6683_v25, 4 }
 0x225   :  { %6674 = vst [vmem:[#allocation56_spill] sm:$0xff] %v5414_v33  ;;  %2754 = vrot.lane.b32.xlu1 %v2745_v1, %s3707_s30  ;;  %v5438_v1 = vmul.f32 %v5266_v29, %v2849_v22 }
 0x226   :  { %2752 = vrot.lane.b32.xlu0 %v2744_v62, %s3707_s30  ;;  %v1751_v62 = vsel %vm1479_vm4, %v6673_v16, %v1749_v10  ;;  %v5468_v16 = vmul.f32 %v5290_v15, %v2849_v22  ;;  %v2887_v10 = vstv %s5394_s13  ;;  %v1773_v22 = vsel %vm1479_vm4, %v6675_v14, %v1771_v60 }
 0x227   :  { %v5447_v57 = vpop.permute.xlu1 %2261  ;;  %v5479_v28 = vadd.f32 %v1751_v62, %v5367_v42  ;;  %v5491_v42 = vmul.f32 %v5049_v59, %v2887_v10  ;;  %v6681_v62 = vld [vmem:[#allocation21_spill] sm:$0xff]  ;;  %v6682_v14 = vrot.slane %v5343_v49, 9  ;;  %v5499_v60 = vmul.f32 %v5266_v29, %v2887_v10 }
 0x228   :  { %6677 = vst [vmem:[#allocation57_spill] sm:$0xff] %v5447_v57  ;;  %v5455_v18 = vpop.permute.xlu0 %2259  ;;  %v6680_v57 = vld [vmem:[#allocation20_spill] sm:$0xff]  ;;  %v5502_v56 = vadd.f32 %v1773_v22, %v5383_v24  ;;  %v6684_v49 = vrot.slane %v5346_v38, 9  ;;  %v5515_v3 = vmul.f32 %v5080_v5, %v2887_v10  ;;  %v5518_v24 = vmul.f32 %v5290_v15, %v2887_v10 }
 0x229   :  { %6678 = vst [vmem:[#allocation58_spill] sm:$0xff] %v5455_v18  ;;  %2758 = vrot.lane.b32.xlu1 %v5354_v9, %s3707_s30  ;;  %v5482_v9 = vadd.f32 %v1750_v13, %v5369_v0  ;;  %v1788_v2 = vrot.slane %v6680_v57, 4  ;;  %v1808_v0 = vrot.slane %v6681_v62, 4  ;;  %v1792_v18 = vsel %vm1790_vm5, %v6679_v32, %v1789_v17 }
 0x22a   :  { %2756 = vrot.lane.b32.xlu0 %v2746_v48, %s3707_s30 }
 0x22b   :  { %v2266_v55 = vpop.permute.xlu1 %2265  ;;  %v1791_v17 = vsel %vm1790_vm5, %v6680_v57, %v1788_v2  ;;  %v5537_v2 = vadd.f32 %v1792_v18, %v5402_v4  ;;  %v6687_v57 = vld [vmem:[#allocation24_spill] sm:$0xff]  ;;  %v6693_v18 = vrot.slane %v5392_v35, 9 }
 0x22c   :  { %v2270_v48 = vrot.slane %v2266_v55, 4  ;;  %v2264_v33 = vpop.permute.xlu0 %2263  ;;  %v5505_v55 = vadd.f32 %v1772_v50, %v5385_v12  ;;  %v2963_v12 = vstv %s5449_s14  ;;  %v5549_v45 = vadd.f32 %v1791_v17, %v5420_v37 }
 0x22d   :  { %v2269_v13 = vrot.slane %v2264_v33, 4  ;;  %2792 = vrot.lane.b32.xlu1 %v6682_v14, %s3707_s30  ;;  %v5561_v61 = vmul.f32 %v5266_v29, %v2963_v12  ;;  %v2925_v50 = vstv %s5563_s16 }
 0x22e   :  { %2790 = vrot.lane.b32.xlu0 %v6684_v49, %s3707_s30  ;;  %6689 = vst [vmem:[#allocation59_spill] sm:$0xff] %v5549_v45  ;;  %v5698_v36 = vmul.f32 %v5080_v5, %v2925_v50 }
 0x22f   :  { %v2273_v14 = vsel %vm2111_vm6, %v2269_v13, %v2270_v48  ;;  %v2300_v46 = vpop.permute.xlu1 %2299  ;;  %v1810_v48 = vsel %vm1790_vm5, %v6681_v62, %v1808_v0  ;;  %v6685_v13 = vld [vmem:[#allocation23_spill] sm:$0xff]  ;;  %v6688_v62 = vrot.slane %v5364_v7, 9  ;;  %v5546_v0 = vmul.f32 %v5049_v59, %v2963_v12 }
 0x230   :  { %v5526_v32 = vsel %vm2113_vm7, %v2264_v33, %v2273_v14  ;;  %v2306_v38 = vrot.slane %v2300_v46, 4  ;;  %v2298_v22 = vpop.permute.xlu0 %2297  ;;  %v1826_v49 = vrot.slane %v6685_v13, 4  ;;  %v1809_v33 = vsel %vm1790_vm5, %v6683_v25, %v1807_v8 }
 0x231   :  { %v2305_v10 = vrot.slane %v2298_v22, 4  ;;  %2796 = vrot.lane.b32.xlu1 %v6686_v23, %s3707_s30  ;;  %v1825_v46 = vrot.slane %v6687_v57, 4  ;;  %v5555_v8 = vadd.f32 %v1810_v48, %v5429_v52  ;;  %v5566_v37 = vadd.f32 %v1809_v33, %v5441_v53 }
 0x232   :  { %2794 = vrot.lane.b32.xlu0 %v6688_v62, %s3707_s30  ;;  %v1828_v17 = vsel %vm1790_vm5, %v6685_v13, %v1826_v49  ;;  %v5582_v13 = vmul.f32 %v5080_v5, %v2963_v12  ;;  %v6694_v49 = vld [vmem:[#allocation27_spill] sm:$0xff] }
 0x233   :  { %v2309_v23 = vsel %vm2111_vm6, %v2305_v10, %v2306_v38  ;;  %v2304_v14 = vpop.permute.xlu1 %2303  ;;  %v6690_v38 = vld [vmem:[#allocation25_spill] sm:$0xff]  ;;  %v1827_v10 = vsel %vm1790_vm5, %v6687_v57, %v1825_v46  ;;  %v1862_v33 = vrot.slane %v6694_v49, 4  ;;  %v3001_v57 = vstv %s5521_s15 }
 0x234   :  { %v5558_v25 = vsel %vm2113_vm7, %v2298_v22, %v2309_v23  ;;  %v2308_v7 = vrot.slane %v2304_v14, 4  ;;  %v2302_v62 = vpop.permute.xlu0 %2301  ;;  %v1844_v52 = vrot.slane %v6690_v38, 4  ;;  %v6691_v22 = vrot.slane %v5389_v58, 9  ;;  %v6692_v23 = vld [vmem:[#allocation26_spill] sm:$0xff] }
 0x235   :  { %v2307_v48 = vrot.slane %v2302_v62, 4  ;;  %v1843_v14 = vrot.slane %v6692_v23, 4  ;;  %v5591_v46 = vadd.f32 %v1828_v17, %v5462_v43  ;;  %v5598_v45 = vadd.f32 %v1827_v10, %v5472_v20 }
 0x236   :  { %2830 = vrot.lane.b32.xlu1 %v6691_v22, %s3707_s30  ;;  %2828 = vrot.lane.b32.xlu0 %v6693_v18, %s3707_s30  ;;  %v5587_v22 = vmul.f32 %v5290_v15, %v2963_v12  ;;  %v6697_v43 = vrot.slane %v5417_v26, 9  ;;  %v5613_v17 = vmul.f32 %v5049_v59, %v3001_v57  ;;  %v1864_v26 = vsel %vm1790_vm5, %v6694_v49, %v1862_v33 }
 0x237   :  { %v2311_v4 = vsel %vm2111_vm6, %v2307_v48, %v2308_v7  ;;  %v2338_v58 = vpop.permute.xlu1 %2337  ;;  %v1846_v7 = vsel %vm1790_vm5, %v6690_v38, %v1844_v52  ;;  %v6696_v48 = vld [vmem:[#allocation28_spill] sm:$0xff]  ;;  %v5616_v38 = vmul.f32 %v5266_v29, %v3001_v57  ;;  %v6699_v52 = vld [vmem:[#allocation29_spill] sm:$0xff] }
 0x238   :  { %v5594_v35 = vsel %vm2113_vm7, %v2302_v62, %v2311_v4  ;;  %v2344_v18 = vrot.slane %v2338_v58, 4  ;;  %v2336_v53 = vpop.permute.xlu0 %2335  ;;  %v1861_v12 = vrot.slane %v6696_v48, 4  ;;  %v1845_v4 = vsel %vm1790_vm5, %v6692_v23, %v1843_v14 }
 0x239   :  { %6695 = vst [vmem:[#allocation60_spill] sm:$0xff] %v5594_v35  ;;  %v2343_v54 = vrot.slane %v2336_v53, 4  ;;  %v6698_v62 = vrot.slane %v5426_v41, 9  ;;  %v1884_v10 = vrot.slane %v6699_v52, 4  ;;  %v5626_v41 = vadd.f32 %v1846_v7, %v5479_v28 }
 0x23a   :  { %2834 = vrot.lane.b32.xlu1 %v6697_v43, %s3707_s30  ;;  %v5633_v49 = vadd.f32 %v1845_v4, %v5482_v9  ;;  %v5641_v28 = vmul.f32 %v5080_v5, %v3001_v57  ;;  %v6702_v7 = vrot.slane %v5438_v1, 9  ;;  %v6706_v9 = vld [vmem:[#allocation32_spill] sm:$0xff] }
 0x23b   :  { %2832 = vrot.lane.b32.xlu0 %v6698_v62, %s3707_s30  ;;  %v2347_v58 = vsel %vm2111_vm6, %v2343_v54, %v2344_v18  ;;  %v2342_v23 = vpop.permute.xlu1 %2341  ;;  %v1863_v54 = vsel %vm1790_vm5, %v6696_v48, %v1861_v12  ;;  %v6701_v18 = vrot.slane %v5435_v44, 9  ;;  %v5652_v48 = vmul.f32 %v5290_v15, %v3001_v57  ;;  %v6703_v12 = vld [vmem:[#allocation30_spill] sm:$0xff] }
 0x23c   :  { %v5629_v43 = vsel %vm2113_vm7, %v2336_v53, %v2347_v58  ;;  %v2346_v62 = vrot.slane %v2342_v23, 4  ;;  %v2340_v20 = vpop.permute.xlu0 %2339  ;;  %v5644_v53 = vadd.f32 %v1864_v26, %v5502_v56  ;;  %v1886_v44 = vsel %vm1790_vm5, %v6699_v52, %v1884_v10  ;;  %v6705_v52 = vld [vmem:[#allocation31_spill] sm:$0xff] }
 0x23d   :  { %6700 = vst [vmem:[#allocation61_spill] sm:$0xff] %v5629_v43  ;;  %v2345_v33 = vrot.slane %v2340_v20, 4  ;;  %v1883_v58 = vrot.slane %v6703_v12, 4  ;;  %v5659_v26 = vmul.f32 %v5049_v59, %v2925_v50  ;;  %v5662_v1 = vadd.f32 %v1863_v54, %v5505_v55  ;;  %v6708_v43 = vld [vmem:[#allocation33_spill] sm:$0xff] }
 0x23e   :  { %2868 = vrot.lane.b32.xlu1 %v6701_v18, %s3707_s30  ;;  %v1906_v18 = vrot.slane %v4951_v34, 4  ;;  %v1905_v10 = vrot.slane %v6705_v52, 4  ;;  %v1928_v14 = vrot.slane %v6706_v9, 4  ;;  %v5675_v54 = vadd.f32 %v1886_v44, %v5537_v2 }
 0x23f   :  { %2866 = vrot.lane.b32.xlu0 %v6702_v7, %s3707_s30  ;;  %v2349_v23 = vsel %vm2111_vm6, %v2345_v33, %v2346_v62  ;;  %v2376_v56 = vpop.permute.xlu1 %2375  ;;  %v6707_v33 = vrot.slane %v5459_v31, 9  ;;  %v5687_v31 = vsel %vm1790_vm5, %v6703_v12, %v1883_v58  ;;  %v3039_v44 = vstv %s5623_s17 }
 0x240   :  { %v5666_v7 = vsel %vm2113_vm7, %v2340_v20, %v2349_v23  ;;  %v2382_v57 = vrot.slane %v2376_v56, 4  ;;  %v2374_v4 = vpop.permute.xlu0 %2373  ;;  %v1927_v20 = vrot.slane %v6708_v43, 4  ;;  %v6709_v23 = vrot.slane %v5468_v16, 9  ;;  %6710 = vst [vmem:[#allocation63_spill] sm:$0xff] %v5687_v31 }
 0x241   :  { %6704 = vst [vmem:[#allocation62_spill] sm:$0xff] %v5666_v7  ;;  %v2381_v62 = vrot.slane %v2374_v4, 4  ;;  %v5683_v7 = vmul.f32 %v5266_v29, %v2925_v50  ;;  %v1908_v35 = vsel %vm1790_vm5, %v4951_v34, %v1906_v18  ;;  %v1907_v12 = vsel %vm1790_vm5, %v6705_v52, %v1905_v10  ;;  %v6712_v18 = vld [vmem:[#allocation34_spill] sm:$0xff] }
 0x242   :  { %2872 = vrot.lane.b32.xlu1 %v6707_v33, %s3707_s30  ;;  %v1930_v58 = vsel %vm1790_vm5, %v6706_v9, %v1928_v14  ;;  %v5708_v34 = vmul.f32 %v5290_v15, %v2925_v50  ;;  %v6714_v52 = vrot.slane %v5499_v60, 9  ;;  %v5718_v14 = vmul.f32 %v5049_v59, %v3039_v44 }
 0x243   :  { %2870 = vrot.lane.b32.xlu0 %v6709_v23, %s3707_s30  ;;  %v2385_v33 = vsel %vm2111_vm6, %v2381_v62, %v2382_v57  ;;  %v2380_v55 = vpop.permute.xlu1 %2379  ;;  %v6711_v62 = vrot.slane %v5491_v42, 9  ;;  %v5723_v42 = vadd.f32 %v1908_v35, %v5555_v8  ;;  %v5728_v10 = vmul.f32 %v5266_v29, %v3039_v44 }
 0x244   :  { %v5695_v16 = vsel %vm2113_vm7, %v2374_v4, %v2385_v33  ;;  %v2384_v23 = vrot.slane %v2380_v55, 4  ;;  %v2378_v56 = vpop.permute.xlu0 %2377  ;;  %v1929_v4 = vsel %vm1790_vm5, %v6708_v43, %v1927_v20  ;;  %v1950_v55 = vrot.slane %v6712_v18, 4  ;;  %v6713_v33 = vld [vmem:[#allocation35_spill] sm:$0xff] }
 0x245   :  { %v2383_v57 = vrot.slane %v2378_v56, 4  ;;  %v1949_v2 = vrot.slane %v6713_v33, 4  ;;  %v5731_v20 = vadd.f32 %v1907_v12, %v5566_v37  ;;  %v5738_v8 = vadd.f32 %v1930_v58, %v5591_v46 }
 0x246   :  { %2906 = vrot.lane.b32.xlu1 %v6711_v62, %s3707_s30  ;;  %v5741_v35 = vadd.f32 %v1929_v4, %v5598_v45  ;;  %v6716_v46 = vrot.slane %v5518_v24, 9  ;;  %v5756_v58 = vmul.f32 %v5080_v5, %v3039_v44  ;;  %v2109_v4 = vrot.slane %v5178_v51, 4 }
 0x247   :  { %2904 = vrot.lane.b32.xlu0 %v6714_v52, %s3707_s30  ;;  %v2387_v50 = vsel %vm2111_vm6, %v2383_v57, %v2384_v23  ;;  %v2414_v9 = vpop.permute.xlu1 %2413  ;;  %v6715_v57 = vrot.slane %v5515_v3, 9  ;;  %v1951_v12 = vsel %vm1790_vm5, %v6713_v33, %v1949_v2  ;;  %v2110_v3 = vrot.slane %v5175_v40, 4  ;;  %v6717_v2 = vld [vmem:[#allocation38_spill] sm:$0xff] }
 0x248   :  { %v5734_v60 = vsel %vm2113_vm7, %v2378_v56, %v2387_v50  ;;  %v2420_v59 = vrot.slane %v2414_v9, 4  ;;  %v2412_v62 = vpop.permute.xlu0 %2411  ;;  %v1952_v56 = vsel %vm1790_vm5, %v6712_v18, %v1950_v55  ;;  %v1994_v55 = vrot.slane %v6717_v2, 4 }
 0x249   :  { %v2419_v23 = vrot.slane %v2412_v62, 4  ;;  %v5767_v5 = vmul.f32 %v5290_v15, %v3039_v44  ;;  %v5770_v40 = vadd.f32 %v1952_v56, %v5626_v41  ;;  %v6720_v18 = vrot.slane %v5546_v0, 10 }
 0x24a   :  { %2910 = vrot.lane.b32.xlu1 %v6715_v57, %s3707_s30  ;;  %v6723_v44 = vrot.slane %v5561_v61, 10  ;;  %v5786_v56 = vstv %s5720_s18  ;;  %v2139_v52 = vrot.slane %v5204_v19, 4  ;;  %v1996_v43 = vsel %vm1790_vm5, %v6717_v2, %v1994_v55  ;;  %v5807_v2 = vld [vmem:[%s6245_s0 + $0x8] sm:$0x7] }
 0x24b   :  { %2908 = vrot.lane.b32.xlu0 %v6716_v46, %s3707_s30  ;;  %v2423_v50 = vsel %vm2111_vm6, %v2419_v23, %v2420_v59  ;;  %v2418_v9 = vpop.permute.xlu1 %2417  ;;  %v5773_v46 = vadd.f32 %v1951_v12, %v5633_v49  ;;  %v6719_v59 = vld [vmem:[#allocation36_spill] sm:$0xff]  ;;  %v2115_v49 = vsel %vm2111_vm6, %v2109_v4, %v2110_v3  ;;  %v2140_v12 = vrot.slane %v5197_v30, 4 }
 0x24c   :  { %v5764_v24 = vsel %vm2113_vm7, %v2412_v62, %v2423_v50  ;;  %v2422_v33 = vrot.slane %v2418_v9, 4  ;;  %v2416_v57 = vpop.permute.xlu0 %2415  ;;  %v1972_v23 = vrot.slane %v6719_v59, 4  ;;  %v6721_v62 = vld [vmem:[#allocation37_spill] sm:$0xff]  ;;  %v6724_v4 = vld [vmem:[#allocation40_spill] sm:$0xff]  ;;  %v5811_v55 = vmul.f32 %v5807_v2, %v5786_v56 }
 0x24d   :  { %6718 = vst [vmem:[#allocation64_spill] sm:$0xff] %v5764_v24  ;;  %v2421_v45 = vrot.slane %v2416_v57, 4  ;;  %v1971_v50 = vrot.slane %v6721_v62, 4  ;;  %v6722_v9 = vld [vmem:[#allocation41_spill] sm:$0xff]  ;;  %v2016_v30 = vrot.slane %v6724_v4, 4 }
 0x24e   :  { %2982 = vrot.lane.b32.xlu1 %v6720_v18, %s3707_s30  ;;  %v2015_v37 = vrot.slane %v6722_v9, 4  ;;  %v1974_v3 = vsel %vm1790_vm5, %v6719_v59, %v1972_v23  ;;  %v2142_v59 = vrot.slane %v5217_v21, 4  ;;  %v6726_v23 = vrot.slane %v5587_v22, 10 }
 0x24f   :  { %2980 = vrot.lane.b32.xlu0 %v6723_v44, %s3707_s30  ;;  %v2425_v0 = vsel %vm2111_vm6, %v2421_v45, %v2422_v33  ;;  %v2452_v18 = vpop.permute.xlu1 %2451  ;;  %v6725_v45 = vrot.slane %v5582_v13, 10  ;;  %v1973_v33 = vsel %vm1790_vm5, %v6721_v62, %v1971_v50  ;;  %v2141_v13 = vrot.slane %v5227_v11, 4 }
 0x250   :  { %v5795_v24 = vsel %vm2113_vm7, %v2416_v57, %v2425_v0  ;;  %v2458_v61 = vrot.slane %v2452_v18, 4  ;;  %v2450_v44 = vpop.permute.xlu0 %2449  ;;  %v2116_v57 = vsel %vm2113_vm7, %v5178_v51, %v2115_v49  ;;  %v2000_v0 = vadd.f32 %v1996_v43, %v5675_v54 }
 0x251   :  { %v2457_v31 = vrot.slane %v2450_v44, 4  ;;  %v2017_v18 = vsel %vm1790_vm5, %v6722_v9, %v2015_v37  ;;  %v5828_v51 = vadd.f32 %v1974_v3, %v5644_v53  ;;  %v5835_v22 = vmul.f32 %v5266_v29, %v5786_v56  ;;  %v6728_v9 = vld [vmem:[#allocation43_spill] sm:$0xff] }
 0x252   :  { %2986 = vrot.lane.b32.xlu1 %v6725_v45, %s3707_s30  ;;  %v2143_v45 = vsel %vm2111_vm6, %v2139_v52, %v2140_v12  ;;  %v5838_v54 = vadd.f32 %v1973_v33, %v5662_v1  ;;  %v2018_v43 = vsel %vm1790_vm5, %v6724_v4, %v2016_v30  ;;  %v6727_v53 = vrot.slane %v5613_v17, 10 }
 0x253   :  { %2984 = vrot.lane.b32.xlu0 %v6726_v23, %s3707_s30  ;;  %v2461_v62 = vsel %vm2111_vm6, %v2457_v31, %v2458_v61  ;;  %v2456_v50 = vpop.permute.xlu1 %2455  ;;  %v2120_v31 = vadd.f32 %v2116_v57, %v2000_v0  ;;  %v2021_v37 = vadd.f32 %v2017_v18, %v5731_v20  ;;  %v2037_v12 = vrot.slane %v6728_v9, 4 }
 0x254   :  { %v5831_v21 = vsel %vm2113_vm7, %v2450_v44, %v2461_v62  ;;  %v2460_v49 = vrot.slane %v2456_v50, 4  ;;  %v2454_v41 = vpop.permute.xlu0 %2453  ;;  %v2144_v61 = vsel %vm2113_vm7, %v5204_v19, %v2143_v45  ;;  %v2145_v44 = vsel %vm2111_vm6, %v2141_v13, %v2142_v59  ;;  %v6730_v13 = vld [vmem:[#allocation42_spill] sm:$0xff] }
 0x255   :  { %v2459_v52 = vrot.slane %v2454_v41, 4  ;;  %v6729_v1 = vrot.slane %v5616_v38, 10  ;;  %v2170_v3 = vrot.slane %v5244_v47, 4  ;;  %v2169_v4 = vrot.slane %v5247_v27, 4 }
 0x256   :  { %3020 = vrot.lane.b32.xlu1 %v6727_v53, %s3707_s30  ;;  %v2278_v17 = vadd.f32 %v5526_v32, %v2120_v31  ;;  %v3642_v19 = vrot.slane %v5811_v55, 10  ;;  %v3641_v59 = vrot.slane %v5835_v22, 10  ;;  %v2038_v38 = vrot.slane %v6730_v13, 4  ;;  %v6733_v53 = vld [vmem:[#allocation39_spill] sm:$0xff] }
 0x257   :  { %3018 = vrot.lane.b32.xlu0 %v6729_v1, %s3707_s30  ;;  %v2463_v30 = vsel %vm2111_vm6, %v2459_v52, %v2460_v49  ;;  %v2490_v20 = vpop.permute.xlu1 %2489  ;;  %v2149_v0 = vadd.f32 %v2144_v61, %v2021_v37  ;;  %v6731_v32 = vrot.slane %v5641_v28, 10  ;;  %v2022_v45 = vadd.f32 %v2018_v43, %v5723_v42 }
 0x258   :  { %v2464_v33 = vsel %vm2113_vm7, %v2454_v41, %v2463_v30  ;;  %v2496_v57 = vrot.slane %v2490_v20, 4  ;;  %v2488_v23 = vpop.permute.xlu0 %2487  ;;  %v2146_v41 = vsel %vm2113_vm7, %v5227_v11, %v2145_v44  ;;  %v2172_v62 = vrot.slane %v5273_v63, 4 }
 0x259   :  { %v5861_v18 = vadd.f32 %v2464_v33, %v2278_v17  ;;  %v2495_v47 = vrot.slane %v2488_v23, 4  ;;  %v2171_v50 = vrot.slane %v5279_v6, 4  ;;  %v6732_v49 = vrot.slane %v5652_v48, 10  ;;  %v5884_v48 = vld [vmem:[%s6245_s0 + $0x14] sm:$0x7]  ;;  %v6735_v17 = vld [vmem:[#allocation45_spill] sm:$0xff] }
 0x25a   :  { %3024 = vrot.lane.b32.xlu1 %v6731_v32, %s3707_s30  ;;  %v2039_v31 = vsel %vm1790_vm5, %v6728_v9, %v2037_v12  ;;  %v2173_v52 = vsel %vm2111_vm6, %v2169_v4, %v2170_v3  ;;  %v2315_v28 = vadd.f32 %v5558_v25, %v2149_v0  ;;  %v1993_v11 = vrot.slane %v6733_v53, 4  ;;  %v6738_v0 = vld [vmem:[#allocation60_spill] sm:$0xff] }
 0x25b   :  { %3022 = vrot.lane.b32.xlu0 %v6732_v49, %s3707_s30  ;;  %v2499_v42 = vsel %vm2111_vm6, %v2495_v47, %v2496_v57  ;;  %v2494_v43 = vpop.permute.xlu1 %2493  ;;  %v5888_v9 = vmul.f32 %v5884_v48, %v5786_v56  ;;  %v2040_v25 = vsel %vm1790_vm5, %v6730_v13, %v2038_v38  ;;  %v2150_v12 = vadd.f32 %v2146_v41, %v2022_v45  ;;  %v6737_v13 = vld [vmem:[#allocation50_spill] sm:$0xff] }
 0x25c   :  { %v2500_v63 = vsel %vm2113_vm7, %v2488_v23, %v2499_v42  ;;  %v2498_v37 = vrot.slane %v2494_v43, 4  ;;  %v2492_v61 = vpop.permute.xlu0 %2491  ;;  %v6734_v3 = vrot.slane %v5659_v26, 9  ;;  %v2043_v4 = vadd.f32 %v2039_v31, %v5741_v35  ;;  %v6741_v43 = vld [vmem:[#allocation51_spill] sm:$0xff] }
 0x25d   :  { %v5894_v44 = vadd.f32 %v2500_v63, %v2315_v28  ;;  %v2497_v1 = vrot.slane %v2492_v61, 4  ;;  %v2059_v30 = vrot.slane %v6735_v17, 4  ;;  %v2174_v20 = vsel %vm2113_vm7, %v5247_v27, %v2173_v52 }
 0x25e   :  { %2944 = vrot.lane.b32.xlu1 %v6734_v3, %s3707_s30  ;;  %v2175_v33 = vsel %vm2111_vm6, %v2171_v50, %v2172_v62  ;;  %v6736_v57 = vrot.slane %v5683_v7, 9  ;;  %v2200_v23 = vrot.slane %v5304_v39, 4  ;;  %v2199_v38 = vrot.slane %v6737_v13, 4  ;;  %v6739_v39 = vld [vmem:[#allocation44_spill] sm:$0xff] }
 0x25f   :  { %v2316_v26 = vadd.f32 %v6738_v0, %v2150_v12  ;;  %v2501_v47 = vsel %vm2111_vm6, %v2497_v1, %v2498_v37  ;;  %v2528_v35 = vpop.permute.xlu1 %2527  ;;  %v5913_v32 = vsel %vm1790_vm5, %v6733_v53, %v1993_v11  ;;  %v5918_v7 = vmul.f32 %v5290_v15, %v5786_v56  ;;  %v6742_v56 = vld [vmem:[#allocation52_spill] sm:$0xff] }
 0x260   :  { %2942 = vrot.lane.b32.xlu0 %v6736_v57, %s3707_s30  ;;  %v2502_v27 = vsel %vm2113_vm7, %v2492_v61, %v2501_v47  ;;  %v2534_v45 = vrot.slane %v2528_v35, 4  ;;  %v2526_v41 = vpop.permute.xlu0 %2525  ;;  %v2060_v62 = vrot.slane %v6739_v39, 4  ;;  %v2179_v50 = vadd.f32 %v2174_v20, %v2043_v4  ;;  %v6744_v61 = vld [vmem:[#allocation61_spill] sm:$0xff] }
 0x261   :  { %v5921_v49 = vadd.f32 %v2502_v27, %v2316_v26  ;;  %v2533_v31 = vrot.slane %v2526_v41, 4  ;;  %v6740_v52 = vrot.slane %v5698_v36, 9  ;;  %v2044_v28 = vadd.f32 %v2040_v25, %v5738_v8  ;;  %v6748_v27 = vld [vmem:[#allocation53_spill] sm:$0xff] }
 0x262   :  { %v2176_v42 = vsel %vm2113_vm7, %v5279_v6, %v2175_v33  ;;  %v2202_v53 = vrot.slane %v6741_v43, 4  ;;  %v2201_v11 = vrot.slane %v6742_v56, 4  ;;  %v6743_v63 = vrot.slane %v5708_v34, 9 }
 0x263   :  { %2948 = vrot.lane.b32.xlu1 %v6740_v52, %s3707_s30  ;;  %v2061_v37 = vsel %vm1790_vm5, %v6735_v17, %v2059_v30  ;;  %v2203_v36 = vsel %vm2111_vm6, %v2199_v38, %v2200_v23  ;;  %v2353_v12 = vadd.f32 %v6744_v61, %v2179_v50  ;;  %v2537_v8 = vsel %vm2111_vm6, %v2533_v31, %v2534_v45  ;;  %v2532_v25 = vpop.permute.xlu1 %2531  ;;  %v6746_v38 = vld [vmem:[#allocation47_spill] sm:$0xff]  ;;  %v6753_v61 = vld [vmem:[#allocation56_spill] sm:$0xff] }
 0x264   :  { %2946 = vrot.lane.b32.xlu0 %v6743_v63, %s3707_s30  ;;  %v2538_v6 = vsel %vm2113_vm7, %v2526_v41, %v2537_v8  ;;  %v2536_v1 = vrot.slane %v2532_v25, 4  ;;  %v2530_v3 = vpop.permute.xlu0 %2529  ;;  %v3644_v4 = vrot.slane %v5888_v9, 10  ;;  %v5942_v20 = vstv %s5890_s21  ;;  %v6749_v41 = vld [vmem:[#allocation54_spill] sm:$0xff] }
 0x265   :  { %v2062_v34 = vsel %vm1790_vm5, %v6739_v39, %v2060_v62  ;;  %v2180_v33 = vadd.f32 %v2176_v42, %v2044_v28  ;;  %v5946_v17 = vadd.f32 %v2538_v6, %v2353_v12  ;;  %v2535_v30 = vrot.slane %v2530_v3, 4  ;;  %v6750_v62 = vld [vmem:[#allocation62_spill] sm:$0xff] }
 0x266   :  { %v6745_v57 = vrot.slane %v5718_v14, 10  ;;  %v2065_v23 = vadd.f32 %v2061_v37, %v5773_v46  ;;  %v2081_v0 = vrot.slane %v6746_v38, 4  ;;  %v2204_v26 = vsel %vm2113_vm7, %v6737_v13, %v2203_v36  ;;  %v6752_v36 = vld [vmem:[#allocation55_spill] sm:$0xff] }
 0x267   :  { %v2205_v47 = vsel %vm2111_vm6, %v2201_v11, %v2202_v53  ;;  %v6747_v35 = vrot.slane %v5728_v10, 10  ;;  %v2230_v45 = vrot.slane %v6748_v27, 4  ;;  %v2229_v39 = vrot.slane %v6749_v41, 4  ;;  %v2566_v46 = vpop.permute.xlu1 %2565 }
 0x268   :  { %3058 = vrot.lane.b32.xlu1 %v6745_v57, %s3707_s30  ;;  %v2354_v14 = vadd.f32 %v6750_v62, %v2180_v33  ;;  %v2539_v50 = vsel %vm2111_vm6, %v2535_v30, %v2536_v1  ;;  %v2572_v52 = vrot.slane %v2566_v46, 4  ;;  %v2564_v28 = vpop.permute.xlu0 %2563  ;;  %v3643_v13 = vrot.slane %v5918_v7, 10  ;;  %v6755_v1 = vld [vmem:[#allocation46_spill] sm:$0xff] }
 0x269   :  { %3056 = vrot.lane.b32.xlu0 %v6747_v35, %s3707_s30  ;;  %v2540_v31 = vsel %vm2113_vm7, %v2530_v3, %v2539_v50  ;;  %v5967_v42 = vmul.f32 %v5807_v2, %v5942_v20  ;;  %v2209_v10 = vadd.f32 %v2204_v26, %v2065_v23  ;;  %v2571_v53 = vrot.slane %v2564_v28, 4  ;;  %v6756_v3 = vld [vmem:[#allocation48_spill] sm:$0xff]  ;;  %v6759_v62 = vld [vmem:[#allocation58_spill] sm:$0xff] }
 0x26a   :  { %v5969_v43 = vadd.f32 %v2540_v31, %v2354_v14  ;;  %v6751_v11 = vrot.slane %v5756_v58, 10  ;;  %v5976_v63 = vmul.f32 %v5266_v29, %v5942_v20  ;;  %v2066_v37 = vadd.f32 %v2062_v34, %v5770_v40 }
 0x26b   :  { %v2206_v7 = vsel %vm2113_vm7, %v6742_v56, %v2205_v47  ;;  %v2232_v2 = vrot.slane %v6752_v36, 4  ;;  %v2231_v12 = vrot.slane %v6753_v61, 4  ;;  %v6754_v8 = vrot.slane %v5767_v5, 10  ;;  %v2570_v6 = vpop.permute.xlu1 %2569  ;;  %v6757_v5 = vld [vmem:[#allocation49_spill] sm:$0xff] }
 0x26c   :  { %3062 = vrot.lane.b32.xlu1 %v6751_v11, %s3707_s30  ;;  %v2083_v58 = vsel %vm1790_vm5, %v6746_v38, %v2081_v0  ;;  %v2233_v25 = vsel %vm2111_vm6, %v2229_v39, %v2230_v45  ;;  %v2391_v29 = vadd.f32 %v5695_v16, %v2209_v10  ;;  %v2575_v40 = vsel %vm2111_vm6, %v2571_v53, %v2572_v52  ;;  %v2568_v57 = vpop.permute.xlu0 %2567  ;;  %v6758_v45 = vld [vmem:[#allocation57_spill] sm:$0xff]  ;;  %v6761_v10 = vld [vmem:[#allocation63_spill] sm:$0xff] }
 0x26d   :  { %3060 = vrot.lane.b32.xlu0 %v6754_v8, %s3707_s30  ;;  %v2082_v56 = vrot.slane %v6755_v1, 4  ;;  %v2108_v34 = vrot.slane %v6756_v3, 4  ;;  %v2576_v33 = vsel %vm2113_vm7, %v2564_v28, %v2575_v40  ;;  %v2574_v30 = vrot.slane %v2570_v6, 4 }
 0x26e   :  { %v2107_v23 = vrot.slane %v6757_v5, 4  ;;  %v2210_v26 = vadd.f32 %v2206_v7, %v2066_v37  ;;  %v5995_v47 = vadd.f32 %v2576_v33, %v2391_v29  ;;  %v2573_v38 = vrot.slane %v2568_v57, 4 }
 0x26f   :  { %v2087_v16 = vadd.f32 %v2083_v58, %v5838_v54  ;;  %v2234_v0 = vsel %vm2113_vm7, %v6749_v41, %v2233_v25  ;;  %v2235_v35 = vsel %vm2111_vm6, %v2231_v12, %v2232_v2  ;;  %v3647_v27 = vrot.slane %v5967_v42, 10  ;;  %v2604_v54 = vpop.permute.xlu1 %2603  ;;  %v6762_v2 = vld [vmem:[#allocation64_spill] sm:$0xff] }
 0x270   :  { %3096 = vrot.lane.b32.xlu1 %v3642_v19, %s3707_s30  ;;  %v2268_v39 = vrot.slane %v6758_v45, 4  ;;  %v2267_v14 = vrot.slane %v6759_v62, 4  ;;  %v2392_v55 = vadd.f32 %v5734_v60, %v2210_v26  ;;  %v2577_v19 = vsel %vm2111_vm6, %v2573_v38, %v2574_v30  ;;  %v2602_v31 = vpop.permute.xlu0 %2601  ;;  %v6760_v60 = vld [vmem:[#allocation59_spill] sm:$0xff] }
 0x271   :  { %3094 = vrot.lane.b32.xlu0 %v3641_v59, %s3707_s30  ;;  %v2084_v41 = vsel %vm1790_vm5, %v6755_v1, %v2082_v56  ;;  %v2578_v50 = vsel %vm2113_vm7, %v2568_v57, %v2577_v19  ;;  %v2610_v46 = vrot.slane %v2604_v54, 4  ;;  %v3119_v22 = vmul.f32 %v5884_v48, %v5942_v20 }
 0x272   :  { %v2112_v59 = vsel %vm2111_vm6, %v2107_v23, %v2108_v34  ;;  %v2239_v52 = vadd.f32 %v2234_v0, %v2087_v16  ;;  %v6018_v28 = vadd.f32 %v2578_v50, %v2392_v55  ;;  %v2609_v42 = vrot.slane %v2602_v31, 4 }
 0x273   :  { %v1889_v53 = vadd.f32 %v6761_v10, %v6760_v60  ;;  %v2236_v11 = vsel %vm2113_vm7, %v6753_v61, %v2235_v35  ;;  %v3646_v48 = vrot.slane %v5976_v63, 10  ;;  %v3118_v37 = vmul.f32 %v5290_v15, %v5942_v20  ;;  %v2608_v12 = vpop.permute.xlu1 %2607 }
 0x274   :  { %3100 = vrot.lane.b32.xlu1 %v3644_v4, %s3707_s30  ;;  %v2088_v7 = vadd.f32 %v2084_v41, %v5828_v51  ;;  %v2271_v36 = vsel %vm2111_vm6, %v2267_v14, %v2268_v39  ;;  %v2429_v9 = vadd.f32 %v6762_v2, %v2239_v52  ;;  %v2613_v4 = vsel %vm2111_vm6, %v2609_v42, %v2610_v46  ;;  %v2606_v58 = vpop.permute.xlu0 %2605 }
 0x275   :  { %3098 = vrot.lane.b32.xlu0 %v3643_v13, %s3707_s30  ;;  %v1999_v8 = vadd.f32 %v5913_v32, %v1889_v53  ;;  %v2114_v61 = vsel %vm2113_vm7, %v6757_v5, %v2112_v59  ;;  %v2614_v13 = vsel %vm2113_vm7, %v2602_v31, %v2613_v4  ;;  %v2612_v63 = vrot.slane %v2608_v12, 4 }
 0x276   :  { %v2240_v25 = vadd.f32 %v2236_v11, %v2088_v7  ;;  %v6039_v15 = vadd.f32 %v2614_v13, %v2429_v9  ;;  %v2611_v51 = vrot.slane %v2606_v58, 4  ;;  %v3649_v20 = vrot.slane %v3119_v22, 10 }
 0x277   :  { %v2272_v29 = vsel %vm2113_vm7, %v6759_v62, %v2271_v36  ;;  %v3648_v32 = vrot.slane %v3118_v37, 10  ;;  %v2119_v40 = vadd.f32 %v2114_v61, %v1999_v8  ;;  %v2634_v56 = vpop.permute.xlu1 %2633 }
 0x278   :  { %3134 = vrot.lane.b32.xlu1 %v3647_v27, %s3707_s30  ;;  %v2430_v6 = vadd.f32 %v5795_v24, %v2240_v25  ;;  %v2615_v1 = vsel %vm2111_vm6, %v2611_v51, %v2612_v63  ;;  %v2640_v34 = vrot.slane %v2634_v56, 4  ;;  %v2632_v33 = vpop.permute.xlu0 %2631 }
 0x279   :  { %3132 = vrot.lane.b32.xlu0 %v3646_v48, %s3707_s30  ;;  %v2616_v3 = vsel %vm2113_vm7, %v2606_v58, %v2615_v1  ;;  %v2277_v30 = vadd.f32 %v2272_v29, %v2119_v40  ;;  %v2639_v5 = vrot.slane %v2632_v33, 4 }
 0x27a   :  { %v6048_v57 = vadd.f32 %v2616_v3, %v2430_v6 }
 0x27b   :  { %v2467_v23 = vadd.f32 %v5831_v21, %v2277_v30  ;;  %v2643_v24 = vsel %vm2111_vm6, %v2639_v5, %v2640_v34  ;;  %v2638_v26 = vpop.permute.xlu1 %2637 }
 0x27c   :  { %3138 = vrot.lane.b32.xlu1 %v3649_v20, %s3707_s30  ;;  %v2645_v38 = vsel %vm2644_vm8, %v2632_v33, %v2643_v24  ;;  %v2642_v16 = vrot.slane %v2638_v26, 4  ;;  %v2636_v0 = vpop.permute.xlu0 %2635 }
 0x27d   :  { %3136 = vrot.lane.b32.xlu0 %v3648_v32, %s3707_s30  ;;  %v6055_v35 = vadd.f32 %v2645_v38, %v2467_v23  ;;  %v2641_v27 = vrot.slane %v2636_v0, 4 }
 0x27f   :  { %v2646_v45 = vsel %vm2111_vm6, %v2641_v27, %v2642_v16  ;;  %v2665_v39 = vpop.permute.xlu1 %2664 }
 0x280   :  { %v2647_v62 = vsel %vm2644_vm8, %v2636_v0, %v2646_v45  ;;  %v2671_v14 = vrot.slane %v2665_v39, 4  ;;  %v2663_v55 = vpop.permute.xlu0 %2662 }
 0x281   :  { %v6060_v19 = vadd.f32 %v2647_v62, %v5861_v18  ;;  %v2670_v21 = vrot.slane %v2663_v55, 4 }
 0x283   :  { %v2674_v54 = vsel %vm2111_vm6, %v2670_v21, %v2671_v14  ;;  %v2669_v41 = vpop.permute.xlu1 %2668 }
 0x284   :  { %v2675_v50 = vsel %vm2644_vm8, %v2663_v55, %v2674_v54  ;;  %v2673_v46 = vrot.slane %v2669_v41, 4  ;;  %v2667_v31 = vpop.permute.xlu0 %2666 }
 0x285   :  { %v6065_v22 = vadd.f32 %v2675_v50, %v5894_v44  ;;  %v2672_v59 = vrot.slane %v2667_v31, 4 }
 0x287   :  { %v2676_v52 = vsel %vm2111_vm6, %v2672_v59, %v2673_v46  ;;  %v2695_v42 = vpop.permute.xlu1 %2694 }
 0x288   :  { %v2677_v60 = vsel %vm2644_vm8, %v2667_v31, %v2676_v52  ;;  %v2701_v10 = vrot.slane %v2695_v42, 4  ;;  %v2693_v18 = vpop.permute.xlu0 %2692 }
 0x289   :  { %v6070_v53 = vadd.f32 %v2677_v60, %v5921_v49  ;;  %v2700_v11 = vrot.slane %v2693_v18, 4 }
 0x28b   :  { %v2704_v48 = vsel %vm2111_vm6, %v2700_v11, %v2701_v10  ;;  %v2699_v37 = vpop.permute.xlu1 %2698 }
 0x28c   :  { %v2705_v7 = vsel %vm2644_vm8, %v2693_v18, %v2704_v48  ;;  %v2703_v36 = vrot.slane %v2699_v37, 4  ;;  %v2697_v44 = vpop.permute.xlu0 %2696 }
 0x28d   :  { %v6075_v2 = vadd.f32 %v2705_v7, %v5946_v17  ;;  %v2702_v9 = vrot.slane %v2697_v44, 4 }
 0x28f   :  { %v2706_v4 = vsel %vm2111_vm6, %v2702_v9, %v2703_v36  ;;  %v2725_v12 = vpop.permute.xlu1 %2724 }
 0x290   :  { %v2707_v8 = vsel %vm2644_vm8, %v2697_v44, %v2706_v4  ;;  %v2731_v61 = vrot.slane %v2725_v12, 4  ;;  %v2723_v49 = vpop.permute.xlu0 %2722 }
 0x291   :  { %v6080_v13 = vadd.f32 %v2707_v8, %v5969_v43  ;;  %v2730_v63 = vrot.slane %v2723_v49, 4  ;;  %v3154_v8 = vlaneseq }
 0x293   :  { %v2734_v58 = vsel %vm2111_vm6, %v2730_v63, %v2731_v61  ;;  %v2729_v25 = vpop.permute.xlu1 %2728 }
 0x294   :  { %v2735_v51 = vsel %vm2644_vm8, %v2723_v49, %v2734_v58  ;;  %v2733_v20 = vrot.slane %v2729_v25, 4  ;;  %v2727_v17 = vpop.permute.xlu0 %2726 }
 0x295   :  { %v6085_v29 = vadd.f32 %v2735_v51, %v5995_v47  ;;  %v2732_v32 = vrot.slane %v2727_v17, 4 }
 0x297   :  { %v2736_v40 = vsel %vm2111_vm6, %v2732_v32, %v2733_v20  ;;  %v2755_v6 = vpop.permute.xlu1 %2754  ;;  %v3155_v32 = vshrl.u32 %v3154_v8, 7 }
 0x298   :  { %v2737_v1 = vsel %vm2644_vm8, %v2727_v17, %v2736_v40  ;;  %v2761_v56 = vrot.slane %v2755_v6, 4  ;;  %v2753_v43 = vpop.permute.xlu0 %2752 }
 0x299   :  { %v6090_v3 = vadd.f32 %v2737_v1, %v6018_v28  ;;  %v2760_v34 = vrot.slane %v2753_v43, 4 }
 0x29b   :  { %v2764_v33 = vsel %vm2111_vm6, %v2760_v34, %v2761_v56  ;;  %v2759_v30 = vpop.permute.xlu1 %2758 }
 0x29c   :  { %v2765_v5 = vsel %vm2644_vm8, %v2753_v43, %v2764_v33  ;;  %v2763_v23 = vrot.slane %v2759_v30, 4  ;;  %v2757_v47 = vpop.permute.xlu0 %2756 }
 0x29d   :  { %v6095_v24 = vadd.f32 %v2765_v5, %v6039_v15  ;;  %v2762_v26 = vrot.slane %v2757_v47, 4  ;;  %v6130_v5 = vsub.s32 0, %v3155_v32 }
 0x29f   :  { %v2766_v38 = vsel %vm2111_vm6, %v2762_v26, %v2763_v23  ;;  %v2793_v16 = vpop.permute.xlu1 %2792  ;;  %v6132_v23 = vsub.s32 4, %v3155_v32 }
 0x2a0   :  { %v2767_v0 = vsel %vm2644_vm8, %v2757_v47, %v2766_v38  ;;  %v2799_v27 = vrot.slane %v2793_v16, 4  ;;  %v2791_v28 = vpop.permute.xlu0 %2790 }
 0x2a1   :  { %v6100_v45 = vadd.f32 %v2767_v0, %v6048_v57  ;;  %v2798_v39 = vrot.slane %v2791_v28, 4 }
 0x2a3   :  { %v2802_v62 = vsel %vm2111_vm6, %v2798_v39, %v2799_v27  ;;  %v2797_v14 = vpop.permute.xlu1 %2796 }
 0x2a4   :  { %v2803_v55 = vsel %vm2644_vm8, %v2791_v28, %v2802_v62  ;;  %v2801_v21 = vrot.slane %v2797_v14, 4  ;;  %v2795_v15 = vpop.permute.xlu0 %2794 }
 0x2a5   :  { %v2808_v54 = vadd.f32 %v2803_v55, %v6055_v35  ;;  %v2800_v41 = vrot.slane %v2795_v15, 4 }
 0x2a7   :  { %v2804_v50 = vsel %vm2111_vm6, %v2800_v41, %v2801_v21 }
 0x2a8   :  { %v2831_v46 = vpop.permute.xlu1 %2830  ;;  %v2805_v31 = vsel %vm2644_vm8, %v2795_v15, %v2804_v50  ;;  %v2829_v59 = vpop.permute.xlu0 %2828 }
 0x2a9   :  { %v2809_v57 = vadd.f32 %v2805_v31, %v6060_v19  ;;  %v2837_v9 = vrot.slane %v2831_v46, 4  ;;  %v2836_v4 = vrot.slane %v2829_v59, 4 }
 0x2ab   :  { %v2840_v51 = vsel %vm2111_vm6, %v2836_v4, %v2837_v9 }
 0x2ac   :  { %v2835_v52 = vpop.permute.xlu1 %2834  ;;  %v2841_v1 = vsel %vm2644_vm8, %v2829_v59, %v2840_v51 }
 0x2ad   :  { %v2833_v42 = vpop.permute.xlu0 %2832  ;;  %v2839_v49 = vrot.slane %v2835_v52, 4  ;;  %v2846_v26 = vadd.f32 %v2841_v1, %v6065_v22 }
 0x2ae   :  { %v2838_v63 = vrot.slane %v2833_v42, 4 }
 0x2b0   :  { %v6108_v60 = vpop.permute.xlu1 %2868  ;;  %v2842_v56 = vsel %vm2111_vm6, %v2838_v63, %v2839_v49 }
 0x2b1   :  { %v6110_v10 = vpop.permute.xlu0 %2866  ;;  %v2843_v38 = vsel %vm2644_vm8, %v2833_v42, %v2842_v56  ;;  %v2875_v59 = vrot.slane %v6108_v60, 4 }
 0x2b2   :  { %v2847_v21 = vadd.f32 %v2843_v38, %v6070_v53  ;;  %v2874_v53 = vrot.slane %v6110_v10, 4 }
 0x2b4   :  { %v6112_v18 = vpop.permute.xlu1 %2872  ;;  %v2878_v63 = vsel %vm2111_vm6, %v2874_v53, %v2875_v59 }
 0x2b5   :  { %v6114_v11 = vpop.permute.xlu0 %2870  ;;  %v2877_v8 = vrot.slane %v6112_v18, 4  ;;  %v2879_v32 = vsel %vm2644_vm8, %v6110_v10, %v2878_v63 }
 0x2b8   :  { %v6116_v35 = vpop.permute.xlu1 %2906 }
 0x2b9   :  { %v6118_v48 = vpop.permute.xlu0 %2904  ;;  %v2913_v51 = vrot.slane %v6116_v35, 4 }
 0x2bc   :  { %v6120_v37 = vpop.permute.xlu1 %2910 }
 0x2bd   :  { %v6122_v7 = vpop.permute.xlu0 %2908  ;;  %v2915_v56 = vrot.slane %v6120_v37, 4 }
 0x2c0   :  { %v2983_v36 = vpop.permute.xlu1 %2982 }
 0x2c1   :  { %v2989_v19 = vrot.slane %v2983_v36, 4  ;;  %v2981_v44 = vpop.permute.xlu0 %2980 }
 0x2c2   :  { %v2988_v12 = vrot.slane %v2981_v44, 4 }
 0x2c4   :  { %v2987_v61 = vpop.permute.xlu1 %2986  ;;  %v2992_v58 = vsel %vm2111_vm6, %v2988_v12, %v2989_v19 }
 0x2c5   :  { %v2985_v25 = vpop.permute.xlu0 %2984  ;;  %v2991_v20 = vrot.slane %v2987_v61, 4  ;;  %v2993_v40 = vsel %vm2644_vm8, %v2981_v44, %v2992_v58  ;;  %v2876_v61 = vrot.slane %v6114_v11, 4 }
 0x2c6   :  { %v2990_v17 = vrot.slane %v2985_v25, 4  ;;  %v2998_v47 = vadd.f32 %v2993_v40, %v2808_v54 }
 0x2c7   :  { %v2880_v18 = vsel %vm2111_vm6, %v2876_v61, %v2877_v8 }
 0x2c8   :  { %v3021_v6 = vpop.permute.xlu1 %3020  ;;  %v2994_v33 = vsel %vm2111_vm6, %v2990_v17, %v2991_v20  ;;  %v3157_v15 = vrot.slane %v2998_v47, %v6130_v5  ;;  %v3161_v54 = vrot.slane %v2998_v47, %v6132_v23  ;;  %v2912_v20 = vrot.slane %v6118_v48, 4 }
 0x2c9   :  { %v3027_v43 = vrot.slane %v3021_v6, 4  ;;  %v3019_v34 = vpop.permute.xlu0 %3018  ;;  %v2995_v27 = vsel %vm2644_vm8, %v2985_v25, %v2994_v33  ;;  %v2881_v35 = vsel %vm2644_vm8, %v6114_v11, %v2880_v18 }
 0x2ca   :  { %v3026_v30 = vrot.slane %v3019_v34, 4  ;;  %v2999_v22 = vadd.f32 %v2995_v27, %v2809_v57  ;;  %v2916_v33 = vsel %vm2111_vm6, %v2912_v20, %v2913_v51  ;;  %v2885_v37 = vadd.f32 %v2881_v35, %v6080_v13 }
 0x2cc   :  { %v3030_v16 = vsel %vm2111_vm6, %v3026_v30, %v3027_v43  ;;  %v3025_v0 = vpop.permute.xlu1 %3024  ;;  %v3165_v44 = vrot.slane %v2999_v22, %v6130_v5  ;;  %v3169_v9 = vrot.slane %v2999_v22, %v6132_v23  ;;  %v2914_v43 = vrot.slane %v6122_v7, 4 }
 0x2cd   :  { %v3031_v28 = vsel %vm2644_vm8, %v3019_v34, %v3030_v16  ;;  %v3029_v39 = vrot.slane %v3025_v0, 4  ;;  %v3023_v62 = vpop.permute.xlu0 %3022  ;;  %v2884_v34 = vadd.f32 %v2879_v32, %v6075_v2  ;;  %v2917_v2 = vsel %vm2644_vm8, %v6118_v48, %v2916_v33 }
 0x2ce   :  { %v3036_v14 = vadd.f32 %v3031_v28, %v2846_v26  ;;  %v3028_v55 = vrot.slane %v3023_v62, 4  ;;  %v2918_v27 = vsel %vm2111_vm6, %v2914_v43, %v2915_v56 }
 0x2d0   :  { %v3179_v41 = vrot.slane %v3036_v14, %v6130_v5  ;;  %v3183_v50 = vrot.slane %v3036_v14, %v6132_v23  ;;  %v3032_v46 = vsel %vm2111_vm6, %v3028_v55, %v3029_v39  ;;  %v2945_v31 = vpop.permute.xlu1 %2944 }
 0x2d1   :  { %v3033_v52 = vsel %vm2644_vm8, %v3023_v62, %v3032_v46  ;;  %v2951_v11 = vrot.slane %v2945_v31, 4  ;;  %v2919_v46 = vsel %vm2644_vm8, %v6122_v7, %v2918_v27 }
 0x2d2   :  { %v6147_v42 = vpop.permute.xlu0 %2942  ;;  %v3263_v36 = vsel %vm3262_vm9, %v3157_v15, %v3179_v41  ;;  %v3264_v19 = vsel %vm3262_vm9, %v3161_v54, %v3183_v50  ;;  %v3037_v57 = vadd.f32 %v3033_v52, %v2847_v21  ;;  %v2922_v50 = vadd.f32 %v2917_v2, %v6085_v29 }
 0x2d3   :  { %v2950_v28 = vrot.slane %v6147_v42, 4  ;;  %v2923_v61 = vadd.f32 %v2919_v46, %v6090_v3 }
 0x2d4   :  { %v3187_v4 = vrot.slane %v3037_v57, %v6130_v5  ;;  %v3191_v12 = vrot.slane %v3037_v57, %v6132_v23 }
 0x2d5   :  { %v6156_v60 = vpop.permute.xlu1 %2948  ;;  %v2954_v31 = vsel %vm2111_vm6, %v2950_v28, %v2951_v11 }
 0x2d6   :  { %v6160_v49 = vpop.permute.xlu0 %2946  ;;  %v3265_v58 = vsel %vm3262_vm9, %v3165_v44, %v3187_v4  ;;  %v3266_v25 = vsel %vm3262_vm9, %v3169_v9, %v3191_v12 }
 0x2da   :  { %v3059_v17 = vpop.permute.xlu1 %3058 }
 0x2db   :  { %v3065_v40 = vrot.slane %v3059_v17, 4  ;;  %v3057_v6 = vpop.permute.xlu0 %3056  ;;  %v2955_v17 = vsel %vm2644_vm8, %v6147_v42, %v2954_v31 }
 0x2dc   :  { %v3064_v1 = vrot.slane %v3057_v6, 4  ;;  %v2960_v56 = vadd.f32 %v2955_v17, %v6095_v24 }
 0x2de   :  { %v3068_v30 = vsel %vm2111_vm6, %v3064_v1, %v3065_v40  ;;  %v3063_v47 = vpop.permute.xlu1 %3062 }
 0x2df   :  { %v3069_v10 = vsel %vm2644_vm8, %v3057_v6, %v3068_v30  ;;  %v3067_v26 = vrot.slane %v3063_v47, 4  ;;  %v3061_v38 = vpop.permute.xlu0 %3060 }
 0x2e0   :  { %v3074_v16 = vadd.f32 %v3069_v10, %v2884_v34  ;;  %v3066_v0 = vrot.slane %v3061_v38, 4 }
 0x2e2   :  { %v3201_v39 = vrot.slane %v3074_v16, %v6130_v5  ;;  %v3205_v62 = vrot.slane %v3074_v16, %v6132_v23  ;;  %v3070_v14 = vsel %vm2111_vm6, %v3066_v0, %v3067_v26  ;;  %v3097_v55 = vpop.permute.xlu1 %3096 }
 0x2e3   :  { %v3071_v21 = vsel %vm2644_vm8, %v3061_v38, %v3070_v14  ;;  %v3103_v15 = vrot.slane %v3097_v55, 4  ;;  %v3095_v54 = vpop.permute.xlu0 %3094 }
 0x2e4   :  { %v3268_v13 = vsel %vm3267_vm10, %v3263_v36, %v3201_v39  ;;  %v3269_v48 = vsel %vm3267_vm10, %v3264_v19, %v3205_v62  ;;  %v3075_v22 = vadd.f32 %v3071_v21, %v2885_v37  ;;  %v3102_v41 = vrot.slane %v3095_v54, 4 }
 0x2e5   :  { %v2953_v36 = vrot.slane %v6156_v60, 4  ;;  %v2952_v19 = vrot.slane %v6160_v49, 4 }
 0x2e6   :  { %v3209_v59 = vrot.slane %v3075_v22, %v6130_v5  ;;  %v3213_v52 = vrot.slane %v3075_v22, %v6132_v23  ;;  %v3106_v53 = vsel %vm2111_vm6, %v3102_v41, %v3103_v15  ;;  %v3101_v57 = vpop.permute.xlu1 %3100 }
 0x2e7   :  { %v3107_v44 = vsel %vm2644_vm8, %v3095_v54, %v3106_v53  ;;  %v3105_v9 = vrot.slane %v3101_v57, 4  ;;  %v3099_v29 = vpop.permute.xlu0 %3098  ;;  %v2956_v32 = vsel %vm2111_vm6, %v2952_v19, %v2953_v36 }
 0x2e8   :  { %v3270_v4 = vsel %vm3267_vm10, %v3265_v58, %v3209_v59  ;;  %v3271_v7 = vsel %vm3267_vm10, %v3266_v25, %v3213_v52  ;;  %v3112_v12 = vadd.f32 %v3107_v44, %v2922_v50  ;;  %v3104_v8 = vrot.slane %v3099_v29, 4 }
 0x2e9   :  { %v2957_v33 = vsel %vm2644_vm8, %v6160_v49, %v2956_v32 }
 0x2ea   :  { %v3223_v63 = vrot.slane %v3112_v12, %v6130_v5  ;;  %v3227_v51 = vrot.slane %v3112_v12, %v6132_v23  ;;  %v3108_v60 = vsel %vm2111_vm6, %v3104_v8, %v3105_v9  ;;  %v3135_v20 = vpop.permute.xlu1 %3134  ;;  %v2961_v0 = vadd.f32 %v2957_v33, %v6100_v45 }
 0x2eb   :  { %v3109_v58 = vsel %vm2644_vm8, %v3099_v29, %v3108_v60  ;;  %v3141_v25 = vrot.slane %v3135_v20, 4  ;;  %v3133_v18 = vpop.permute.xlu0 %3132 }
 0x2ec   :  { %v3273_v40 = vsel %vm3272_vm11, %v3268_v13, %v3223_v63  ;;  %v3274_v3 = vsel %vm3272_vm11, %v3269_v48, %v3227_v51  ;;  %v3113_v6 = vadd.f32 %v3109_v58, %v2923_v61  ;;  %v3140_v1 = vrot.slane %v3133_v18, 4 }
 0x2ee   :  { %v3231_v43 = vrot.slane %v3113_v6, %v6130_v5  ;;  %v3235_v34 = vrot.slane %v3113_v6, %v6132_v23  ;;  %v3144_v42 = vsel %vm2111_vm6, %v3140_v1, %v3141_v25  ;;  %v3139_v35 = vpop.permute.xlu1 %3138 }
 0x2ef   :  { %v3145_v30 = vsel %vm2644_vm8, %v3133_v18, %v3144_v42  ;;  %v3143_v47 = vrot.slane %v3139_v35, 4  ;;  %v3137_v10 = vpop.permute.xlu0 %3136 }
 0x2f0   :  { %v3275_v26 = vsel %vm3272_vm11, %v3270_v4, %v3231_v43  ;;  %v3276_v38 = vsel %vm3272_vm11, %v3271_v7, %v3235_v34  ;;  %v3150_v16 = vadd.f32 %v3145_v30, %v2960_v56  ;;  %v3142_v24 = vrot.slane %v3137_v10, 4 }
 0x2f2   :  { %v3245_v37 = vrot.slane %v3150_v16, %v6130_v5  ;;  %v3249_v2 = vrot.slane %v3150_v16, %v6132_v23  ;;  %v3146_v27 = vsel %vm2111_vm6, %v3142_v24, %v3143_v47 }
 0x2f3   :  { %v3147_v49 = vsel %vm2644_vm8, %v3137_v10, %v3146_v27 }
 0x2f4   :  { %v3277_v11 = vsel %vm2111_vm6, %v3273_v40, %v3245_v37  ;;  %v3278_v28 = vsel %vm2111_vm6, %v3274_v3, %v3249_v2  ;;  %v3151_v39 = vadd.f32 %v3147_v49, %v2961_v0 }
 0x2f5   :  { %3281 = vst [vmem:[%s6248_s3] sm:$0x1f] %v3277_v11  ;;  %3283 = vst.msk [vmem:[%s6248_s3 + $0x8] sm:$0x1f] %vm3282_vm12, %v3278_v28 }
 0x2f6   :  { %v3253_v45 = vrot.slane %v3151_v39, %v6130_v5  ;;  %v3257_v62 = vrot.slane %v3151_v39, %v6132_v23 }
 0x2f8   :  { %v3279_v14 = vsel %vm2111_vm6, %v3275_v26, %v3253_v45  ;;  %v3280_v55 = vsel %vm2111_vm6, %v3276_v38, %v3257_v62 }
 0x2f9   :  { %3284 = vst [vmem:[%s6248_s3 + $0x10] sm:$0x1f] %v3279_v14  ;;  %3285 = vst.msk [vmem:[%s6248_s3 + $0x18] sm:$0x1f] %vm3282_vm12, %v3280_v55 }
 0x2fa   :  { %3290 = vsyncpa [#allocation3], 1 }
 0x2fb   :  { %3291 = vsyncpa [#allocation5], 1 }

</bundles_post_ra>
